<compile_context>
chip_gen: v7x
topology: tpu7x:2x2x1
jax: 0.10.0
libtpu: 0.0.40
codegen_flags: <defaults>
</compile_context>

<pallas_src>
import functools
import random

import jax
import jax.numpy as jnp
from jax.experimental import pallas as pl
from jax.experimental.pallas import tpu as pltpu


# ----------------------------- LSTM cell math -------------------------------

def _sigmoid(x):
    # explicit form (exp + add + div) -- identical math in kernel & reference
    return 1.0 / (1.0 + jnp.exp(-x))


def _gates_to_state(gates, c, hdim):
    """gates: [B, 4H] fused (i,f,g,o). Full-width EUP, then lane slices."""
    sg = _sigmoid(gates)          # i, f, o live here
    tg = jnp.tanh(gates)          # g lives here
    i = sg[:, 0 * hdim:1 * hdim]
    f = sg[:, 1 * hdim:2 * hdim]
    g = tg[:, 2 * hdim:3 * hdim]
    o = sg[:, 3 * hdim:4 * hdim]
    c_new = f * c + i * g
    h_new = o * jnp.tanh(c_new)
    return h_new, c_new


# ------------------------- fused encoder+decoder kernel ----------------------

def _seq2seq_kernel(tf_ref,                               # SMEM [T] int32
                    enc_x_ref, tx_ref, x0_ref,            # [S,B,E],[T,B,E],[B,E]
                    enc_w_ref, enc_b_ref,                 # [E+H,4H],[1,4H]
                    dec_w_ref, dec_b_ref,                 # [E+H,4H],[1,4H]
                    fc_w_ref, fc_b_ref, emb_ref,          # [H,Vp],[1,Vp],[Vp,E]
                    out_ref,                              # [B, T*Vp]
                    xh_s):                                # VMEM [B, E+H]
    S, B, E = enc_x_ref.shape
    T = tx_ref.shape[0]
    H = fc_w_ref.shape[0]
    Vp = fc_b_ref.shape[1]

    enc_b = enc_b_ref[...]
    dec_b = dec_b_ref[...]
    fc_b = fc_b_ref[...]

    h = jnp.zeros((B, H), jnp.float32)
    c = jnp.zeros((B, H), jnp.float32)

    # ---------------- encoder: S fully-unrolled steps ----------------
    for s in range(S):                       # static indices -> full unroll
        xh_s[:, :E] = enc_x_ref[s]
        xh_s[:, E:] = h
        gates = jnp.dot(xh_s[...], enc_w_ref[...],
                        preferred_element_type=jnp.float32) + enc_b
        h, c = _gates_to_state(gates, c, H)

    # ---------------- decoder: T fully-unrolled steps ----------------
    # loop-invariant lane-index iota for the greedy argmax (hoisted once)
    col = jax.lax.broadcasted_iota(jnp.int32, (B, Vp), 1).astype(jnp.float32)

    x = x0_ref[...]                           # <s> embedding
    for t in range(T):
        xh_s[:, :E] = x
        xh_s[:, E:] = h
        gates = jnp.dot(xh_s[...], dec_w_ref[...],
                        preferred_element_type=jnp.float32) + dec_b
        h, c = _gates_to_state(gates, c, H)

        logits = jnp.dot(h, fc_w_ref[...],
                         preferred_element_type=jnp.float32) + fc_b
        # lane-aligned 128-wide slice of the VMEM-resident output block
        out_ref[:, t * Vp:(t + 1) * Vp] = logits

        if t + 1 < T:
            # greedy top-1 (first-max tie break, matching torch.argmax);
            # padded vocab columns carry a -1e30 bias so they never win.
            vmax = jnp.max(logits, axis=-1, keepdims=True)
            cand = jnp.where(logits >= vmax, col, float(Vp))
            top1 = jnp.min(cand, axis=-1, keepdims=True)          # [B, 1]
            onehot = (col == top1).astype(jnp.float32)            # [B, Vp]
            greedy_x = jnp.dot(onehot, emb_ref[...],
                               preferred_element_type=jnp.float32)  # [B, E]
            tf = tf_ref[t]                                        # SMEM scalar
            x = jnp.where(tf > 0, tx_ref[t], greedy_x)


def run_seq2seq(tf_mask, enc_x, teacher_x, x0,
                enc_w, enc_b, dec_w, dec_b, fc_w, fc_b, dec_emb):
    S, B, E = enc_x.shape
    T = teacher_x.shape[0]
    H = fc_w.shape[0]
    Vp = fc_w.shape[1]

    # NOTE: with grid=(1,) every block is loaded exactly once, so the default
    # double-buffering of the resident weight blocks is irrelevant here
    # (would matter -- pl.Buffered(1) / Vp tiling -- only at real model sizes).
    grid_spec = pltpu.PrefetchScalarGridSpec(
        num_scalar_prefetch=1,               # teacher-force mask -> SMEM
        grid=(1,),
        in_specs=[
            pl.BlockSpec((S, B, E), lambda i, tf: (0, 0, 0)),      # enc emb
            pl.BlockSpec((T, B, E), lambda i, tf: (0, 0, 0)),      # teacher emb
            pl.BlockSpec((B, E), lambda i, tf: (0, 0)),            # <s> emb
            pl.BlockSpec((E + H, 4 * H), lambda i, tf: (0, 0)),    # enc LSTM W
            pl.BlockSpec((1, 4 * H), lambda i, tf: (0, 0)),        # enc LSTM b
            pl.BlockSpec((E + H, 4 * H), lambda i, tf: (0, 0)),    # dec LSTM W
            pl.BlockSpec((1, 4 * H), lambda i, tf: (0, 0)),        # dec LSTM b
            pl.BlockSpec((H, Vp), lambda i, tf: (0, 0)),           # fc W
            pl.BlockSpec((1, Vp), lambda i, tf: (0, 0)),           # fc b
            pl.BlockSpec((Vp, E), lambda i, tf: (0, 0)),           # dec emb tbl
        ],
        out_specs=pl.BlockSpec((B, T * Vp), lambda i, tf: (0, 0)),
        scratch_shapes=[pltpu.VMEM((B, E + H), jnp.float32)],      # xh slab
    )
    return pl.pallas_call(
        _seq2seq_kernel,
        grid_spec=grid_spec,
        out_shape=jax.ShapeDtypeStruct((B, T * Vp), jnp.float32),
        compiler_params=pltpu.CompilerParams(
            dimension_semantics=("arbitrary",)),
    )(tf_mask, enc_x, teacher_x, x0,
      enc_w, enc_b, dec_w, dec_b, fc_w, fc_b, dec_emb)


# ------------------------------- Seq2Seq -------------------------------------

def init_params(key, src_vocab, tgt_vocab, emb_dim, hidden):
    """Gate order (i,f,g,o); b = b_ih + b_hh pre-summed; tgt vocab padded to 128."""
    v_pad = ((tgt_vocab + 127) // 128) * 128
    ks = jax.random.split(key, 8)
    s = 0.1
    dec_emb = jnp.zeros((v_pad, emb_dim), jnp.float32)
    dec_emb = dec_emb.at[:tgt_vocab].set(
        s * jax.random.normal(ks[3], (tgt_vocab, emb_dim), jnp.float32))
    fc_w = jnp.zeros((hidden, v_pad), jnp.float32)
    fc_w = fc_w.at[:, :tgt_vocab].set(
        s * jax.random.normal(ks[6], (hidden, tgt_vocab), jnp.float32))
    fc_b = jnp.full((1, v_pad), -1e30, jnp.float32)   # pad cols never win argmax
    fc_b = fc_b.at[:, :tgt_vocab].set(
        s * jax.random.normal(ks[7], (1, tgt_vocab), jnp.float32))
    return dict(
        enc_emb=s * jax.random.normal(ks[0], (src_vocab, emb_dim), jnp.float32),
        enc_w=s * jax.random.normal(ks[1], (emb_dim + hidden, 4 * hidden), jnp.float32),
        enc_b=s * jax.random.normal(ks[2], (1, 4 * hidden), jnp.float32),
        dec_emb=dec_emb,
        dec_w=s * jax.random.normal(ks[4], (emb_dim + hidden, 4 * hidden), jnp.float32),
        dec_b=s * jax.random.normal(ks[5], (1, 4 * hidden), jnp.float32),
        fc_w=fc_w,
        fc_b=fc_b,
    )


@functools.partial(jax.jit, static_argnames=("tgt_vocab",))
def seq2seq_forward(params, input_ids, target_ids, tf_mask, start_token_id,
                    tgt_vocab):
    B_in, _ = input_ids.shape
    T = target_ids.shape[1]
    E = params["enc_emb"].shape[-1]
    Vp = params["fc_w"].shape[1]

    # pad batch to a full f32 sublane (8); padded rows compute independent
    # garbage that is sliced off at the end.
    Bp = ((B_in + 7) // 8) * 8
    pad = Bp - B_in
    ids_src = jnp.pad(input_ids, ((0, pad), (0, 0)))
    ids_tgt = jnp.pad(target_ids, ((0, pad), (0, 0)))

    # one XLA gather each for the whole source / teacher sequences (time-major)
    enc_x = jnp.take(params["enc_emb"], ids_src.T, axis=0)       # [S, Bp, E]
    teacher_x = jnp.take(params["dec_emb"], ids_tgt.T, axis=0)   # [T, Bp, E]
    x0 = jnp.broadcast_to(params["dec_emb"][start_token_id], (Bp, E))

    flat = run_seq2seq(tf_mask.astype(jnp.int32), enc_x, teacher_x, x0,
                       params["enc_w"], params["enc_b"],
                       params["dec_w"], params["dec_b"],
                       params["fc_w"], params["fc_b"], params["dec_emb"])
    # [Bp, T*Vp] -> [Bp, T, Vp] is a free row-major reshape (no transpose pass)
    return flat.reshape(Bp, T, Vp)[:B_in, :, :tgt_vocab]


def seq2seq_reference(params, input_ids, target_ids, tf_mask, start_token_id,
                      tgt_vocab):
    """Plain-JAX reference with the same math as the Pallas kernel."""
    B, S = input_ids.shape
    _, T = target_ids.shape
    H = params["enc_w"].shape[1] // 4

    def step(x, h, c, w, b):
        e = x.shape[-1]
        gates = x @ w[:e] + h @ w[e:] + b
        i = _sigmoid(gates[:, :H])
        f = _sigmoid(gates[:, H:2 * H])
        g = jnp.tanh(gates[:, 2 * H:3 * H])
        o = _sigmoid(gates[:, 3 * H:4 * H])
        c = f * c + i * g
        return o * jnp.tanh(c), c

    h = jnp.zeros((B, H), jnp.float32)
    c = jnp.zeros((B, H), jnp.float32)
    for s in range(S):
        x = params["enc_emb"][input_ids[:, s]]
        h, c = step(x, h, c, params["enc_w"], params["enc_b"])

    dec_in = jnp.full((B,), start_token_id, jnp.int32)
    outs = []
    for t in range(T):
        x = params["dec_emb"][dec_in]
        h, c = step(x, h, c, params["dec_w"], params["dec_b"])
        logits = h @ params["fc_w"] + params["fc_b"]
        outs.append(logits[:, :tgt_vocab])
        top1 = jnp.argmax(logits[:, :tgt_vocab], axis=-1).astype(jnp.int32)
        dec_in = jnp.where(tf_mask[t] > 0, target_ids[:, t], top1)
    return jnp.stack(outs, axis=1)


if __name__ == "__main__":
    B, S_SRC, T_TGT = 2, 8, 8
    SRC_VOCAB, TGT_VOCAB = 64, 64
    EMB, HIDDEN = 32, 32
    START_TOKEN_ID = 1  # stands in for tokenizer.token_to_id('<s>')

    key = jax.random.PRNGKey(0)
    k_par, k_src, k_tgt = jax.random.split(key, 3)
    params = init_params(k_par, SRC_VOCAB, TGT_VOCAB, EMB, HIDDEN)
    input_ids = jax.random.randint(k_src, (B, S_SRC), 0, SRC_VOCAB, jnp.int32)
    target_ids = jax.random.randint(k_tgt, (B, T_TGT), 0, TGT_VOCAB, jnp.int32)

    # correctness check on the fully teacher-forced path (deterministic: no
    # argmax feedback, so tiny matmul-rounding diffs cannot cascade).
    tf_all = jnp.ones((T_TGT,), jnp.int32)
    out_tf = seq2seq_forward(params, input_ids, target_ids, tf_all,
                             START_TOKEN_ID, tgt_vocab=TGT_VOCAB)
    out_tf = jax.block_until_ready(out_tf)
    ref_tf = seq2seq_reference(params, input_ids, target_ids, tf_all,
                               START_TOKEN_ID, TGT_VOCAB)
    assert out_tf.shape == (B, T_TGT, TGT_VOCAB), out_tf.shape
    err = float(jnp.max(jnp.abs(out_tf - ref_tf)))
    assert err < 2e-3, f"mismatch vs reference: {err}"

    # mixed teacher forcing: deterministic coin flips (random.seed(0)) passed
    # as a runtime int32 mask -> no retrace when re-randomized.
    random.seed(0)
    tf_mask = jnp.asarray(
        [1 if random.random() < 0.5 else 0 for _ in range(T_TGT)], jnp.int32)
    out = seq2seq_forward(params, input_ids, target_ids, tf_mask,
                          START_TOKEN_ID, tgt_vocab=TGT_VOCAB)
    out = jax.block_until_ready(out)
    assert out.shape == (B, T_TGT, TGT_VOCAB), out.shape
    assert bool(jnp.all(jnp.isfinite(out)))
    print("KERNEL_OK")
</pallas_src>

<mosaic_0001>
module attributes {stable_mosaic.version = 11 : i64} {
  func.func @_seq2seq_kernel(%arg0: i32, %arg1: memref<8xi32, #tpu.memory_space<smem>>, %arg2: memref<8x8x32xf32, #tpu.memory_space<vmem>>, %arg3: memref<8x8x32xf32, #tpu.memory_space<vmem>>, %arg4: memref<8x32xf32, #tpu.memory_space<vmem>>, %arg5: memref<64x128xf32, #tpu.memory_space<vmem>>, %arg6: memref<1x128xf32, #tpu.memory_space<vmem>>, %arg7: memref<64x128xf32, #tpu.memory_space<vmem>>, %arg8: memref<1x128xf32, #tpu.memory_space<vmem>>, %arg9: memref<32x128xf32, #tpu.memory_space<vmem>>, %arg10: memref<1x128xf32, #tpu.memory_space<vmem>>, %arg11: memref<128x32xf32, #tpu.memory_space<vmem>>, %arg12: memref<8x1024xf32, #tpu.memory_space<vmem>>, %arg13: memref<8x64xf32, #tpu.memory_space<vmem>>) attributes {dimension_semantics = [#tpu.dimension_semantics<arbitrary>], iteration_bounds = array<i64: 1>, scalar_prefetch = 1 : i64, scratch_operands = 1 : i64, tpu.core_type = #tpu.core_type<tc>, window_params = [{pipeline_mode = #tpu.pipeline_mode<synchronous>, transform_indices = @transform_0, window_bounds = array<i64: 8, 8, 32>}, {pipeline_mode = #tpu.pipeline_mode<synchronous>, transform_indices = @transform_1, window_bounds = array<i64: 8, 8, 32>}, {pipeline_mode = #tpu.pipeline_mode<synchronous>, transform_indices = @transform_2, window_bounds = array<i64: 8, 32>}, {pipeline_mode = #tpu.pipeline_mode<synchronous>, transform_indices = @transform_3, window_bounds = array<i64: 64, 128>}, {pipeline_mode = #tpu.pipeline_mode<synchronous>, transform_indices = @transform_4, window_bounds = array<i64: 1, 128>}, {pipeline_mode = #tpu.pipeline_mode<synchronous>, transform_indices = @transform_5, window_bounds = array<i64: 64, 128>}, {pipeline_mode = #tpu.pipeline_mode<synchronous>, transform_indices = @transform_6, window_bounds = array<i64: 1, 128>}, {pipeline_mode = #tpu.pipeline_mode<synchronous>, transform_indices = @transform_7, window_bounds = array<i64: 32, 128>}, {pipeline_mode = #tpu.pipeline_mode<synchronous>, transform_indices = @transform_8, window_bounds = array<i64: 1, 128>}, {pipeline_mode = #tpu.pipeline_mode<synchronous>, transform_indices = @transform_9, window_bounds = array<i64: 128, 32>}, {pipeline_mode = #tpu.pipeline_mode<synchronous>, transform_indices = @transform_10, window_bounds = array<i64: 8, 1024>}]} {
    %c0 = arith.constant 0 : index
    %c0_0 = arith.constant 0 : index
    %0 = vector.load %arg6[%c0, %c0_0] : memref<1x128xf32, #tpu.memory_space<vmem>>, vector<1x128xf32>
    %c0_1 = arith.constant 0 : index
    %c0_2 = arith.constant 0 : index
    %1 = vector.load %arg8[%c0_1, %c0_2] : memref<1x128xf32, #tpu.memory_space<vmem>>, vector<1x128xf32>
    %c0_3 = arith.constant 0 : index
    %c0_4 = arith.constant 0 : index
    %2 = vector.load %arg10[%c0_3, %c0_4] : memref<1x128xf32, #tpu.memory_space<vmem>>, vector<1x128xf32>
    %cst = arith.constant 0.000000e+00 : f32
    %3 = vector.broadcast %cst : f32 to vector<8x32xf32>
    %cst_5 = arith.constant 0.000000e+00 : f32
    %4 = vector.broadcast %cst_5 : f32 to vector<8x32xf32>
    %c0_6 = arith.constant 0 : index
    %c0_7 = arith.constant 0 : index
    %c0_8 = arith.constant 0 : index
    %5 = vector.load %arg2[%c0_6, %c0_7, %c0_8] : memref<8x8x32xf32, #tpu.memory_space<vmem>>, vector<1x8x32xf32>
    %6 = vector.shape_cast %5 : vector<1x8x32xf32> to vector<8x32xf32>
    %c0_9 = arith.constant 0 : index
    %c0_10 = arith.constant 0 : index
    %7 = vector.load %arg13[%c0_9, %c0_10] : memref<8x64xf32, #tpu.memory_space<vmem>>, vector<8x32xf32>
    tpu.vector_store %arg13[%c0_9, %c0_10], %6 {strides = array<i32>} : memref<8x64xf32, #tpu.memory_space<vmem>>, vector<8x32xf32>,
    %c0_11 = arith.constant 0 : index
    %c32 = arith.constant 32 : index
    %8 = vector.load %arg13[%c0_11, %c32] : memref<8x64xf32, #tpu.memory_space<vmem>>, vector<8x32xf32>
    tpu.vector_store %arg13[%c0_11, %c32], %3 {strides = array<i32>} : memref<8x64xf32, #tpu.memory_space<vmem>>, vector<8x32xf32>,
    %c0_12 = arith.constant 0 : index
    %c0_13 = arith.constant 0 : index
    %9 = vector.load %arg13[%c0_12, %c0_13] : memref<8x64xf32, #tpu.memory_space<vmem>>, vector<8x64xf32>
    %c0_14 = arith.constant 0 : index
    %c0_15 = arith.constant 0 : index
    %10 = vector.load %arg5[%c0_14, %c0_15] : memref<64x128xf32, #tpu.memory_space<vmem>>, vector<64x128xf32>
    %cst_16 = arith.constant dense<0.000000e+00> : vector<8x128xf32>
    %11 = tpu.matmul %9, %10, %cst_16 {dimension_numbers = #tpu.dot_dimension_numbers<[1], [0], [0], [1], [0, 0, 1, 1], [], []>} : vector<8x64xf32>, vector<64x128xf32>, vector<8x128xf32> -> vector<8x128xf32>
    %12 = vector.broadcast %0 : vector<1x128xf32> to vector<8x128xf32>
    %13 = arith.addf %11, %12 : vector<8x128xf32>
    %cst_17 = arith.constant 0.000000e+00 : f32
    %14 = vector.broadcast %cst_17 : f32 to vector<8x128xf32>
    %15 = arith.subf %14, %13 : vector<8x128xf32>
    %16 = math.exp %15 : vector<8x128xf32>
    %cst_18 = arith.constant 1.000000e+00 : f32
    %17 = vector.broadcast %cst_18 : f32 to vector<8x128xf32>
    %18 = arith.addf %17, %16 : vector<8x128xf32>
    %cst_19 = arith.constant 1.000000e+00 : f32
    %19 = vector.broadcast %cst_19 : f32 to vector<8x128xf32>
    %20 = arith.divf %19, %18 : vector<8x128xf32>
    %21 = math.tanh %13 : vector<8x128xf32>
    %22 = vector.extract_strided_slice %20 {offsets = [0, 0], sizes = [8, 32], strides = [1, 1]} : vector<8x128xf32> to vector<8x32xf32>
    %23 = vector.extract_strided_slice %20 {offsets = [0, 32], sizes = [8, 32], strides = [1, 1]} : vector<8x128xf32> to vector<8x32xf32>
    %24 = vector.extract_strided_slice %21 {offsets = [0, 64], sizes = [8, 32], strides = [1, 1]} : vector<8x128xf32> to vector<8x32xf32>
    %25 = vector.extract_strided_slice %20 {offsets = [0, 96], sizes = [8, 32], strides = [1, 1]} : vector<8x128xf32> to vector<8x32xf32>
    %26 = arith.mulf %23, %4 : vector<8x32xf32>
    %27 = arith.mulf %22, %24 : vector<8x32xf32>
    %28 = arith.addf %26, %27 : vector<8x32xf32>
    %29 = math.tanh %28 : vector<8x32xf32>
    %30 = arith.mulf %25, %29 : vector<8x32xf32>
    %c1 = arith.constant 1 : index
    %c0_20 = arith.constant 0 : index
    %c0_21 = arith.constant 0 : index
    %31 = vector.load %arg2[%c1, %c0_20, %c0_21] : memref<8x8x32xf32, #tpu.memory_space<vmem>>, vector<1x8x32xf32>
    %32 = vector.shape_cast %31 : vector<1x8x32xf32> to vector<8x32xf32>
    %c0_22 = arith.constant 0 : index
    %c0_23 = arith.constant 0 : index
    %33 = vector.load %arg13[%c0_22, %c0_23] : memref<8x64xf32, #tpu.memory_space<vmem>>, vector<8x32xf32>
    tpu.vector_store %arg13[%c0_22, %c0_23], %32 {strides = array<i32>} : memref<8x64xf32, #tpu.memory_space<vmem>>, vector<8x32xf32>,
    %c0_24 = arith.constant 0 : index
    %c32_25 = arith.constant 32 : index
    %34 = vector.load %arg13[%c0_24, %c32_25] : memref<8x64xf32, #tpu.memory_space<vmem>>, vector<8x32xf32>
    tpu.vector_store %arg13[%c0_24, %c32_25], %30 {strides = array<i32>} : memref<8x64xf32, #tpu.memory_space<vmem>>, vector<8x32xf32>,
    %c0_26 = arith.constant 0 : index
    %c0_27 = arith.constant 0 : index
    %35 = vector.load %arg13[%c0_26, %c0_27] : memref<8x64xf32, #tpu.memory_space<vmem>>, vector<8x64xf32>
    %c0_28 = arith.constant 0 : index
    %c0_29 = arith.constant 0 : index
    %36 = vector.load %arg5[%c0_28, %c0_29] : memref<64x128xf32, #tpu.memory_space<vmem>>, vector<64x128xf32>
    %cst_30 = arith.constant dense<0.000000e+00> : vector<8x128xf32>
    %37 = tpu.matmul %35, %36, %cst_30 {dimension_numbers = #tpu.dot_dimension_numbers<[1], [0], [0], [1], [0, 0, 1, 1], [], []>} : vector<8x64xf32>, vector<64x128xf32>, vector<8x128xf32> -> vector<8x128xf32>
    %38 = vector.broadcast %0 : vector<1x128xf32> to vector<8x128xf32>
    %39 = arith.addf %37, %38 : vector<8x128xf32>
    %cst_31 = arith.constant 0.000000e+00 : f32
    %40 = vector.broadcast %cst_31 : f32 to vector<8x128xf32>
    %41 = arith.subf %40, %39 : vector<8x128xf32>
    %42 = math.exp %41 : vector<8x128xf32>
    %cst_32 = arith.constant 1.000000e+00 : f32
    %43 = vector.broadcast %cst_32 : f32 to vector<8x128xf32>
    %44 = arith.addf %43, %42 : vector<8x128xf32>
    %cst_33 = arith.constant 1.000000e+00 : f32
    %45 = vector.broadcast %cst_33 : f32 to vector<8x128xf32>
    %46 = arith.divf %45, %44 : vector<8x128xf32>
    %47 = math.tanh %39 : vector<8x128xf32>
    %48 = vector.extract_strided_slice %46 {offsets = [0, 0], sizes = [8, 32], strides = [1, 1]} : vector<8x128xf32> to vector<8x32xf32>
    %49 = vector.extract_strided_slice %46 {offsets = [0, 32], sizes = [8, 32], strides = [1, 1]} : vector<8x128xf32> to vector<8x32xf32>
    %50 = vector.extract_strided_slice %47 {offsets = [0, 64], sizes = [8, 32], strides = [1, 1]} : vector<8x128xf32> to vector<8x32xf32>
    %51 = vector.extract_strided_slice %46 {offsets = [0, 96], sizes = [8, 32], strides = [1, 1]} : vector<8x128xf32> to vector<8x32xf32>
    %52 = arith.mulf %49, %28 : vector<8x32xf32>
    %53 = arith.mulf %48, %50 : vector<8x32xf32>
    %54 = arith.addf %52, %53 : vector<8x32xf32>
    %55 = math.tanh %54 : vector<8x32xf32>
    %56 = arith.mulf %51, %55 : vector<8x32xf32>
    %c2 = arith.constant 2 : index
    %c0_34 = arith.constant 0 : index
    %c0_35 = arith.constant 0 : index
    %57 = vector.load %arg2[%c2, %c0_34, %c0_35] : memref<8x8x32xf32, #tpu.memory_space<vmem>>, vector<1x8x32xf32>
    %58 = vector.shape_cast %57 : vector<1x8x32xf32> to vector<8x32xf32>
    %c0_36 = arith.constant 0 : index
    %c0_37 = arith.constant 0 : index
    %59 = vector.load %arg13[%c0_36, %c0_37] : memref<8x64xf32, #tpu.memory_space<vmem>>, vector<8x32xf32>
    tpu.vector_store %arg13[%c0_36, %c0_37], %58 {strides = array<i32>} : memref<8x64xf32, #tpu.memory_space<vmem>>, vector<8x32xf32>,
    %c0_38 = arith.constant 0 : index
    %c32_39 = arith.constant 32 : index
    %60 = vector.load %arg13[%c0_38, %c32_39] : memref<8x64xf32, #tpu.memory_space<vmem>>, vector<8x32xf32>
    tpu.vector_store %arg13[%c0_38, %c32_39], %56 {strides = array<i32>} : memref<8x64xf32, #tpu.memory_space<vmem>>, vector<8x32xf32>,
    %c0_40 = arith.constant 0 : index
    %c0_41 = arith.constant 0 : index
    %61 = vector.load %arg13[%c0_40, %c0_41] : memref<8x64xf32, #tpu.memory_space<vmem>>, vector<8x64xf32>
    %c0_42 = arith.constant 0 : index
    %c0_43 = arith.constant 0 : index
    %62 = vector.load %arg5[%c0_42, %c0_43] : memref<64x128xf32, #tpu.memory_space<vmem>>, vector<64x128xf32>
    %cst_44 = arith.constant dense<0.000000e+00> : vector<8x128xf32>
    %63 = tpu.matmul %61, %62, %cst_44 {dimension_numbers = #tpu.dot_dimension_numbers<[1], [0], [0], [1], [0, 0, 1, 1], [], []>} : vector<8x64xf32>, vector<64x128xf32>, vector<8x128xf32> -> vector<8x128xf32>
    %64 = vector.broadcast %0 : vector<1x128xf32> to vector<8x128xf32>
    %65 = arith.addf %63, %64 : vector<8x128xf32>
    %cst_45 = arith.constant 0.000000e+00 : f32
    %66 = vector.broadcast %cst_45 : f32 to vector<8x128xf32>
    %67 = arith.subf %66, %65 : vector<8x128xf32>
    %68 = math.exp %67 : vector<8x128xf32>
    %cst_46 = arith.constant 1.000000e+00 : f32
    %69 = vector.broadcast %cst_46 : f32 to vector<8x128xf32>
    %70 = arith.addf %69, %68 : vector<8x128xf32>
    %cst_47 = arith.constant 1.000000e+00 : f32
    %71 = vector.broadcast %cst_47 : f32 to vector<8x128xf32>
    %72 = arith.divf %71, %70 : vector<8x128xf32>
    %73 = math.tanh %65 : vector<8x128xf32>
    %74 = vector.extract_strided_slice %72 {offsets = [0, 0], sizes = [8, 32], strides = [1, 1]} : vector<8x128xf32> to vector<8x32xf32>
    %75 = vector.extract_strided_slice %72 {offsets = [0, 32], sizes = [8, 32], strides = [1, 1]} : vector<8x128xf32> to vector<8x32xf32>
    %76 = vector.extract_strided_slice %73 {offsets = [0, 64], sizes = [8, 32], strides = [1, 1]} : vector<8x128xf32> to vector<8x32xf32>
    %77 = vector.extract_strided_slice %72 {offsets = [0, 96], sizes = [8, 32], strides = [1, 1]} : vector<8x128xf32> to vector<8x32xf32>
    %78 = arith.mulf %75, %54 : vector<8x32xf32>
    %79 = arith.mulf %74, %76 : vector<8x32xf32>
    %80 = arith.addf %78, %79 : vector<8x32xf32>
    %81 = math.tanh %80 : vector<8x32xf32>
    %82 = arith.mulf %77, %81 : vector<8x32xf32>
    %c3 = arith.constant 3 : index
    %c0_48 = arith.constant 0 : index
    %c0_49 = arith.constant 0 : index
    %83 = vector.load %arg2[%c3, %c0_48, %c0_49] : memref<8x8x32xf32, #tpu.memory_space<vmem>>, vector<1x8x32xf32>
    %84 = vector.shape_cast %83 : vector<1x8x32xf32> to vector<8x32xf32>
    %c0_50 = arith.constant 0 : index
    %c0_51 = arith.constant 0 : index
    %85 = vector.load %arg13[%c0_50, %c0_51] : memref<8x64xf32, #tpu.memory_space<vmem>>, vector<8x32xf32>
    tpu.vector_store %arg13[%c0_50, %c0_51], %84 {strides = array<i32>} : memref<8x64xf32, #tpu.memory_space<vmem>>, vector<8x32xf32>,
    %c0_52 = arith.constant 0 : index
    %c32_53 = arith.constant 32 : index
    %86 = vector.load %arg13[%c0_52, %c32_53] : memref<8x64xf32, #tpu.memory_space<vmem>>, vector<8x32xf32>
    tpu.vector_store %arg13[%c0_52, %c32_53], %82 {strides = array<i32>} : memref<8x64xf32, #tpu.memory_space<vmem>>, vector<8x32xf32>,
    %c0_54 = arith.constant 0 : index
    %c0_55 = arith.constant 0 : index
    %87 = vector.load %arg13[%c0_54, %c0_55] : memref<8x64xf32, #tpu.memory_space<vmem>>, vector<8x64xf32>
    %c0_56 = arith.constant 0 : index
    %c0_57 = arith.constant 0 : index
    %88 = vector.load %arg5[%c0_56, %c0_57] : memref<64x128xf32, #tpu.memory_space<vmem>>, vector<64x128xf32>
    %cst_58 = arith.constant dense<0.000000e+00> : vector<8x128xf32>
    %89 = tpu.matmul %87, %88, %cst_58 {dimension_numbers = #tpu.dot_dimension_numbers<[1], [0], [0], [1], [0, 0, 1, 1], [], []>} : vector<8x64xf32>, vector<64x128xf32>, vector<8x128xf32> -> vector<8x128xf32>
    %90 = vector.broadcast %0 : vector<1x128xf32> to vector<8x128xf32>
    %91 = arith.addf %89, %90 : vector<8x128xf32>
    %cst_59 = arith.constant 0.000000e+00 : f32
    %92 = vector.broadcast %cst_59 : f32 to vector<8x128xf32>
    %93 = arith.subf %92, %91 : vector<8x128xf32>
    %94 = math.exp %93 : vector<8x128xf32>
    %cst_60 = arith.constant 1.000000e+00 : f32
    %95 = vector.broadcast %cst_60 : f32 to vector<8x128xf32>
    %96 = arith.addf %95, %94 : vector<8x128xf32>
    %cst_61 = arith.constant 1.000000e+00 : f32
    %97 = vector.broadcast %cst_61 : f32 to vector<8x128xf32>
    %98 = arith.divf %97, %96 : vector<8x128xf32>
    %99 = math.tanh %91 : vector<8x128xf32>
    %100 = vector.extract_strided_slice %98 {offsets = [0, 0], sizes = [8, 32], strides = [1, 1]} : vector<8x128xf32> to vector<8x32xf32>
    %101 = vector.extract_strided_slice %98 {offsets = [0, 32], sizes = [8, 32], strides = [1, 1]} : vector<8x128xf32> to vector<8x32xf32>
    %102 = vector.extract_strided_slice %99 {offsets = [0, 64], sizes = [8, 32], strides = [1, 1]} : vector<8x128xf32> to vector<8x32xf32>
    %103 = vector.extract_strided_slice %98 {offsets = [0, 96], sizes = [8, 32], strides = [1, 1]} : vector<8x128xf32> to vector<8x32xf32>
    %104 = arith.mulf %101, %80 : vector<8x32xf32>
    %105 = arith.mulf %100, %102 : vector<8x32xf32>
    %106 = arith.addf %104, %105 : vector<8x32xf32>
    %107 = math.tanh %106 : vector<8x32xf32>
    %108 = arith.mulf %103, %107 : vector<8x32xf32>
    %c4 = arith.constant 4 : index
    %c0_62 = arith.constant 0 : index
    %c0_63 = arith.constant 0 : index
    %109 = vector.load %arg2[%c4, %c0_62, %c0_63] : memref<8x8x32xf32, #tpu.memory_space<vmem>>, vector<1x8x32xf32>
    %110 = vector.shape_cast %109 : vector<1x8x32xf32> to vector<8x32xf32>
    %c0_64 = arith.constant 0 : index
    %c0_65 = arith.constant 0 : index
    %111 = vector.load %arg13[%c0_64, %c0_65] : memref<8x64xf32, #tpu.memory_space<vmem>>, vector<8x32xf32>
    tpu.vector_store %arg13[%c0_64, %c0_65], %110 {strides = array<i32>} : memref<8x64xf32, #tpu.memory_space<vmem>>, vector<8x32xf32>,
    %c0_66 = arith.constant 0 : index
    %c32_67 = arith.constant 32 : index
    %112 = vector.load %arg13[%c0_66, %c32_67] : memref<8x64xf32, #tpu.memory_space<vmem>>, vector<8x32xf32>
    tpu.vector_store %arg13[%c0_66, %c32_67], %108 {strides = array<i32>} : memref<8x64xf32, #tpu.memory_space<vmem>>, vector<8x32xf32>,
    %c0_68 = arith.constant 0 : index
    %c0_69 = arith.constant 0 : index
    %113 = vector.load %arg13[%c0_68, %c0_69] : memref<8x64xf32, #tpu.memory_space<vmem>>, vector<8x64xf32>
    %c0_70 = arith.constant 0 : index
    %c0_71 = arith.constant 0 : index
    %114 = vector.load %arg5[%c0_70, %c0_71] : memref<64x128xf32, #tpu.memory_space<vmem>>, vector<64x128xf32>
    %cst_72 = arith.constant dense<0.000000e+00> : vector<8x128xf32>
    %115 = tpu.matmul %113, %114, %cst_72 {dimension_numbers = #tpu.dot_dimension_numbers<[1], [0], [0], [1], [0, 0, 1, 1], [], []>} : vector<8x64xf32>, vector<64x128xf32>, vector<8x128xf32> -> vector<8x128xf32>
    %116 = vector.broadcast %0 : vector<1x128xf32> to vector<8x128xf32>
    %117 = arith.addf %115, %116 : vector<8x128xf32>
    %cst_73 = arith.constant 0.000000e+00 : f32
    %118 = vector.broadcast %cst_73 : f32 to vector<8x128xf32>
    %119 = arith.subf %118, %117 : vector<8x128xf32>
    %120 = math.exp %119 : vector<8x128xf32>
    %cst_74 = arith.constant 1.000000e+00 : f32
    %121 = vector.broadcast %cst_74 : f32 to vector<8x128xf32>
    %122 = arith.addf %121, %120 : vector<8x128xf32>
    %cst_75 = arith.constant 1.000000e+00 : f32
    %123 = vector.broadcast %cst_75 : f32 to vector<8x128xf32>
    %124 = arith.divf %123, %122 : vector<8x128xf32>
    %125 = math.tanh %117 : vector<8x128xf32>
    %126 = vector.extract_strided_slice %124 {offsets = [0, 0], sizes = [8, 32], strides = [1, 1]} : vector<8x128xf32> to vector<8x32xf32>
    %127 = vector.extract_strided_slice %124 {offsets = [0, 32], sizes = [8, 32], strides = [1, 1]} : vector<8x128xf32> to vector<8x32xf32>
    %128 = vector.extract_strided_slice %125 {offsets = [0, 64], sizes = [8, 32], strides = [1, 1]} : vector<8x128xf32> to vector<8x32xf32>
    %129 = vector.extract_strided_slice %124 {offsets = [0, 96], sizes = [8, 32], strides = [1, 1]} : vector<8x128xf32> to vector<8x32xf32>
    %130 = arith.mulf %127, %106 : vector<8x32xf32>
    %131 = arith.mulf %126, %128 : vector<8x32xf32>
    %132 = arith.addf %130, %131 : vector<8x32xf32>
    %133 = math.tanh %132 : vector<8x32xf32>
    %134 = arith.mulf %129, %133 : vector<8x32xf32>
    %c5 = arith.constant 5 : index
    %c0_76 = arith.constant 0 : index
    %c0_77 = arith.constant 0 : index
    %135 = vector.load %arg2[%c5, %c0_76, %c0_77] : memref<8x8x32xf32, #tpu.memory_space<vmem>>, vector<1x8x32xf32>
    %136 = vector.shape_cast %135 : vector<1x8x32xf32> to vector<8x32xf32>
    %c0_78 = arith.constant 0 : index
    %c0_79 = arith.constant 0 : index
    %137 = vector.load %arg13[%c0_78, %c0_79] : memref<8x64xf32, #tpu.memory_space<vmem>>, vector<8x32xf32>
    tpu.vector_store %arg13[%c0_78, %c0_79], %136 {strides = array<i32>} : memref<8x64xf32, #tpu.memory_space<vmem>>, vector<8x32xf32>,
    %c0_80 = arith.constant 0 : index
    %c32_81 = arith.constant 32 : index
    %138 = vector.load %arg13[%c0_80, %c32_81] : memref<8x64xf32, #tpu.memory_space<vmem>>, vector<8x32xf32>
    tpu.vector_store %arg13[%c0_80, %c32_81], %134 {strides = array<i32>} : memref<8x64xf32, #tpu.memory_space<vmem>>, vector<8x32xf32>,
    %c0_82 = arith.constant 0 : index
    %c0_83 = arith.constant 0 : index
    %139 = vector.load %arg13[%c0_82, %c0_83] : memref<8x64xf32, #tpu.memory_space<vmem>>, vector<8x64xf32>
    %c0_84 = arith.constant 0 : index
    %c0_85 = arith.constant 0 : index
    %140 = vector.load %arg5[%c0_84, %c0_85] : memref<64x128xf32, #tpu.memory_space<vmem>>, vector<64x128xf32>
    %cst_86 = arith.constant dense<0.000000e+00> : vector<8x128xf32>
    %141 = tpu.matmul %139, %140, %cst_86 {dimension_numbers = #tpu.dot_dimension_numbers<[1], [0], [0], [1], [0, 0, 1, 1], [], []>} : vector<8x64xf32>, vector<64x128xf32>, vector<8x128xf32> -> vector<8x128xf32>
    %142 = vector.broadcast %0 : vector<1x128xf32> to vector<8x128xf32>
    %143 = arith.addf %141, %142 : vector<8x128xf32>
    %cst_87 = arith.constant 0.000000e+00 : f32
    %144 = vector.broadcast %cst_87 : f32 to vector<8x128xf32>
    %145 = arith.subf %144, %143 : vector<8x128xf32>
    %146 = math.exp %145 : vector<8x128xf32>
    %cst_88 = arith.constant 1.000000e+00 : f32
    %147 = vector.broadcast %cst_88 : f32 to vector<8x128xf32>
    %148 = arith.addf %147, %146 : vector<8x128xf32>
    %cst_89 = arith.constant 1.000000e+00 : f32
    %149 = vector.broadcast %cst_89 : f32 to vector<8x128xf32>
    %150 = arith.divf %149, %148 : vector<8x128xf32>
    %151 = math.tanh %143 : vector<8x128xf32>
    %152 = vector.extract_strided_slice %150 {offsets = [0, 0], sizes = [8, 32], strides = [1, 1]} : vector<8x128xf32> to vector<8x32xf32>
    %153 = vector.extract_strided_slice %150 {offsets = [0, 32], sizes = [8, 32], strides = [1, 1]} : vector<8x128xf32> to vector<8x32xf32>
    %154 = vector.extract_strided_slice %151 {offsets = [0, 64], sizes = [8, 32], strides = [1, 1]} : vector<8x128xf32> to vector<8x32xf32>
    %155 = vector.extract_strided_slice %150 {offsets = [0, 96], sizes = [8, 32], strides = [1, 1]} : vector<8x128xf32> to vector<8x32xf32>
    %156 = arith.mulf %153, %132 : vector<8x32xf32>
    %157 = arith.mulf %152, %154 : vector<8x32xf32>
    %158 = arith.addf %156, %157 : vector<8x32xf32>
    %159 = math.tanh %158 : vector<8x32xf32>
    %160 = arith.mulf %155, %159 : vector<8x32xf32>
    %c6 = arith.constant 6 : index
    %c0_90 = arith.constant 0 : index
    %c0_91 = arith.constant 0 : index
    %161 = vector.load %arg2[%c6, %c0_90, %c0_91] : memref<8x8x32xf32, #tpu.memory_space<vmem>>, vector<1x8x32xf32>
    %162 = vector.shape_cast %161 : vector<1x8x32xf32> to vector<8x32xf32>
    %c0_92 = arith.constant 0 : index
    %c0_93 = arith.constant 0 : index
    %163 = vector.load %arg13[%c0_92, %c0_93] : memref<8x64xf32, #tpu.memory_space<vmem>>, vector<8x32xf32>
    tpu.vector_store %arg13[%c0_92, %c0_93], %162 {strides = array<i32>} : memref<8x64xf32, #tpu.memory_space<vmem>>, vector<8x32xf32>,
    %c0_94 = arith.constant 0 : index
    %c32_95 = arith.constant 32 : index
    %164 = vector.load %arg13[%c0_94, %c32_95] : memref<8x64xf32, #tpu.memory_space<vmem>>, vector<8x32xf32>
    tpu.vector_store %arg13[%c0_94, %c32_95], %160 {strides = array<i32>} : memref<8x64xf32, #tpu.memory_space<vmem>>, vector<8x32xf32>,
    %c0_96 = arith.constant 0 : index
    %c0_97 = arith.constant 0 : index
    %165 = vector.load %arg13[%c0_96, %c0_97] : memref<8x64xf32, #tpu.memory_space<vmem>>, vector<8x64xf32>
    %c0_98 = arith.constant 0 : index
    %c0_99 = arith.constant 0 : index
    %166 = vector.load %arg5[%c0_98, %c0_99] : memref<64x128xf32, #tpu.memory_space<vmem>>, vector<64x128xf32>
    %cst_100 = arith.constant dense<0.000000e+00> : vector<8x128xf32>
    %167 = tpu.matmul %165, %166, %cst_100 {dimension_numbers = #tpu.dot_dimension_numbers<[1], [0], [0], [1], [0, 0, 1, 1], [], []>} : vector<8x64xf32>, vector<64x128xf32>, vector<8x128xf32> -> vector<8x128xf32>
    %168 = vector.broadcast %0 : vector<1x128xf32> to vector<8x128xf32>
    %169 = arith.addf %167, %168 : vector<8x128xf32>
    %cst_101 = arith.constant 0.000000e+00 : f32
    %170 = vector.broadcast %cst_101 : f32 to vector<8x128xf32>
    %171 = arith.subf %170, %169 : vector<8x128xf32>
    %172 = math.exp %171 : vector<8x128xf32>
    %cst_102 = arith.constant 1.000000e+00 : f32
    %173 = vector.broadcast %cst_102 : f32 to vector<8x128xf32>
    %174 = arith.addf %173, %172 : vector<8x128xf32>
    %cst_103 = arith.constant 1.000000e+00 : f32
    %175 = vector.broadcast %cst_103 : f32 to vector<8x128xf32>
    %176 = arith.divf %175, %174 : vector<8x128xf32>
    %177 = math.tanh %169 : vector<8x128xf32>
    %178 = vector.extract_strided_slice %176 {offsets = [0, 0], sizes = [8, 32], strides = [1, 1]} : vector<8x128xf32> to vector<8x32xf32>
    %179 = vector.extract_strided_slice %176 {offsets = [0, 32], sizes = [8, 32], strides = [1, 1]} : vector<8x128xf32> to vector<8x32xf32>
    %180 = vector.extract_strided_slice %177 {offsets = [0, 64], sizes = [8, 32], strides = [1, 1]} : vector<8x128xf32> to vector<8x32xf32>
    %181 = vector.extract_strided_slice %176 {offsets = [0, 96], sizes = [8, 32], strides = [1, 1]} : vector<8x128xf32> to vector<8x32xf32>
    %182 = arith.mulf %179, %158 : vector<8x32xf32>
    %183 = arith.mulf %178, %180 : vector<8x32xf32>
    %184 = arith.addf %182, %183 : vector<8x32xf32>
    %185 = math.tanh %184 : vector<8x32xf32>
    %186 = arith.mulf %181, %185 : vector<8x32xf32>
    %c7 = arith.constant 7 : index
    %c0_104 = arith.constant 0 : index
    %c0_105 = arith.constant 0 : index
    %187 = vector.load %arg2[%c7, %c0_104, %c0_105] : memref<8x8x32xf32, #tpu.memory_space<vmem>>, vector<1x8x32xf32>
    %188 = vector.shape_cast %187 : vector<1x8x32xf32> to vector<8x32xf32>
    %c0_106 = arith.constant 0 : index
    %c0_107 = arith.constant 0 : index
    %189 = vector.load %arg13[%c0_106, %c0_107] : memref<8x64xf32, #tpu.memory_space<vmem>>, vector<8x32xf32>
    tpu.vector_store %arg13[%c0_106, %c0_107], %188 {strides = array<i32>} : memref<8x64xf32, #tpu.memory_space<vmem>>, vector<8x32xf32>,
    %c0_108 = arith.constant 0 : index
    %c32_109 = arith.constant 32 : index
    %190 = vector.load %arg13[%c0_108, %c32_109] : memref<8x64xf32, #tpu.memory_space<vmem>>, vector<8x32xf32>
    tpu.vector_store %arg13[%c0_108, %c32_109], %186 {strides = array<i32>} : memref<8x64xf32, #tpu.memory_space<vmem>>, vector<8x32xf32>,
    %c0_110 = arith.constant 0 : index
    %c0_111 = arith.constant 0 : index
    %191 = vector.load %arg13[%c0_110, %c0_111] : memref<8x64xf32, #tpu.memory_space<vmem>>, vector<8x64xf32>
    %c0_112 = arith.constant 0 : index
    %c0_113 = arith.constant 0 : index
    %192 = vector.load %arg5[%c0_112, %c0_113] : memref<64x128xf32, #tpu.memory_space<vmem>>, vector<64x128xf32>
    %cst_114 = arith.constant dense<0.000000e+00> : vector<8x128xf32>
    %193 = tpu.matmul %191, %192, %cst_114 {dimension_numbers = #tpu.dot_dimension_numbers<[1], [0], [0], [1], [0, 0, 1, 1], [], []>} : vector<8x64xf32>, vector<64x128xf32>, vector<8x128xf32> -> vector<8x128xf32>
    %194 = vector.broadcast %0 : vector<1x128xf32> to vector<8x128xf32>
    %195 = arith.addf %193, %194 : vector<8x128xf32>
    %cst_115 = arith.constant 0.000000e+00 : f32
    %196 = vector.broadcast %cst_115 : f32 to vector<8x128xf32>
    %197 = arith.subf %196, %195 : vector<8x128xf32>
    %198 = math.exp %197 : vector<8x128xf32>
    %cst_116 = arith.constant 1.000000e+00 : f32
    %199 = vector.broadcast %cst_116 : f32 to vector<8x128xf32>
    %200 = arith.addf %199, %198 : vector<8x128xf32>
    %cst_117 = arith.constant 1.000000e+00 : f32
    %201 = vector.broadcast %cst_117 : f32 to vector<8x128xf32>
    %202 = arith.divf %201, %200 : vector<8x128xf32>
    %203 = math.tanh %195 : vector<8x128xf32>
    %204 = vector.extract_strided_slice %202 {offsets = [0, 0], sizes = [8, 32], strides = [1, 1]} : vector<8x128xf32> to vector<8x32xf32>
    %205 = vector.extract_strided_slice %202 {offsets = [0, 32], sizes = [8, 32], strides = [1, 1]} : vector<8x128xf32> to vector<8x32xf32>
    %206 = vector.extract_strided_slice %203 {offsets = [0, 64], sizes = [8, 32], strides = [1, 1]} : vector<8x128xf32> to vector<8x32xf32>
    %207 = vector.extract_strided_slice %202 {offsets = [0, 96], sizes = [8, 32], strides = [1, 1]} : vector<8x128xf32> to vector<8x32xf32>
    %208 = arith.mulf %205, %184 : vector<8x32xf32>
    %209 = arith.mulf %204, %206 : vector<8x32xf32>
    %210 = arith.addf %208, %209 : vector<8x32xf32>
    %211 = math.tanh %210 : vector<8x32xf32>
    %212 = arith.mulf %207, %211 : vector<8x32xf32>
    %213 = tpu.iota {dimensions = array<i32: 1>} : vector<8x128xi32>
    %214 = arith.sitofp %213 : vector<8x128xi32> to vector<8x128xf32>
    %c0_118 = arith.constant 0 : index
    %c0_119 = arith.constant 0 : index
    %215 = vector.load %arg4[%c0_118, %c0_119] : memref<8x32xf32, #tpu.memory_space<vmem>>, vector<8x32xf32>
    %c0_120 = arith.constant 0 : index
    %c0_121 = arith.constant 0 : index
    %216 = vector.load %arg13[%c0_120, %c0_121] : memref<8x64xf32, #tpu.memory_space<vmem>>, vector<8x32xf32>
    tpu.vector_store %arg13[%c0_120, %c0_121], %215 {strides = array<i32>} : memref<8x64xf32, #tpu.memory_space<vmem>>, vector<8x32xf32>,
    %c0_122 = arith.constant 0 : index
    %c32_123 = arith.constant 32 : index
    %217 = vector.load %arg13[%c0_122, %c32_123] : memref<8x64xf32, #tpu.memory_space<vmem>>, vector<8x32xf32>
    tpu.vector_store %arg13[%c0_122, %c32_123], %212 {strides = array<i32>} : memref<8x64xf32, #tpu.memory_space<vmem>>, vector<8x32xf32>,
    %c0_124 = arith.constant 0 : index
    %c0_125 = arith.constant 0 : index
    %218 = vector.load %arg13[%c0_124, %c0_125] : memref<8x64xf32, #tpu.memory_space<vmem>>, vector<8x64xf32>
    %c0_126 = arith.constant 0 : index
    %c0_127 = arith.constant 0 : index
    %219 = vector.load %arg7[%c0_126, %c0_127] : memref<64x128xf32, #tpu.memory_space<vmem>>, vector<64x128xf32>
    %cst_128 = arith.constant dense<0.000000e+00> : vector<8x128xf32>
    %220 = tpu.matmul %218, %219, %cst_128 {dimension_numbers = #tpu.dot_dimension_numbers<[1], [0], [0], [1], [0, 0, 1, 1], [], []>} : vector<8x64xf32>, vector<64x128xf32>, vector<8x128xf32> -> vector<8x128xf32>
    %221 = vector.broadcast %1 : vector<1x128xf32> to vector<8x128xf32>
    %222 = arith.addf %220, %221 : vector<8x128xf32>
    %cst_129 = arith.constant 0.000000e+00 : f32
    %223 = vector.broadcast %cst_129 : f32 to vector<8x128xf32>
    %224 = arith.subf %223, %222 : vector<8x128xf32>
    %225 = math.exp %224 : vector<8x128xf32>
    %cst_130 = arith.constant 1.000000e+00 : f32
    %226 = vector.broadcast %cst_130 : f32 to vector<8x128xf32>
    %227 = arith.addf %226, %225 : vector<8x128xf32>
    %cst_131 = arith.constant 1.000000e+00 : f32
    %228 = vector.broadcast %cst_131 : f32 to vector<8x128xf32>
    %229 = arith.divf %228, %227 : vector<8x128xf32>
    %230 = math.tanh %222 : vector<8x128xf32>
    %231 = vector.extract_strided_slice %229 {offsets = [0, 0], sizes = [8, 32], strides = [1, 1]} : vector<8x128xf32> to vector<8x32xf32>
    %232 = vector.extract_strided_slice %229 {offsets = [0, 32], sizes = [8, 32], strides = [1, 1]} : vector<8x128xf32> to vector<8x32xf32>
    %233 = vector.extract_strided_slice %230 {offsets = [0, 64], sizes = [8, 32], strides = [1, 1]} : vector<8x128xf32> to vector<8x32xf32>
    %234 = vector.extract_strided_slice %229 {offsets = [0, 96], sizes = [8, 32], strides = [1, 1]} : vector<8x128xf32> to vector<8x32xf32>
    %235 = arith.mulf %232, %210 : vector<8x32xf32>
    %236 = arith.mulf %231, %233 : vector<8x32xf32>
    %237 = arith.addf %235, %236 : vector<8x32xf32>
    %238 = math.tanh %237 : vector<8x32xf32>
    %239 = arith.mulf %234, %238 : vector<8x32xf32>
    %c0_132 = arith.constant 0 : index
    %c0_133 = arith.constant 0 : index
    %240 = vector.load %arg9[%c0_132, %c0_133] : memref<32x128xf32, #tpu.memory_space<vmem>>, vector<32x128xf32>
    %cst_134 = arith.constant dense<0.000000e+00> : vector<8x128xf32>
    %241 = tpu.matmul %239, %240, %cst_134 {dimension_numbers = #tpu.dot_dimension_numbers<[1], [0], [0], [1], [0, 0, 1, 1], [], []>} : vector<8x32xf32>, vector<32x128xf32>, vector<8x128xf32> -> vector<8x128xf32>
    %242 = vector.broadcast %2 : vector<1x128xf32> to vector<8x128xf32>
    %243 = arith.addf %241, %242 : vector<8x128xf32>
    %c0_135 = arith.constant 0 : index
    %c0_136 = arith.constant 0 : index
    %244 = vector.load %arg12[%c0_135, %c0_136] : memref<8x1024xf32, #tpu.memory_space<vmem>>, vector<8x128xf32>
    tpu.vector_store %arg12[%c0_135, %c0_136], %243 {strides = array<i32>} : memref<8x1024xf32, #tpu.memory_space<vmem>>, vector<8x128xf32>,
    %cst_137 = arith.constant dense<0xFF800000> : vector<8xf32>
    %245 = vector.multi_reduction <maximumf>, %243, %cst_137 [1] : vector<8x128xf32> to vector<8xf32>
    %246 = vector.shape_cast %245 : vector<8xf32> to vector<8x1xf32>
    %247 = vector.broadcast %246 : vector<8x1xf32> to vector<8x128xf32>
    %248 = arith.cmpf oge, %243, %247 : vector<8x128xf32>
    %cst_138 = arith.constant 1.280000e+02 : f32
    %249 = vector.broadcast %cst_138 : f32 to vector<8x128xf32>
    %250 = arith.select %248, %214, %249 : vector<8x128xi1>, vector<8x128xf32>
    %cst_139 = arith.constant dense<0x7F800000> : vector<8xf32>
    %251 = vector.multi_reduction <minimumf>, %250, %cst_139 [1] : vector<8x128xf32> to vector<8xf32>
    %252 = vector.shape_cast %251 : vector<8xf32> to vector<8x1xf32>
    %253 = vector.broadcast %252 : vector<8x1xf32> to vector<8x128xf32>
    %254 = arith.cmpf oeq, %214, %253 : vector<8x128xf32>
    %255 = arith.extui %254 : vector<8x128xi1> to vector<8x128xi32>
    %256 = arith.sitofp %255 : vector<8x128xi32> to vector<8x128xf32>
    %c0_140 = arith.constant 0 : index
    %c0_141 = arith.constant 0 : index
    %257 = vector.load %arg11[%c0_140, %c0_141] : memref<128x32xf32, #tpu.memory_space<vmem>>, vector<128x32xf32>
    %cst_142 = arith.constant dense<0.000000e+00> : vector<8x32xf32>
    %258 = tpu.matmul %256, %257, %cst_142 {dimension_numbers = #tpu.dot_dimension_numbers<[1], [0], [0], [1], [0, 0, 1, 1], [], []>} : vector<8x128xf32>, vector<128x32xf32>, vector<8x32xf32> -> vector<8x32xf32>
    %c0_143 = arith.constant 0 : index
    %259 = memref.load %arg1[%c0_143] : memref<8xi32, #tpu.memory_space<smem>>
    %c0_i32 = arith.constant 0 : i32
    %260 = arith.cmpi sgt, %259, %c0_i32 : i32
    %c0_144 = arith.constant 0 : index
    %c0_145 = arith.constant 0 : index
    %c0_146 = arith.constant 0 : index
    %261 = vector.load %arg3[%c0_144, %c0_145, %c0_146] : memref<8x8x32xf32, #tpu.memory_space<vmem>>, vector<1x8x32xf32>
    %262 = vector.shape_cast %261 : vector<1x8x32xf32> to vector<8x32xf32>
    %263 = arith.select %260, %262, %258 : vector<8x32xf32>
    %c0_147 = arith.constant 0 : index
    %c0_148 = arith.constant 0 : index
    %264 = vector.load %arg13[%c0_147, %c0_148] : memref<8x64xf32, #tpu.memory_space<vmem>>, vector<8x32xf32>
    tpu.vector_store %arg13[%c0_147, %c0_148], %263 {strides = array<i32>} : memref<8x64xf32, #tpu.memory_space<vmem>>, vector<8x32xf32>,
    %c0_149 = arith.constant 0 : index
    %c32_150 = arith.constant 32 : index
    %265 = vector.load %arg13[%c0_149, %c32_150] : memref<8x64xf32, #tpu.memory_space<vmem>>, vector<8x32xf32>
    tpu.vector_store %arg13[%c0_149, %c32_150], %239 {strides = array<i32>} : memref<8x64xf32, #tpu.memory_space<vmem>>, vector<8x32xf32>,
    %c0_151 = arith.constant 0 : index
    %c0_152 = arith.constant 0 : index
    %266 = vector.load %arg13[%c0_151, %c0_152] : memref<8x64xf32, #tpu.memory_space<vmem>>, vector<8x64xf32>
    %c0_153 = arith.constant 0 : index
    %c0_154 = arith.constant 0 : index
    %267 = vector.load %arg7[%c0_153, %c0_154] : memref<64x128xf32, #tpu.memory_space<vmem>>, vector<64x128xf32>
    %cst_155 = arith.constant dense<0.000000e+00> : vector<8x128xf32>
    %268 = tpu.matmul %266, %267, %cst_155 {dimension_numbers = #tpu.dot_dimension_numbers<[1], [0], [0], [1], [0, 0, 1, 1], [], []>} : vector<8x64xf32>, vector<64x128xf32>, vector<8x128xf32> -> vector<8x128xf32>
    %269 = vector.broadcast %1 : vector<1x128xf32> to vector<8x128xf32>
    %270 = arith.addf %268, %269 : vector<8x128xf32>
    %cst_156 = arith.constant 0.000000e+00 : f32
    %271 = vector.broadcast %cst_156 : f32 to vector<8x128xf32>
    %272 = arith.subf %271, %270 : vector<8x128xf32>
    %273 = math.exp %272 : vector<8x128xf32>
    %cst_157 = arith.constant 1.000000e+00 : f32
    %274 = vector.broadcast %cst_157 : f32 to vector<8x128xf32>
    %275 = arith.addf %274, %273 : vector<8x128xf32>
    %cst_158 = arith.constant 1.000000e+00 : f32
    %276 = vector.broadcast %cst_158 : f32 to vector<8x128xf32>
    %277 = arith.divf %276, %275 : vector<8x128xf32>
    %278 = math.tanh %270 : vector<8x128xf32>
    %279 = vector.extract_strided_slice %277 {offsets = [0, 0], sizes = [8, 32], strides = [1, 1]} : vector<8x128xf32> to vector<8x32xf32>
    %280 = vector.extract_strided_slice %277 {offsets = [0, 32], sizes = [8, 32], strides = [1, 1]} : vector<8x128xf32> to vector<8x32xf32>
    %281 = vector.extract_strided_slice %278 {offsets = [0, 64], sizes = [8, 32], strides = [1, 1]} : vector<8x128xf32> to vector<8x32xf32>
    %282 = vector.extract_strided_slice %277 {offsets = [0, 96], sizes = [8, 32], strides = [1, 1]} : vector<8x128xf32> to vector<8x32xf32>
    %283 = arith.mulf %280, %237 : vector<8x32xf32>
    %284 = arith.mulf %279, %281 : vector<8x32xf32>
    %285 = arith.addf %283, %284 : vector<8x32xf32>
    %286 = math.tanh %285 : vector<8x32xf32>
    %287 = arith.mulf %282, %286 : vector<8x32xf32>
    %c0_159 = arith.constant 0 : index
    %c0_160 = arith.constant 0 : index
    %288 = vector.load %arg9[%c0_159, %c0_160] : memref<32x128xf32, #tpu.memory_space<vmem>>, vector<32x128xf32>
    %cst_161 = arith.constant dense<0.000000e+00> : vector<8x128xf32>
    %289 = tpu.matmul %287, %288, %cst_161 {dimension_numbers = #tpu.dot_dimension_numbers<[1], [0], [0], [1], [0, 0, 1, 1], [], []>} : vector<8x32xf32>, vector<32x128xf32>, vector<8x128xf32> -> vector<8x128xf32>
    %290 = vector.broadcast %2 : vector<1x128xf32> to vector<8x128xf32>
    %291 = arith.addf %289, %290 : vector<8x128xf32>
    %c0_162 = arith.constant 0 : index
    %c128 = arith.constant 128 : index
    %292 = vector.load %arg12[%c0_162, %c128] : memref<8x1024xf32, #tpu.memory_space<vmem>>, vector<8x128xf32>
    tpu.vector_store %arg12[%c0_162, %c128], %291 {strides = array<i32>} : memref<8x1024xf32, #tpu.memory_space<vmem>>, vector<8x128xf32>,
    %cst_163 = arith.constant dense<0xFF800000> : vector<8xf32>
    %293 = vector.multi_reduction <maximumf>, %291, %cst_163 [1] : vector<8x128xf32> to vector<8xf32>
    %294 = vector.shape_cast %293 : vector<8xf32> to vector<8x1xf32>
    %295 = vector.broadcast %294 : vector<8x1xf32> to vector<8x128xf32>
    %296 = arith.cmpf oge, %291, %295 : vector<8x128xf32>
    %cst_164 = arith.constant 1.280000e+02 : f32
    %297 = vector.broadcast %cst_164 : f32 to vector<8x128xf32>
    %298 = arith.select %296, %214, %297 : vector<8x128xi1>, vector<8x128xf32>
    %cst_165 = arith.constant dense<0x7F800000> : vector<8xf32>
    %299 = vector.multi_reduction <minimumf>, %298, %cst_165 [1] : vector<8x128xf32> to vector<8xf32>
    %300 = vector.shape_cast %299 : vector<8xf32> to vector<8x1xf32>
    %301 = vector.broadcast %300 : vector<8x1xf32> to vector<8x128xf32>
    %302 = arith.cmpf oeq, %214, %301 : vector<8x128xf32>
    %303 = arith.extui %302 : vector<8x128xi1> to vector<8x128xi32>
    %304 = arith.sitofp %303 : vector<8x128xi32> to vector<8x128xf32>
    %c0_166 = arith.constant 0 : index
    %c0_167 = arith.constant 0 : index
    %305 = vector.load %arg11[%c0_166, %c0_167] : memref<128x32xf32, #tpu.memory_space<vmem>>, vector<128x32xf32>
    %cst_168 = arith.constant dense<0.000000e+00> : vector<8x32xf32>
    %306 = tpu.matmul %304, %305, %cst_168 {dimension_numbers = #tpu.dot_dimension_numbers<[1], [0], [0], [1], [0, 0, 1, 1], [], []>} : vector<8x128xf32>, vector<128x32xf32>, vector<8x32xf32> -> vector<8x32xf32>
    %c1_169 = arith.constant 1 : index
    %307 = memref.load %arg1[%c1_169] : memref<8xi32, #tpu.memory_space<smem>>
    %c0_i32_170 = arith.constant 0 : i32
    %308 = arith.cmpi sgt, %307, %c0_i32_170 : i32
    %c1_171 = arith.constant 1 : index
    %c0_172 = arith.constant 0 : index
    %c0_173 = arith.constant 0 : index
    %309 = vector.load %arg3[%c1_171, %c0_172, %c0_173] : memref<8x8x32xf32, #tpu.memory_space<vmem>>, vector<1x8x32xf32>
    %310 = vector.shape_cast %309 : vector<1x8x32xf32> to vector<8x32xf32>
    %311 = arith.select %308, %310, %306 : vector<8x32xf32>
    %c0_174 = arith.constant 0 : index
    %c0_175 = arith.constant 0 : index
    %312 = vector.load %arg13[%c0_174, %c0_175] : memref<8x64xf32, #tpu.memory_space<vmem>>, vector<8x32xf32>
    tpu.vector_store %arg13[%c0_174, %c0_175], %311 {strides = array<i32>} : memref<8x64xf32, #tpu.memory_space<vmem>>, vector<8x32xf32>,
    %c0_176 = arith.constant 0 : index
    %c32_177 = arith.constant 32 : index
    %313 = vector.load %arg13[%c0_176, %c32_177] : memref<8x64xf32, #tpu.memory_space<vmem>>, vector<8x32xf32>
    tpu.vector_store %arg13[%c0_176, %c32_177], %287 {strides = array<i32>} : memref<8x64xf32, #tpu.memory_space<vmem>>, vector<8x32xf32>,
    %c0_178 = arith.constant 0 : index
    %c0_179 = arith.constant 0 : index
    %314 = vector.load %arg13[%c0_178, %c0_179] : memref<8x64xf32, #tpu.memory_space<vmem>>, vector<8x64xf32>
    %c0_180 = arith.constant 0 : index
    %c0_181 = arith.constant 0 : index
    %315 = vector.load %arg7[%c0_180, %c0_181] : memref<64x128xf32, #tpu.memory_space<vmem>>, vector<64x128xf32>
    %cst_182 = arith.constant dense<0.000000e+00> : vector<8x128xf32>
    %316 = tpu.matmul %314, %315, %cst_182 {dimension_numbers = #tpu.dot_dimension_numbers<[1], [0], [0], [1], [0, 0, 1, 1], [], []>} : vector<8x64xf32>, vector<64x128xf32>, vector<8x128xf32> -> vector<8x128xf32>
    %317 = vector.broadcast %1 : vector<1x128xf32> to vector<8x128xf32>
    %318 = arith.addf %316, %317 : vector<8x128xf32>
    %cst_183 = arith.constant 0.000000e+00 : f32
    %319 = vector.broadcast %cst_183 : f32 to vector<8x128xf32>
    %320 = arith.subf %319, %318 : vector<8x128xf32>
    %321 = math.exp %320 : vector<8x128xf32>
    %cst_184 = arith.constant 1.000000e+00 : f32
    %322 = vector.broadcast %cst_184 : f32 to vector<8x128xf32>
    %323 = arith.addf %322, %321 : vector<8x128xf32>
    %cst_185 = arith.constant 1.000000e+00 : f32
    %324 = vector.broadcast %cst_185 : f32 to vector<8x128xf32>
    %325 = arith.divf %324, %323 : vector<8x128xf32>
    %326 = math.tanh %318 : vector<8x128xf32>
    %327 = vector.extract_strided_slice %325 {offsets = [0, 0], sizes = [8, 32], strides = [1, 1]} : vector<8x128xf32> to vector<8x32xf32>
    %328 = vector.extract_strided_slice %325 {offsets = [0, 32], sizes = [8, 32], strides = [1, 1]} : vector<8x128xf32> to vector<8x32xf32>
    %329 = vector.extract_strided_slice %326 {offsets = [0, 64], sizes = [8, 32], strides = [1, 1]} : vector<8x128xf32> to vector<8x32xf32>
    %330 = vector.extract_strided_slice %325 {offsets = [0, 96], sizes = [8, 32], strides = [1, 1]} : vector<8x128xf32> to vector<8x32xf32>
    %331 = arith.mulf %328, %285 : vector<8x32xf32>
    %332 = arith.mulf %327, %329 : vector<8x32xf32>
    %333 = arith.addf %331, %332 : vector<8x32xf32>
    %334 = math.tanh %333 : vector<8x32xf32>
    %335 = arith.mulf %330, %334 : vector<8x32xf32>
    %c0_186 = arith.constant 0 : index
    %c0_187 = arith.constant 0 : index
    %336 = vector.load %arg9[%c0_186, %c0_187] : memref<32x128xf32, #tpu.memory_space<vmem>>, vector<32x128xf32>
    %cst_188 = arith.constant dense<0.000000e+00> : vector<8x128xf32>
    %337 = tpu.matmul %335, %336, %cst_188 {dimension_numbers = #tpu.dot_dimension_numbers<[1], [0], [0], [1], [0, 0, 1, 1], [], []>} : vector<8x32xf32>, vector<32x128xf32>, vector<8x128xf32> -> vector<8x128xf32>
    %338 = vector.broadcast %2 : vector<1x128xf32> to vector<8x128xf32>
    %339 = arith.addf %337, %338 : vector<8x128xf32>
    %c0_189 = arith.constant 0 : index
    %c256 = arith.constant 256 : index
    %340 = vector.load %arg12[%c0_189, %c256] : memref<8x1024xf32, #tpu.memory_space<vmem>>, vector<8x128xf32>
    tpu.vector_store %arg12[%c0_189, %c256], %339 {strides = array<i32>} : memref<8x1024xf32, #tpu.memory_space<vmem>>, vector<8x128xf32>,
    %cst_190 = arith.constant dense<0xFF800000> : vector<8xf32>
    %341 = vector.multi_reduction <maximumf>, %339, %cst_190 [1] : vector<8x128xf32> to vector<8xf32>
    %342 = vector.shape_cast %341 : vector<8xf32> to vector<8x1xf32>
    %343 = vector.broadcast %342 : vector<8x1xf32> to vector<8x128xf32>
    %344 = arith.cmpf oge, %339, %343 : vector<8x128xf32>
    %cst_191 = arith.constant 1.280000e+02 : f32
    %345 = vector.broadcast %cst_191 : f32 to vector<8x128xf32>
    %346 = arith.select %344, %214, %345 : vector<8x128xi1>, vector<8x128xf32>
    %cst_192 = arith.constant dense<0x7F800000> : vector<8xf32>
    %347 = vector.multi_reduction <minimumf>, %346, %cst_192 [1] : vector<8x128xf32> to vector<8xf32>
    %348 = vector.shape_cast %347 : vector<8xf32> to vector<8x1xf32>
    %349 = vector.broadcast %348 : vector<8x1xf32> to vector<8x128xf32>
    %350 = arith.cmpf oeq, %214, %349 : vector<8x128xf32>
    %351 = arith.extui %350 : vector<8x128xi1> to vector<8x128xi32>
    %352 = arith.sitofp %351 : vector<8x128xi32> to vector<8x128xf32>
    %c0_193 = arith.constant 0 : index
    %c0_194 = arith.constant 0 : index
    %353 = vector.load %arg11[%c0_193, %c0_194] : memref<128x32xf32, #tpu.memory_space<vmem>>, vector<128x32xf32>
    %cst_195 = arith.constant dense<0.000000e+00> : vector<8x32xf32>
    %354 = tpu.matmul %352, %353, %cst_195 {dimension_numbers = #tpu.dot_dimension_numbers<[1], [0], [0], [1], [0, 0, 1, 1], [], []>} : vector<8x128xf32>, vector<128x32xf32>, vector<8x32xf32> -> vector<8x32xf32>
    %c2_196 = arith.constant 2 : index
    %355 = memref.load %arg1[%c2_196] : memref<8xi32, #tpu.memory_space<smem>>
    %c0_i32_197 = arith.constant 0 : i32
    %356 = arith.cmpi sgt, %355, %c0_i32_197 : i32
    %c2_198 = arith.constant 2 : index
    %c0_199 = arith.constant 0 : index
    %c0_200 = arith.constant 0 : index
    %357 = vector.load %arg3[%c2_198, %c0_199, %c0_200] : memref<8x8x32xf32, #tpu.memory_space<vmem>>, vector<1x8x32xf32>
    %358 = vector.shape_cast %357 : vector<1x8x32xf32> to vector<8x32xf32>
    %359 = arith.select %356, %358, %354 : vector<8x32xf32>
    %c0_201 = arith.constant 0 : index
    %c0_202 = arith.constant 0 : index
    %360 = vector.load %arg13[%c0_201, %c0_202] : memref<8x64xf32, #tpu.memory_space<vmem>>, vector<8x32xf32>
    tpu.vector_store %arg13[%c0_201, %c0_202], %359 {strides = array<i32>} : memref<8x64xf32, #tpu.memory_space<vmem>>, vector<8x32xf32>,
    %c0_203 = arith.constant 0 : index
    %c32_204 = arith.constant 32 : index
    %361 = vector.load %arg13[%c0_203, %c32_204] : memref<8x64xf32, #tpu.memory_space<vmem>>, vector<8x32xf32>
    tpu.vector_store %arg13[%c0_203, %c32_204], %335 {strides = array<i32>} : memref<8x64xf32, #tpu.memory_space<vmem>>, vector<8x32xf32>,
    %c0_205 = arith.constant 0 : index
    %c0_206 = arith.constant 0 : index
    %362 = vector.load %arg13[%c0_205, %c0_206] : memref<8x64xf32, #tpu.memory_space<vmem>>, vector<8x64xf32>
    %c0_207 = arith.constant 0 : index
    %c0_208 = arith.constant 0 : index
    %363 = vector.load %arg7[%c0_207, %c0_208] : memref<64x128xf32, #tpu.memory_space<vmem>>, vector<64x128xf32>
    %cst_209 = arith.constant dense<0.000000e+00> : vector<8x128xf32>
    %364 = tpu.matmul %362, %363, %cst_209 {dimension_numbers = #tpu.dot_dimension_numbers<[1], [0], [0], [1], [0, 0, 1, 1], [], []>} : vector<8x64xf32>, vector<64x128xf32>, vector<8x128xf32> -> vector<8x128xf32>
    %365 = vector.broadcast %1 : vector<1x128xf32> to vector<8x128xf32>
    %366 = arith.addf %364, %365 : vector<8x128xf32>
    %cst_210 = arith.constant 0.000000e+00 : f32
    %367 = vector.broadcast %cst_210 : f32 to vector<8x128xf32>
    %368 = arith.subf %367, %366 : vector<8x128xf32>
    %369 = math.exp %368 : vector<8x128xf32>
    %cst_211 = arith.constant 1.000000e+00 : f32
    %370 = vector.broadcast %cst_211 : f32 to vector<8x128xf32>
    %371 = arith.addf %370, %369 : vector<8x128xf32>
    %cst_212 = arith.constant 1.000000e+00 : f32
    %372 = vector.broadcast %cst_212 : f32 to vector<8x128xf32>
    %373 = arith.divf %372, %371 : vector<8x128xf32>
    %374 = math.tanh %366 : vector<8x128xf32>
    %375 = vector.extract_strided_slice %373 {offsets = [0, 0], sizes = [8, 32], strides = [1, 1]} : vector<8x128xf32> to vector<8x32xf32>
    %376 = vector.extract_strided_slice %373 {offsets = [0, 32], sizes = [8, 32], strides = [1, 1]} : vector<8x128xf32> to vector<8x32xf32>
    %377 = vector.extract_strided_slice %374 {offsets = [0, 64], sizes = [8, 32], strides = [1, 1]} : vector<8x128xf32> to vector<8x32xf32>
    %378 = vector.extract_strided_slice %373 {offsets = [0, 96], sizes = [8, 32], strides = [1, 1]} : vector<8x128xf32> to vector<8x32xf32>
    %379 = arith.mulf %376, %333 : vector<8x32xf32>
    %380 = arith.mulf %375, %377 : vector<8x32xf32>
    %381 = arith.addf %379, %380 : vector<8x32xf32>
    %382 = math.tanh %381 : vector<8x32xf32>
    %383 = arith.mulf %378, %382 : vector<8x32xf32>
    %c0_213 = arith.constant 0 : index
    %c0_214 = arith.constant 0 : index
    %384 = vector.load %arg9[%c0_213, %c0_214] : memref<32x128xf32, #tpu.memory_space<vmem>>, vector<32x128xf32>
    %cst_215 = arith.constant dense<0.000000e+00> : vector<8x128xf32>
    %385 = tpu.matmul %383, %384, %cst_215 {dimension_numbers = #tpu.dot_dimension_numbers<[1], [0], [0], [1], [0, 0, 1, 1], [], []>} : vector<8x32xf32>, vector<32x128xf32>, vector<8x128xf32> -> vector<8x128xf32>
    %386 = vector.broadcast %2 : vector<1x128xf32> to vector<8x128xf32>
    %387 = arith.addf %385, %386 : vector<8x128xf32>
    %c0_216 = arith.constant 0 : index
    %c384 = arith.constant 384 : index
    %388 = vector.load %arg12[%c0_216, %c384] : memref<8x1024xf32, #tpu.memory_space<vmem>>, vector<8x128xf32>
    tpu.vector_store %arg12[%c0_216, %c384], %387 {strides = array<i32>} : memref<8x1024xf32, #tpu.memory_space<vmem>>, vector<8x128xf32>,
    %cst_217 = arith.constant dense<0xFF800000> : vector<8xf32>
    %389 = vector.multi_reduction <maximumf>, %387, %cst_217 [1] : vector<8x128xf32> to vector<8xf32>
    %390 = vector.shape_cast %389 : vector<8xf32> to vector<8x1xf32>
    %391 = vector.broadcast %390 : vector<8x1xf32> to vector<8x128xf32>
    %392 = arith.cmpf oge, %387, %391 : vector<8x128xf32>
    %cst_218 = arith.constant 1.280000e+02 : f32
    %393 = vector.broadcast %cst_218 : f32 to vector<8x128xf32>
    %394 = arith.select %392, %214, %393 : vector<8x128xi1>, vector<8x128xf32>
    %cst_219 = arith.constant dense<0x7F800000> : vector<8xf32>
    %395 = vector.multi_reduction <minimumf>, %394, %cst_219 [1] : vector<8x128xf32> to vector<8xf32>
    %396 = vector.shape_cast %395 : vector<8xf32> to vector<8x1xf32>
    %397 = vector.broadcast %396 : vector<8x1xf32> to vector<8x128xf32>
    %398 = arith.cmpf oeq, %214, %397 : vector<8x128xf32>
    %399 = arith.extui %398 : vector<8x128xi1> to vector<8x128xi32>
    %400 = arith.sitofp %399 : vector<8x128xi32> to vector<8x128xf32>
    %c0_220 = arith.constant 0 : index
    %c0_221 = arith.constant 0 : index
    %401 = vector.load %arg11[%c0_220, %c0_221] : memref<128x32xf32, #tpu.memory_space<vmem>>, vector<128x32xf32>
    %cst_222 = arith.constant dense<0.000000e+00> : vector<8x32xf32>
    %402 = tpu.matmul %400, %401, %cst_222 {dimension_numbers = #tpu.dot_dimension_numbers<[1], [0], [0], [1], [0, 0, 1, 1], [], []>} : vector<8x128xf32>, vector<128x32xf32>, vector<8x32xf32> -> vector<8x32xf32>
    %c3_223 = arith.constant 3 : index
    %403 = memref.load %arg1[%c3_223] : memref<8xi32, #tpu.memory_space<smem>>
    %c0_i32_224 = arith.constant 0 : i32
    %404 = arith.cmpi sgt, %403, %c0_i32_224 : i32
    %c3_225 = arith.constant 3 : index
    %c0_226 = arith.constant 0 : index
    %c0_227 = arith.constant 0 : index
    %405 = vector.load %arg3[%c3_225, %c0_226, %c0_227] : memref<8x8x32xf32, #tpu.memory_space<vmem>>, vector<1x8x32xf32>
    %406 = vector.shape_cast %405 : vector<1x8x32xf32> to vector<8x32xf32>
    %407 = arith.select %404, %406, %402 : vector<8x32xf32>
    %c0_228 = arith.constant 0 : index
    %c0_229 = arith.constant 0 : index
    %408 = vector.load %arg13[%c0_228, %c0_229] : memref<8x64xf32, #tpu.memory_space<vmem>>, vector<8x32xf32>
    tpu.vector_store %arg13[%c0_228, %c0_229], %407 {strides = array<i32>} : memref<8x64xf32, #tpu.memory_space<vmem>>, vector<8x32xf32>,
    %c0_230 = arith.constant 0 : index
    %c32_231 = arith.constant 32 : index
    %409 = vector.load %arg13[%c0_230, %c32_231] : memref<8x64xf32, #tpu.memory_space<vmem>>, vector<8x32xf32>
    tpu.vector_store %arg13[%c0_230, %c32_231], %383 {strides = array<i32>} : memref<8x64xf32, #tpu.memory_space<vmem>>, vector<8x32xf32>,
    %c0_232 = arith.constant 0 : index
    %c0_233 = arith.constant 0 : index
    %410 = vector.load %arg13[%c0_232, %c0_233] : memref<8x64xf32, #tpu.memory_space<vmem>>, vector<8x64xf32>
    %c0_234 = arith.constant 0 : index
    %c0_235 = arith.constant 0 : index
    %411 = vector.load %arg7[%c0_234, %c0_235] : memref<64x128xf32, #tpu.memory_space<vmem>>, vector<64x128xf32>
    %cst_236 = arith.constant dense<0.000000e+00> : vector<8x128xf32>
    %412 = tpu.matmul %410, %411, %cst_236 {dimension_numbers = #tpu.dot_dimension_numbers<[1], [0], [0], [1], [0, 0, 1, 1], [], []>} : vector<8x64xf32>, vector<64x128xf32>, vector<8x128xf32> -> vector<8x128xf32>
    %413 = vector.broadcast %1 : vector<1x128xf32> to vector<8x128xf32>
    %414 = arith.addf %412, %413 : vector<8x128xf32>
    %cst_237 = arith.constant 0.000000e+00 : f32
    %415 = vector.broadcast %cst_237 : f32 to vector<8x128xf32>
    %416 = arith.subf %415, %414 : vector<8x128xf32>
    %417 = math.exp %416 : vector<8x128xf32>
    %cst_238 = arith.constant 1.000000e+00 : f32
    %418 = vector.broadcast %cst_238 : f32 to vector<8x128xf32>
    %419 = arith.addf %418, %417 : vector<8x128xf32>
    %cst_239 = arith.constant 1.000000e+00 : f32
    %420 = vector.broadcast %cst_239 : f32 to vector<8x128xf32>
    %421 = arith.divf %420, %419 : vector<8x128xf32>
    %422 = math.tanh %414 : vector<8x128xf32>
    %423 = vector.extract_strided_slice %421 {offsets = [0, 0], sizes = [8, 32], strides = [1, 1]} : vector<8x128xf32> to vector<8x32xf32>
    %424 = vector.extract_strided_slice %421 {offsets = [0, 32], sizes = [8, 32], strides = [1, 1]} : vector<8x128xf32> to vector<8x32xf32>
    %425 = vector.extract_strided_slice %422 {offsets = [0, 64], sizes = [8, 32], strides = [1, 1]} : vector<8x128xf32> to vector<8x32xf32>
    %426 = vector.extract_strided_slice %421 {offsets = [0, 96], sizes = [8, 32], strides = [1, 1]} : vector<8x128xf32> to vector<8x32xf32>
    %427 = arith.mulf %424, %381 : vector<8x32xf32>
    %428 = arith.mulf %423, %425 : vector<8x32xf32>
    %429 = arith.addf %427, %428 : vector<8x32xf32>
    %430 = math.tanh %429 : vector<8x32xf32>
    %431 = arith.mulf %426, %430 : vector<8x32xf32>
    %c0_240 = arith.constant 0 : index
    %c0_241 = arith.constant 0 : index
    %432 = vector.load %arg9[%c0_240, %c0_241] : memref<32x128xf32, #tpu.memory_space<vmem>>, vector<32x128xf32>
    %cst_242 = arith.constant dense<0.000000e+00> : vector<8x128xf32>
    %433 = tpu.matmul %431, %432, %cst_242 {dimension_numbers = #tpu.dot_dimension_numbers<[1], [0], [0], [1], [0, 0, 1, 1], [], []>} : vector<8x32xf32>, vector<32x128xf32>, vector<8x128xf32> -> vector<8x128xf32>
    %434 = vector.broadcast %2 : vector<1x128xf32> to vector<8x128xf32>
    %435 = arith.addf %433, %434 : vector<8x128xf32>
    %c0_243 = arith.constant 0 : index
    %c512 = arith.constant 512 : index
    %436 = vector.load %arg12[%c0_243, %c512] : memref<8x1024xf32, #tpu.memory_space<vmem>>, vector<8x128xf32>
    tpu.vector_store %arg12[%c0_243, %c512], %435 {strides = array<i32>} : memref<8x1024xf32, #tpu.memory_space<vmem>>, vector<8x128xf32>,
    %cst_244 = arith.constant dense<0xFF800000> : vector<8xf32>
    %437 = vector.multi_reduction <maximumf>, %435, %cst_244 [1] : vector<8x128xf32> to vector<8xf32>
    %438 = vector.shape_cast %437 : vector<8xf32> to vector<8x1xf32>
    %439 = vector.broadcast %438 : vector<8x1xf32> to vector<8x128xf32>
    %440 = arith.cmpf oge, %435, %439 : vector<8x128xf32>
    %cst_245 = arith.constant 1.280000e+02 : f32
    %441 = vector.broadcast %cst_245 : f32 to vector<8x128xf32>
    %442 = arith.select %440, %214, %441 : vector<8x128xi1>, vector<8x128xf32>
    %cst_246 = arith.constant dense<0x7F800000> : vector<8xf32>
    %443 = vector.multi_reduction <minimumf>, %442, %cst_246 [1] : vector<8x128xf32> to vector<8xf32>
    %444 = vector.shape_cast %443 : vector<8xf32> to vector<8x1xf32>
    %445 = vector.broadcast %444 : vector<8x1xf32> to vector<8x128xf32>
    %446 = arith.cmpf oeq, %214, %445 : vector<8x128xf32>
    %447 = arith.extui %446 : vector<8x128xi1> to vector<8x128xi32>
    %448 = arith.sitofp %447 : vector<8x128xi32> to vector<8x128xf32>
    %c0_247 = arith.constant 0 : index
    %c0_248 = arith.constant 0 : index
    %449 = vector.load %arg11[%c0_247, %c0_248] : memref<128x32xf32, #tpu.memory_space<vmem>>, vector<128x32xf32>
    %cst_249 = arith.constant dense<0.000000e+00> : vector<8x32xf32>
    %450 = tpu.matmul %448, %449, %cst_249 {dimension_numbers = #tpu.dot_dimension_numbers<[1], [0], [0], [1], [0, 0, 1, 1], [], []>} : vector<8x128xf32>, vector<128x32xf32>, vector<8x32xf32> -> vector<8x32xf32>
    %c4_250 = arith.constant 4 : index
    %451 = memref.load %arg1[%c4_250] : memref<8xi32, #tpu.memory_space<smem>>
    %c0_i32_251 = arith.constant 0 : i32
    %452 = arith.cmpi sgt, %451, %c0_i32_251 : i32
    %c4_252 = arith.constant 4 : index
    %c0_253 = arith.constant 0 : index
    %c0_254 = arith.constant 0 : index
    %453 = vector.load %arg3[%c4_252, %c0_253, %c0_254] : memref<8x8x32xf32, #tpu.memory_space<vmem>>, vector<1x8x32xf32>
    %454 = vector.shape_cast %453 : vector<1x8x32xf32> to vector<8x32xf32>
    %455 = arith.select %452, %454, %450 : vector<8x32xf32>
    %c0_255 = arith.constant 0 : index
    %c0_256 = arith.constant 0 : index
    %456 = vector.load %arg13[%c0_255, %c0_256] : memref<8x64xf32, #tpu.memory_space<vmem>>, vector<8x32xf32>
    tpu.vector_store %arg13[%c0_255, %c0_256], %455 {strides = array<i32>} : memref<8x64xf32, #tpu.memory_space<vmem>>, vector<8x32xf32>,
    %c0_257 = arith.constant 0 : index
    %c32_258 = arith.constant 32 : index
    %457 = vector.load %arg13[%c0_257, %c32_258] : memref<8x64xf32, #tpu.memory_space<vmem>>, vector<8x32xf32>
    tpu.vector_store %arg13[%c0_257, %c32_258], %431 {strides = array<i32>} : memref<8x64xf32, #tpu.memory_space<vmem>>, vector<8x32xf32>,
    %c0_259 = arith.constant 0 : index
    %c0_260 = arith.constant 0 : index
    %458 = vector.load %arg13[%c0_259, %c0_260] : memref<8x64xf32, #tpu.memory_space<vmem>>, vector<8x64xf32>
    %c0_261 = arith.constant 0 : index
    %c0_262 = arith.constant 0 : index
    %459 = vector.load %arg7[%c0_261, %c0_262] : memref<64x128xf32, #tpu.memory_space<vmem>>, vector<64x128xf32>
    %cst_263 = arith.constant dense<0.000000e+00> : vector<8x128xf32>
    %460 = tpu.matmul %458, %459, %cst_263 {dimension_numbers = #tpu.dot_dimension_numbers<[1], [0], [0], [1], [0, 0, 1, 1], [], []>} : vector<8x64xf32>, vector<64x128xf32>, vector<8x128xf32> -> vector<8x128xf32>
    %461 = vector.broadcast %1 : vector<1x128xf32> to vector<8x128xf32>
    %462 = arith.addf %460, %461 : vector<8x128xf32>
    %cst_264 = arith.constant 0.000000e+00 : f32
    %463 = vector.broadcast %cst_264 : f32 to vector<8x128xf32>
    %464 = arith.subf %463, %462 : vector<8x128xf32>
    %465 = math.exp %464 : vector<8x128xf32>
    %cst_265 = arith.constant 1.000000e+00 : f32
    %466 = vector.broadcast %cst_265 : f32 to vector<8x128xf32>
    %467 = arith.addf %466, %465 : vector<8x128xf32>
    %cst_266 = arith.constant 1.000000e+00 : f32
    %468 = vector.broadcast %cst_266 : f32 to vector<8x128xf32>
    %469 = arith.divf %468, %467 : vector<8x128xf32>
    %470 = math.tanh %462 : vector<8x128xf32>
    %471 = vector.extract_strided_slice %469 {offsets = [0, 0], sizes = [8, 32], strides = [1, 1]} : vector<8x128xf32> to vector<8x32xf32>
    %472 = vector.extract_strided_slice %469 {offsets = [0, 32], sizes = [8, 32], strides = [1, 1]} : vector<8x128xf32> to vector<8x32xf32>
    %473 = vector.extract_strided_slice %470 {offsets = [0, 64], sizes = [8, 32], strides = [1, 1]} : vector<8x128xf32> to vector<8x32xf32>
    %474 = vector.extract_strided_slice %469 {offsets = [0, 96], sizes = [8, 32], strides = [1, 1]} : vector<8x128xf32> to vector<8x32xf32>
    %475 = arith.mulf %472, %429 : vector<8x32xf32>
    %476 = arith.mulf %471, %473 : vector<8x32xf32>
    %477 = arith.addf %475, %476 : vector<8x32xf32>
    %478 = math.tanh %477 : vector<8x32xf32>
    %479 = arith.mulf %474, %478 : vector<8x32xf32>
    %c0_267 = arith.constant 0 : index
    %c0_268 = arith.constant 0 : index
    %480 = vector.load %arg9[%c0_267, %c0_268] : memref<32x128xf32, #tpu.memory_space<vmem>>, vector<32x128xf32>
    %cst_269 = arith.constant dense<0.000000e+00> : vector<8x128xf32>
    %481 = tpu.matmul %479, %480, %cst_269 {dimension_numbers = #tpu.dot_dimension_numbers<[1], [0], [0], [1], [0, 0, 1, 1], [], []>} : vector<8x32xf32>, vector<32x128xf32>, vector<8x128xf32> -> vector<8x128xf32>
    %482 = vector.broadcast %2 : vector<1x128xf32> to vector<8x128xf32>
    %483 = arith.addf %481, %482 : vector<8x128xf32>
    %c0_270 = arith.constant 0 : index
    %c640 = arith.constant 640 : index
    %484 = vector.load %arg12[%c0_270, %c640] : memref<8x1024xf32, #tpu.memory_space<vmem>>, vector<8x128xf32>
    tpu.vector_store %arg12[%c0_270, %c640], %483 {strides = array<i32>} : memref<8x1024xf32, #tpu.memory_space<vmem>>, vector<8x128xf32>,
    %cst_271 = arith.constant dense<0xFF800000> : vector<8xf32>
    %485 = vector.multi_reduction <maximumf>, %483, %cst_271 [1] : vector<8x128xf32> to vector<8xf32>
    %486 = vector.shape_cast %485 : vector<8xf32> to vector<8x1xf32>
    %487 = vector.broadcast %486 : vector<8x1xf32> to vector<8x128xf32>
    %488 = arith.cmpf oge, %483, %487 : vector<8x128xf32>
    %cst_272 = arith.constant 1.280000e+02 : f32
    %489 = vector.broadcast %cst_272 : f32 to vector<8x128xf32>
    %490 = arith.select %488, %214, %489 : vector<8x128xi1>, vector<8x128xf32>
    %cst_273 = arith.constant dense<0x7F800000> : vector<8xf32>
    %491 = vector.multi_reduction <minimumf>, %490, %cst_273 [1] : vector<8x128xf32> to vector<8xf32>
    %492 = vector.shape_cast %491 : vector<8xf32> to vector<8x1xf32>
    %493 = vector.broadcast %492 : vector<8x1xf32> to vector<8x128xf32>
    %494 = arith.cmpf oeq, %214, %493 : vector<8x128xf32>
    %495 = arith.extui %494 : vector<8x128xi1> to vector<8x128xi32>
    %496 = arith.sitofp %495 : vector<8x128xi32> to vector<8x128xf32>
    %c0_274 = arith.constant 0 : index
    %c0_275 = arith.constant 0 : index
    %497 = vector.load %arg11[%c0_274, %c0_275] : memref<128x32xf32, #tpu.memory_space<vmem>>, vector<128x32xf32>
    %cst_276 = arith.constant dense<0.000000e+00> : vector<8x32xf32>
    %498 = tpu.matmul %496, %497, %cst_276 {dimension_numbers = #tpu.dot_dimension_numbers<[1], [0], [0], [1], [0, 0, 1, 1], [], []>} : vector<8x128xf32>, vector<128x32xf32>, vector<8x32xf32> -> vector<8x32xf32>
    %c5_277 = arith.constant 5 : index
    %499 = memref.load %arg1[%c5_277] : memref<8xi32, #tpu.memory_space<smem>>
    %c0_i32_278 = arith.constant 0 : i32
    %500 = arith.cmpi sgt, %499, %c0_i32_278 : i32
    %c5_279 = arith.constant 5 : index
    %c0_280 = arith.constant 0 : index
    %c0_281 = arith.constant 0 : index
    %501 = vector.load %arg3[%c5_279, %c0_280, %c0_281] : memref<8x8x32xf32, #tpu.memory_space<vmem>>, vector<1x8x32xf32>
    %502 = vector.shape_cast %501 : vector<1x8x32xf32> to vector<8x32xf32>
    %503 = arith.select %500, %502, %498 : vector<8x32xf32>
    %c0_282 = arith.constant 0 : index
    %c0_283 = arith.constant 0 : index
    %504 = vector.load %arg13[%c0_282, %c0_283] : memref<8x64xf32, #tpu.memory_space<vmem>>, vector<8x32xf32>
    tpu.vector_store %arg13[%c0_282, %c0_283], %503 {strides = array<i32>} : memref<8x64xf32, #tpu.memory_space<vmem>>, vector<8x32xf32>,
    %c0_284 = arith.constant 0 : index
    %c32_285 = arith.constant 32 : index
    %505 = vector.load %arg13[%c0_284, %c32_285] : memref<8x64xf32, #tpu.memory_space<vmem>>, vector<8x32xf32>
    tpu.vector_store %arg13[%c0_284, %c32_285], %479 {strides = array<i32>} : memref<8x64xf32, #tpu.memory_space<vmem>>, vector<8x32xf32>,
    %c0_286 = arith.constant 0 : index
    %c0_287 = arith.constant 0 : index
    %506 = vector.load %arg13[%c0_286, %c0_287] : memref<8x64xf32, #tpu.memory_space<vmem>>, vector<8x64xf32>
    %c0_288 = arith.constant 0 : index
    %c0_289 = arith.constant 0 : index
    %507 = vector.load %arg7[%c0_288, %c0_289] : memref<64x128xf32, #tpu.memory_space<vmem>>, vector<64x128xf32>
    %cst_290 = arith.constant dense<0.000000e+00> : vector<8x128xf32>
    %508 = tpu.matmul %506, %507, %cst_290 {dimension_numbers = #tpu.dot_dimension_numbers<[1], [0], [0], [1], [0, 0, 1, 1], [], []>} : vector<8x64xf32>, vector<64x128xf32>, vector<8x128xf32> -> vector<8x128xf32>
    %509 = vector.broadcast %1 : vector<1x128xf32> to vector<8x128xf32>
    %510 = arith.addf %508, %509 : vector<8x128xf32>
    %cst_291 = arith.constant 0.000000e+00 : f32
    %511 = vector.broadcast %cst_291 : f32 to vector<8x128xf32>
    %512 = arith.subf %511, %510 : vector<8x128xf32>
    %513 = math.exp %512 : vector<8x128xf32>
    %cst_292 = arith.constant 1.000000e+00 : f32
    %514 = vector.broadcast %cst_292 : f32 to vector<8x128xf32>
    %515 = arith.addf %514, %513 : vector<8x128xf32>
    %cst_293 = arith.constant 1.000000e+00 : f32
    %516 = vector.broadcast %cst_293 : f32 to vector<8x128xf32>
    %517 = arith.divf %516, %515 : vector<8x128xf32>
    %518 = math.tanh %510 : vector<8x128xf32>
    %519 = vector.extract_strided_slice %517 {offsets = [0, 0], sizes = [8, 32], strides = [1, 1]} : vector<8x128xf32> to vector<8x32xf32>
    %520 = vector.extract_strided_slice %517 {offsets = [0, 32], sizes = [8, 32], strides = [1, 1]} : vector<8x128xf32> to vector<8x32xf32>
    %521 = vector.extract_strided_slice %518 {offsets = [0, 64], sizes = [8, 32], strides = [1, 1]} : vector<8x128xf32> to vector<8x32xf32>
    %522 = vector.extract_strided_slice %517 {offsets = [0, 96], sizes = [8, 32], strides = [1, 1]} : vector<8x128xf32> to vector<8x32xf32>
    %523 = arith.mulf %520, %477 : vector<8x32xf32>
    %524 = arith.mulf %519, %521 : vector<8x32xf32>
    %525 = arith.addf %523, %524 : vector<8x32xf32>
    %526 = math.tanh %525 : vector<8x32xf32>
    %527 = arith.mulf %522, %526 : vector<8x32xf32>
    %c0_294 = arith.constant 0 : index
    %c0_295 = arith.constant 0 : index
    %528 = vector.load %arg9[%c0_294, %c0_295] : memref<32x128xf32, #tpu.memory_space<vmem>>, vector<32x128xf32>
    %cst_296 = arith.constant dense<0.000000e+00> : vector<8x128xf32>
    %529 = tpu.matmul %527, %528, %cst_296 {dimension_numbers = #tpu.dot_dimension_numbers<[1], [0], [0], [1], [0, 0, 1, 1], [], []>} : vector<8x32xf32>, vector<32x128xf32>, vector<8x128xf32> -> vector<8x128xf32>
    %530 = vector.broadcast %2 : vector<1x128xf32> to vector<8x128xf32>
    %531 = arith.addf %529, %530 : vector<8x128xf32>
    %c0_297 = arith.constant 0 : index
    %c768 = arith.constant 768 : index
    %532 = vector.load %arg12[%c0_297, %c768] : memref<8x1024xf32, #tpu.memory_space<vmem>>, vector<8x128xf32>
    tpu.vector_store %arg12[%c0_297, %c768], %531 {strides = array<i32>} : memref<8x1024xf32, #tpu.memory_space<vmem>>, vector<8x128xf32>,
    %cst_298 = arith.constant dense<0xFF800000> : vector<8xf32>
    %533 = vector.multi_reduction <maximumf>, %531, %cst_298 [1] : vector<8x128xf32> to vector<8xf32>
    %534 = vector.shape_cast %533 : vector<8xf32> to vector<8x1xf32>
    %535 = vector.broadcast %534 : vector<8x1xf32> to vector<8x128xf32>
    %536 = arith.cmpf oge, %531, %535 : vector<8x128xf32>
    %cst_299 = arith.constant 1.280000e+02 : f32
    %537 = vector.broadcast %cst_299 : f32 to vector<8x128xf32>
    %538 = arith.select %536, %214, %537 : vector<8x128xi1>, vector<8x128xf32>
    %cst_300 = arith.constant dense<0x7F800000> : vector<8xf32>
    %539 = vector.multi_reduction <minimumf>, %538, %cst_300 [1] : vector<8x128xf32> to vector<8xf32>
    %540 = vector.shape_cast %539 : vector<8xf32> to vector<8x1xf32>
    %541 = vector.broadcast %540 : vector<8x1xf32> to vector<8x128xf32>
    %542 = arith.cmpf oeq, %214, %541 : vector<8x128xf32>
    %543 = arith.extui %542 : vector<8x128xi1> to vector<8x128xi32>
    %544 = arith.sitofp %543 : vector<8x128xi32> to vector<8x128xf32>
    %c0_301 = arith.constant 0 : index
    %c0_302 = arith.constant 0 : index
    %545 = vector.load %arg11[%c0_301, %c0_302] : memref<128x32xf32, #tpu.memory_space<vmem>>, vector<128x32xf32>
    %cst_303 = arith.constant dense<0.000000e+00> : vector<8x32xf32>
    %546 = tpu.matmul %544, %545, %cst_303 {dimension_numbers = #tpu.dot_dimension_numbers<[1], [0], [0], [1], [0, 0, 1, 1], [], []>} : vector<8x128xf32>, vector<128x32xf32>, vector<8x32xf32> -> vector<8x32xf32>
    %c6_304 = arith.constant 6 : index
    %547 = memref.load %arg1[%c6_304] : memref<8xi32, #tpu.memory_space<smem>>
    %c0_i32_305 = arith.constant 0 : i32
    %548 = arith.cmpi sgt, %547, %c0_i32_305 : i32
    %c6_306 = arith.constant 6 : index
    %c0_307 = arith.constant 0 : index
    %c0_308 = arith.constant 0 : index
    %549 = vector.load %arg3[%c6_306, %c0_307, %c0_308] : memref<8x8x32xf32, #tpu.memory_space<vmem>>, vector<1x8x32xf32>
    %550 = vector.shape_cast %549 : vector<1x8x32xf32> to vector<8x32xf32>
    %551 = arith.select %548, %550, %546 : vector<8x32xf32>
    %c0_309 = arith.constant 0 : index
    %c0_310 = arith.constant 0 : index
    %552 = vector.load %arg13[%c0_309, %c0_310] : memref<8x64xf32, #tpu.memory_space<vmem>>, vector<8x32xf32>
    tpu.vector_store %arg13[%c0_309, %c0_310], %551 {strides = array<i32>} : memref<8x64xf32, #tpu.memory_space<vmem>>, vector<8x32xf32>,
    %c0_311 = arith.constant 0 : index
    %c32_312 = arith.constant 32 : index
    %553 = vector.load %arg13[%c0_311, %c32_312] : memref<8x64xf32, #tpu.memory_space<vmem>>, vector<8x32xf32>
    tpu.vector_store %arg13[%c0_311, %c32_312], %527 {strides = array<i32>} : memref<8x64xf32, #tpu.memory_space<vmem>>, vector<8x32xf32>,
    %c0_313 = arith.constant 0 : index
    %c0_314 = arith.constant 0 : index
    %554 = vector.load %arg13[%c0_313, %c0_314] : memref<8x64xf32, #tpu.memory_space<vmem>>, vector<8x64xf32>
    %c0_315 = arith.constant 0 : index
    %c0_316 = arith.constant 0 : index
    %555 = vector.load %arg7[%c0_315, %c0_316] : memref<64x128xf32, #tpu.memory_space<vmem>>, vector<64x128xf32>
    %cst_317 = arith.constant dense<0.000000e+00> : vector<8x128xf32>
    %556 = tpu.matmul %554, %555, %cst_317 {dimension_numbers = #tpu.dot_dimension_numbers<[1], [0], [0], [1], [0, 0, 1, 1], [], []>} : vector<8x64xf32>, vector<64x128xf32>, vector<8x128xf32> -> vector<8x128xf32>
    %557 = vector.broadcast %1 : vector<1x128xf32> to vector<8x128xf32>
    %558 = arith.addf %556, %557 : vector<8x128xf32>
    %cst_318 = arith.constant 0.000000e+00 : f32
    %559 = vector.broadcast %cst_318 : f32 to vector<8x128xf32>
    %560 = arith.subf %559, %558 : vector<8x128xf32>
    %561 = math.exp %560 : vector<8x128xf32>
    %cst_319 = arith.constant 1.000000e+00 : f32
    %562 = vector.broadcast %cst_319 : f32 to vector<8x128xf32>
    %563 = arith.addf %562, %561 : vector<8x128xf32>
    %cst_320 = arith.constant 1.000000e+00 : f32
    %564 = vector.broadcast %cst_320 : f32 to vector<8x128xf32>
    %565 = arith.divf %564, %563 : vector<8x128xf32>
    %566 = math.tanh %558 : vector<8x128xf32>
    %567 = vector.extract_strided_slice %565 {offsets = [0, 0], sizes = [8, 32], strides = [1, 1]} : vector<8x128xf32> to vector<8x32xf32>
    %568 = vector.extract_strided_slice %565 {offsets = [0, 32], sizes = [8, 32], strides = [1, 1]} : vector<8x128xf32> to vector<8x32xf32>
    %569 = vector.extract_strided_slice %566 {offsets = [0, 64], sizes = [8, 32], strides = [1, 1]} : vector<8x128xf32> to vector<8x32xf32>
    %570 = vector.extract_strided_slice %565 {offsets = [0, 96], sizes = [8, 32], strides = [1, 1]} : vector<8x128xf32> to vector<8x32xf32>
    %571 = arith.mulf %568, %525 : vector<8x32xf32>
    %572 = arith.mulf %567, %569 : vector<8x32xf32>
    %573 = arith.addf %571, %572 : vector<8x32xf32>
    %574 = math.tanh %573 : vector<8x32xf32>
    %575 = arith.mulf %570, %574 : vector<8x32xf32>
    %c0_321 = arith.constant 0 : index
    %c0_322 = arith.constant 0 : index
    %576 = vector.load %arg9[%c0_321, %c0_322] : memref<32x128xf32, #tpu.memory_space<vmem>>, vector<32x128xf32>
    %cst_323 = arith.constant dense<0.000000e+00> : vector<8x128xf32>
    %577 = tpu.matmul %575, %576, %cst_323 {dimension_numbers = #tpu.dot_dimension_numbers<[1], [0], [0], [1], [0, 0, 1, 1], [], []>} : vector<8x32xf32>, vector<32x128xf32>, vector<8x128xf32> -> vector<8x128xf32>
    %578 = vector.broadcast %2 : vector<1x128xf32> to vector<8x128xf32>
    %579 = arith.addf %577, %578 : vector<8x128xf32>
    %c0_324 = arith.constant 0 : index
    %c896 = arith.constant 896 : index
    %580 = vector.load %arg12[%c0_324, %c896] : memref<8x1024xf32, #tpu.memory_space<vmem>>, vector<8x128xf32>
    tpu.vector_store %arg12[%c0_324, %c896], %579 {strides = array<i32>} : memref<8x1024xf32, #tpu.memory_space<vmem>>, vector<8x128xf32>,
    return
  }
  func.func @transform_0(%arg0: i32, %arg1: memref<8xi32, #tpu.memory_space<smem>>) -> (i32, i32, i32) {
    %c0_i32 = arith.constant 0 : i32
    %c0_i32_0 = arith.constant 0 : i32
    %c0_i32_1 = arith.constant 0 : i32
    %c0_i32_2 = arith.constant 0 : i32
    return %c0_i32, %c0_i32_0, %c0_i32_1 : i32, i32, i32
  }
  func.func @transform_1(%arg0: i32, %arg1: memref<8xi32, #tpu.memory_space<smem>>) -> (i32, i32, i32) {
    %c0_i32 = arith.constant 0 : i32
    %c0_i32_0 = arith.constant 0 : i32
    %c0_i32_1 = arith.constant 0 : i32
    %c0_i32_2 = arith.constant 0 : i32
    return %c0_i32, %c0_i32_0, %c0_i32_1 : i32, i32, i32
  }
  func.func @transform_2(%arg0: i32, %arg1: memref<8xi32, #tpu.memory_space<smem>>) -> (i32, i32) {
    %c0_i32 = arith.constant 0 : i32
    %c0_i32_0 = arith.constant 0 : i32
    %c0_i32_1 = arith.constant 0 : i32
    return %c0_i32, %c0_i32_0 : i32, i32
  }
  func.func @transform_3(%arg0: i32, %arg1: memref<8xi32, #tpu.memory_space<smem>>) -> (i32, i32) {
    %c0_i32 = arith.constant 0 : i32
    %c0_i32_0 = arith.constant 0 : i32
    %c0_i32_1 = arith.constant 0 : i32
    return %c0_i32, %c0_i32_0 : i32, i32
  }
  func.func @transform_4(%arg0: i32, %arg1: memref<8xi32, #tpu.memory_space<smem>>) -> (i32, i32) {
    %c0_i32 = arith.constant 0 : i32
    %c0_i32_0 = arith.constant 0 : i32
    %c0_i32_1 = arith.constant 0 : i32
    return %c0_i32, %c0_i32_0 : i32, i32
  }
  func.func @transform_5(%arg0: i32, %arg1: memref<8xi32, #tpu.memory_space<smem>>) -> (i32, i32) {
    %c0_i32 = arith.constant 0 : i32
    %c0_i32_0 = arith.constant 0 : i32
    %c0_i32_1 = arith.constant 0 : i32
    return %c0_i32, %c0_i32_0 : i32, i32
  }
  func.func @transform_6(%arg0: i32, %arg1: memref<8xi32, #tpu.memory_space<smem>>) -> (i32, i32) {
    %c0_i32 = arith.constant 0 : i32
    %c0_i32_0 = arith.constant 0 : i32
    %c0_i32_1 = arith.constant 0 : i32
    return %c0_i32, %c0_i32_0 : i32, i32
  }
  func.func @transform_7(%arg0: i32, %arg1: memref<8xi32, #tpu.memory_space<smem>>) -> (i32, i32) {
    %c0_i32 = arith.constant 0 : i32
    %c0_i32_0 = arith.constant 0 : i32
    %c0_i32_1 = arith.constant 0 : i32
    return %c0_i32, %c0_i32_0 : i32, i32
  }
  func.func @transform_8(%arg0: i32, %arg1: memref<8xi32, #tpu.memory_space<smem>>) -> (i32, i32) {
    %c0_i32 = arith.constant 0 : i32
    %c0_i32_0 = arith.constant 0 : i32
    %c0_i32_1 = arith.constant 0 : i32
    return %c0_i32, %c0_i32_0 : i32, i32
  }
  func.func @transform_9(%arg0: i32, %arg1: memref<8xi32, #tpu.memory_space<smem>>) -> (i32, i32) {
    %c0_i32 = arith.constant 0 : i32
    %c0_i32_0 = arith.constant 0 : i32
    %c0_i32_1 = arith.constant 0 : i32
    return %c0_i32, %c0_i32_0 : i32, i32
  }
  func.func @transform_10(%arg0: i32, %arg1: memref<8xi32, #tpu.memory_space<smem>>) -> (i32, i32) {
    %c0_i32 = arith.constant 0 : i32
    %c0_i32_0 = arith.constant 0 : i32
    %c0_i32_1 = arith.constant 0 : i32
    return %c0_i32, %c0_i32_0 : i32, i32
  }
}

</mosaic_0001>

<bundles_post_ra>
// kernel: seq2seq_forward.1
= control target key start
LH: loop header
LB: loop body
LE: loop exit
PB: predicated region body
PF: predicated region fallthrough
CT: control target
= control target key end

     0   :  { %s5745_s0 = inlined_call_operand.vmem [shape: s32[8], index: 0, kind: input, shape index: {}]   ;;  %s5746_s1 = inlined_call_operand.vmem [shape: f32[8,8,32], index: 1, kind: input, shape index: {}]   ;;  %s5747_s2 = inlined_call_operand.vmem [shape: f32[8,8,32], index: 2, kind: input, shape index: {}]   ;;  %s5748_s3 = inlined_call_operand.vmem [shape: f32[8,32], index: 3, kind: input, shape index: {}]   ;;  %s5749_s4 = inlined_call_operand.vmem [shape: f32[64,128], index: 4, kind: input, shape index: {}]   ;;  %s5750_s5 = inlined_call_operand.vmem [shape: f32[1,128], index: 5, kind: input, shape index: {}]   ;;  %s5751_s6 = inlined_call_operand.vmem [shape: f32[64,128], index: 6, kind: input, shape index: {}]   ;;  %s5752_s7 = inlined_call_operand.vmem [shape: f32[1,128], index: 7, kind: input, shape index: {}]   ;;  %s5753_s8 = inlined_call_operand.vmem [shape: f32[32,128], index: 8, kind: input, shape index: {}]   ;;  %s5754_s9 = inlined_call_operand.vmem [shape: f32[1,128], index: 9, kind: input, shape index: {}]   ;;  %s5755_s10 = inlined_call_operand.vmem [shape: f32[128,32], index: 10, kind: input, shape index: {}]   ;;  %s5756_s11 = inlined_call_operand.vmem [shape: f32[8,1024], index: 11, kind: output, shape index: {}]  }
   0x1   :  { %s16_s19 = sshll.u32 %s5745_s0, 4  ;;  %s17_s19 = int_to_ptr.vmem [resolvable:$true] %s16_s19 }
   0x2   :  { %s4775_s20 = scalar_lea.vmem %s17_s19, 16  ;;  %p4780_p1 = scmp.lt.s32.totalorder %s17_s19, %s17_s19 }
   0x3   :  { %p4776_p0 = scmp.ne.s32.totalorder %s17_s19, %s4775_s20  ;;  %p4781_p2 = scmp.lt.s32.totalorder %s4775_s20, %s4775_s20 }
   0x5   :  { %p4782_p3 = por %p4781_p2, %p4780_p1 }
   0x7   :  { %p4783_p4 = pnand %p4782_p3, %p4776_p0 }
   0x9   :  { %4786 = shalt.err (!%p4783_p4)  }
   0xa   :  { %s4789_s21 = smov [#allocation4]  }
   0xb   :  { %19 = dma.vmem_to_smem %s17_s19, 16, %s4789_s21, [#allocation3] }
   0xc   :  { %4787 = dma.done.wait [#allocation3], 16 }
   0xd   :  { %4788 = vsyncadd [#allocation3], 4294967280 }
   0xe   :  { %21 = sfence }
   0xf   :  { %v51_v0 = vld [vmem:[%s5749_s4] sm:$0xff]  ;;  %v52_v1 = vld [vmem:[%s5749_s4 + $0x8] sm:$0xff]  ;;  %v53_v2 = vld [vmem:[%s5749_s4 + $0x10] sm:$0xff]  ;;  %v4790_v3 = vmov 0.0|0.0   ;;  %vm4791_vm0 = vmmov 0   ;;  %v4792_v6 = vmov 0.0  }
  0x10   :  { %4230 = vmatprep.subr.bf16.mxu0 %v4790_v3  ;;  %v4869_v4 = vpack.c.bf16 %v52_v1, %v51_v0  ;;  %v54_v5 = vld [vmem:[%s5749_s4 + $0x18] sm:$0xff]  ;;  %3609 = vmatprep.mubr.msk.f32.mxu0 %vm4791_vm0, %v4792_v6  ;;  %vm46_vm1 = vcmask 261120   ;;  %vm48_vm2 = vcmask 523520   ;;  %v45_v7 = vld [vmem:[%s5746_s1] sm:$0xff]  ;;  %v56_v10 = vld [vmem:[%s5749_s4 + $0x28] sm:$0xff]  ;;  %vm65_vm3 = vcmask 523264  }
  0x11   :  { %4242 = vmatprep.subr.bf16.mxu1 %v4790_v3  ;;  %3628 = vmatprep.mubr.msk.f32.mxu1 %vm4791_vm0, %v4792_v6  ;;  %v4883_v8 = vpack.c.bf16 %v54_v5, %v53_v2  ;;  %47 = vst.msk [vmem:[#allocation2] sm:$0xff] %vm46_vm1, %v45_v7  ;;  %v55_v9 = vld [vmem:[%s5749_s4 + $0x20] sm:$0xff]  ;;  %v57_v12 = vld [vmem:[%s5749_s4 + $0x30] sm:$0xff]  ;;  %v58_v13 = vld [vmem:[%s5749_s4 + $0x38] sm:$0xff]  ;;  %s4793_s21 = smov 64   ;;  %s1264_s14 = sld [smem:[#allocation4]] }
  0x12   :  { %4232 = vmatpush3.bf16.msra.mxu0 %v4869_v4  ;;  %4244 = vmatpush3.bf16.msra.mxu1 %v4869_v4  ;;  %49 = vst.msk [vmem:[#allocation2] sm:$0xff] %vm48_vm2, %v4792_v6  ;;  %v4898_v11 = vpack.c.bf16 %v56_v10, %v55_v9  ;;  %v4910_v14 = vpack.c.bf16 %v58_v13, %v57_v12  ;;  %v4933_v16 = vld [vmem:[%s5750_s5] ss:$0 sm:$0xff]  ;;  %s4794_s5 = smov 32   ;;  %v3232_v31 = vld [vmem:[%s5746_s1 + $0x8] sm:$0xff]  ;;  %v3234_v51 = vld [vmem:[%s5746_s1 + $0x10] sm:$0xff] }
  0x13   :  { %4233 = vmatprep.subr.bf16.mxu0 %v4790_v3  ;;  %4245 = vmatprep.subr.bf16.mxu1 %v4790_v3  ;;  %v3236_v12 = vld [vmem:[%s5746_s1 + $0x18] sm:$0xff]  ;;  %s3256_s19 = sld [smem:[#allocation4 + $0x1]]  ;;  %s3262_s25 = sld [smem:[#allocation4 + $0x2]] }
  0x14   :  { %s3268_s29 = sld [smem:[#allocation4 + $0x3]] }
  0x16   :  { %4235 = vmatpush3.bf16.msra.mxu0 %v4883_v8  ;;  %4247 = vmatpush3.bf16.msra.mxu1 %v4883_v8 }
  0x17   :  { %4236 = vmatprep.subr.bf16.mxu0 %v4790_v3  ;;  %4248 = vmatprep.subr.bf16.mxu1 %v4790_v3  ;;  %p1265_p5 = scmp.gt.s32.totalorder %s1264_s14, 0 }
  0x19   :  { %v50_v15 = vld [vmem:[#allocation2] sm:$0xff]  ;;  %s1267_s15 = scalar_select %p1265_p5, 1, 0 }
  0x1a   :  { %4238 = vmatpush3.bf16.msra.mxu0 %v4898_v11  ;;  %4250 = vmatpush3.bf16.msra.mxu1 %v4898_v11  ;;  %165 = vst.msk [vmem:[#allocation2] sm:$0xff] %vm46_vm1, %v3232_v31  ;;  %p1558_p6 = scmp.gt.s32.totalorder %s3256_s19, 0  ;;  %p1852_p7 = scmp.gt.s32.totalorder %s3262_s25, 0 }
  0x1b   :  { %4239 = vmatprep.subr.bf16.mxu0 %v4790_v3  ;;  %4251 = vmatprep.subr.bf16.mxu1 %v4790_v3  ;;  %p2146_p8 = scmp.gt.s32.totalorder %s3268_s29, 0  ;;  %s3274_s29 = sld [smem:[#allocation4 + $0x4]] }
  0x1c   :  { %s1561_s4 = scalar_select %p1558_p6, 1, 0 }
  0x1d   :  { %s1855_s0 = scalar_select %p1852_p7, 1, 0 }
  0x1e   :  { %4241 = vmatpush3.bf16.msra.mxu0 %v4910_v14  ;;  %4253 = vmatpush3.bf16.msra.mxu1 %v4910_v14  ;;  %s2149_s30 = scalar_select %p2146_p8, 1, 0 }
  0x1f   :  { %4254 = vmatprep.subr.bf16.mxu0 %v4790_v3  ;;  %4266 = vmatprep.subr.bf16.mxu1 %v4790_v3 }
  0x21   :  { %3610 = vmatmul.mubr.msk.f32.vlgmr.msra.gmra.mrb[0].mxu0 %vm65_vm3, %v50_v15  ;;  %p2440_p9 = scmp.gt.s32.totalorder %s3274_s29, 0 }
  0x22   :  { %4256 = vmatpush3.bf16.msra.mxu0 %v4869_v4  ;;  %3647 = vmatprep.mubr.msk.f32.mxu0 %vm4791_vm0, %v4792_v6 }
  0x23   :  { %4257 = vmatprep.subr.bf16.mxu0 %v4790_v3 }
  0x26   :  { %4259 = vmatpush3.bf16.msra.mxu0 %v4883_v8 }
  0x27   :  { %4260 = vmatprep.subr.bf16.mxu0 %v4790_v3 }
  0x2a   :  { %4262 = vmatpush3.bf16.msra.mxu0 %v4898_v11 }
  0x2b   :  { %4263 = vmatprep.subr.bf16.mxu0 %v4790_v3 }
  0x2e   :  { %4265 = vmatpush3.bf16.msra.mxu0 %v4910_v14 }
  0x2f   :  { %4278 = vmatprep.subr.bf16.mxu0 %v4790_v3 }
  0xf4   :  { %v135_v17 = vpop.f32.mrb[0].mxu0 }
  0xf5   :  { %v136_v18 = vadd.f32 %v4933_v16, %v135_v17  ;;  %v3611_v19 = vpop.f32.mrb[1].mxu0 }
  0xf7   :  { %4645 = vtanh.f32 %v136_v18  ;;  %v139_v21 = vsub.f32 0.0, %v136_v18 }
  0xf9   :  { %v140_v22 = vmul.f32 1.442695, %v139_v21 }
  0xfb   :  { %4647 = vpow2.f32 %v140_v22 }
 0x101   :  { %v4646_v20 = vpop.eup %4645 }
 0x102   :  { %148 = vrot.lane.b32.xlu0 %v4646_v20, %s4793_s21 }
 0x105   :  { %v4648_v23 = vpop.eup %4647 }
 0x106   :  { %v142_v24 = vadd.f32 1.0, %v4648_v23 }
 0x108   :  { %4649 = vrcp.f32 %v142_v24 }
 0x112   :  { %v4650_v25 = vpop.eup %4649 }
 0x113   :  { %v146_v28 = vmul.f32 0.0, %v4650_v25 }
 0x174   :  { %v149_v26 = vpop.permute.xlu0 %148 }
 0x175   :  { %v151_v27 = vmul.f32 %v4650_v25, %v149_v26 }
 0x177   :  { %153 = vrot.lane.b32.xlu0 %v151_v27, %s4794_s5 }
 0x1e9   :  { %v154_v29 = vpop.permute.xlu0 %153 }
 0x1ea   :  { %v156_v30 = vadd.f32 %v154_v29, %v146_v28 }
 0x1ec   :  { %4651 = vtanh.f32 %v156_v30 }
 0x1f6   :  { %v4652_v32 = vpop.eup %4651 }
 0x1f7   :  { %159 = vrot.lane.b32.xlu1 %v4652_v32, %s4793_s21 }
 0x269   :  { %v160_v33 = vpop.permute.xlu1 %159 }
 0x26a   :  { %v162_v34 = vmul.f32 %v4650_v25, %v160_v33 }
 0x26c   :  { %167 = vrot.lane.b32.xlu1 %v162_v34, %s4793_s21  ;;  %v3238_v34 = vld [vmem:[%s5746_s1 + $0x20] sm:$0xff] }
 0x2de   :  { %v168_v35 = vpop.permute.xlu1 %167 }
 0x2df   :  { %170 = vst.msk [vmem:[#allocation2] sm:$0xff] %vm48_vm2, %v168_v35 }
 0x2e6   :  { %v171_v36 = vld [vmem:[#allocation2] sm:$0xff] }
 0x2e7   :  { %3629 = vmatmul.mubr.msk.f32.vlgmr.msra.gmra.mrb[0].mxu1 %vm65_vm3, %v171_v36  ;;  %279 = vst.msk [vmem:[#allocation2] sm:$0xff] %vm46_vm1, %v3234_v51 }
 0x2e8   :  { %4268 = vmatpush3.bf16.msra.mxu1 %v4869_v4  ;;  %3666 = vmatprep.mubr.msk.f32.mxu1 %vm4791_vm0, %v4792_v6 }
 0x2e9   :  { %4269 = vmatprep.subr.bf16.mxu1 %v4790_v3 }
 0x2ec   :  { %4271 = vmatpush3.bf16.msra.mxu1 %v4883_v8 }
 0x2ed   :  { %4272 = vmatprep.subr.bf16.mxu1 %v4790_v3 }
 0x2f0   :  { %4274 = vmatpush3.bf16.msra.mxu1 %v4898_v11 }
 0x2f1   :  { %4275 = vmatprep.subr.bf16.mxu1 %v4790_v3 }
 0x2f4   :  { %4277 = vmatpush3.bf16.msra.mxu1 %v4910_v14 }
 0x2f5   :  { %4290 = vmatprep.subr.bf16.mxu1 %v4790_v3 }
 0x3ba   :  { %v249_v37 = vpop.f32.mrb[0].mxu1 }
 0x3bb   :  { %v250_v38 = vadd.f32 %v4933_v16, %v249_v37  ;;  %v3630_v39 = vpop.f32.mrb[1].mxu1 }
 0x3bd   :  { %4653 = vtanh.f32 %v250_v38  ;;  %v253_v41 = vsub.f32 0.0, %v250_v38 }
 0x3bf   :  { %v254_v42 = vmul.f32 1.442695, %v253_v41 }
 0x3c1   :  { %4655 = vpow2.f32 %v254_v42 }
 0x3c7   :  { %v4654_v40 = vpop.eup %4653 }
 0x3c8   :  { %262 = vrot.lane.b32.xlu0 %v4654_v40, %s4793_s21 }
 0x3cb   :  { %v4656_v43 = vpop.eup %4655 }
 0x3cc   :  { %v256_v44 = vadd.f32 1.0, %v4656_v43 }
 0x3ce   :  { %4657 = vrcp.f32 %v256_v44 }
 0x3d8   :  { %v4658_v45 = vpop.eup %4657 }
 0x3d9   :  { %v260_v48 = vmul.f32 %v4658_v45, %v156_v30 }
 0x43a   :  { %v263_v46 = vpop.permute.xlu0 %262 }
 0x43b   :  { %v265_v47 = vmul.f32 %v4658_v45, %v263_v46 }
 0x43d   :  { %267 = vrot.lane.b32.xlu1 %v265_v47, %s4794_s5 }
 0x4af   :  { %v268_v49 = vpop.permute.xlu1 %267 }
 0x4b0   :  { %v270_v50 = vadd.f32 %v268_v49, %v260_v48 }
 0x4b2   :  { %4659 = vtanh.f32 %v270_v50 }
 0x4bc   :  { %v4660_v52 = vpop.eup %4659 }
 0x4bd   :  { %273 = vrot.lane.b32.xlu0 %v4660_v52, %s4793_s21 }
 0x52f   :  { %v274_v53 = vpop.permute.xlu0 %273 }
 0x530   :  { %v276_v54 = vmul.f32 %v4658_v45, %v274_v53 }
 0x532   :  { %281 = vrot.lane.b32.xlu1 %v276_v54, %s4793_s21  ;;  %v3240_v54 = vld [vmem:[%s5746_s1 + $0x28] sm:$0xff] }
 0x5a4   :  { %v282_v55 = vpop.permute.xlu1 %281 }
 0x5a5   :  { %284 = vst.msk [vmem:[#allocation2] sm:$0xff] %vm48_vm2, %v282_v55 }
 0x5ac   :  { %v285_v56 = vld [vmem:[#allocation2] sm:$0xff] }
 0x5ad   :  { %3648 = vmatmul.mubr.msk.f32.vlgmr.msra.gmra.mrb[2].mxu0 %vm65_vm3, %v285_v56  ;;  %393 = vst.msk [vmem:[#allocation2] sm:$0xff] %vm46_vm1, %v3236_v12 }
 0x5ae   :  { %4280 = vmatpush3.bf16.msra.mxu0 %v4869_v4  ;;  %3685 = vmatprep.mubr.msk.f32.mxu0 %vm4791_vm0, %v4792_v6 }
 0x5af   :  { %4281 = vmatprep.subr.bf16.mxu0 %v4790_v3 }
 0x5b2   :  { %4283 = vmatpush3.bf16.msra.mxu0 %v4883_v8 }
 0x5b3   :  { %4284 = vmatprep.subr.bf16.mxu0 %v4790_v3 }
 0x5b6   :  { %4286 = vmatpush3.bf16.msra.mxu0 %v4898_v11 }
 0x5b7   :  { %4287 = vmatprep.subr.bf16.mxu0 %v4790_v3 }
 0x5ba   :  { %4289 = vmatpush3.bf16.msra.mxu0 %v4910_v14 }
 0x5bb   :  { %4302 = vmatprep.subr.bf16.mxu0 %v4790_v3 }
 0x680   :  { %v363_v57 = vpop.f32.mrb[2].mxu0 }
 0x681   :  { %v364_v58 = vadd.f32 %v4933_v16, %v363_v57  ;;  %v3649_v59 = vpop.f32.mrb[3].mxu0 }
 0x683   :  { %4661 = vtanh.f32 %v364_v58  ;;  %v367_v61 = vsub.f32 0.0, %v364_v58 }
 0x685   :  { %v368_v62 = vmul.f32 1.442695, %v367_v61 }
 0x687   :  { %4663 = vpow2.f32 %v368_v62 }
 0x68d   :  { %v4662_v60 = vpop.eup %4661 }
 0x68e   :  { %376 = vrot.lane.b32.xlu0 %v4662_v60, %s4793_s21 }
 0x691   :  { %v4664_v63 = vpop.eup %4663 }
 0x692   :  { %v370_v0 = vadd.f32 1.0, %v4664_v63 }
 0x694   :  { %4665 = vrcp.f32 %v370_v0 }
 0x69e   :  { %v4666_v1 = vpop.eup %4665 }
 0x69f   :  { %v374_v7 = vmul.f32 %v4666_v1, %v270_v50 }
 0x700   :  { %v377_v2 = vpop.permute.xlu0 %376 }
 0x701   :  { %v379_v5 = vmul.f32 %v4666_v1, %v377_v2 }
 0x703   :  { %381 = vrot.lane.b32.xlu1 %v379_v5, %s4794_s5 }
 0x775   :  { %v382_v9 = vpop.permute.xlu1 %381 }
 0x776   :  { %v384_v10 = vadd.f32 %v382_v9, %v374_v7 }
 0x778   :  { %4667 = vtanh.f32 %v384_v10 }
 0x782   :  { %v4668_v13 = vpop.eup %4667 }
 0x783   :  { %387 = vrot.lane.b32.xlu0 %v4668_v13, %s4793_s21 }
 0x7f5   :  { %v388_v15 = vpop.permute.xlu0 %387 }
 0x7f6   :  { %v390_v17 = vmul.f32 %v4666_v1, %v388_v15 }
 0x7f8   :  { %395 = vrot.lane.b32.xlu1 %v390_v17, %s4793_s21 }
 0x86a   :  { %v396_v18 = vpop.permute.xlu1 %395 }
 0x86b   :  { %398 = vst.msk [vmem:[#allocation2] sm:$0xff] %vm48_vm2, %v396_v18 }
 0x872   :  { %v399_v19 = vld [vmem:[#allocation2] sm:$0xff] }
 0x873   :  { %3667 = vmatmul.mubr.msk.f32.vlgmr.msra.gmra.mrb[2].mxu1 %vm65_vm3, %v399_v19  ;;  %507 = vst.msk [vmem:[#allocation2] sm:$0xff] %vm46_vm1, %v3238_v34 }
 0x874   :  { %4292 = vmatpush3.bf16.msra.mxu1 %v4869_v4  ;;  %3704 = vmatprep.mubr.msk.f32.mxu1 %vm4791_vm0, %v4792_v6 }
 0x875   :  { %4293 = vmatprep.subr.bf16.mxu1 %v4790_v3 }
 0x878   :  { %4295 = vmatpush3.bf16.msra.mxu1 %v4883_v8 }
 0x879   :  { %4296 = vmatprep.subr.bf16.mxu1 %v4790_v3 }
 0x87c   :  { %4298 = vmatpush3.bf16.msra.mxu1 %v4898_v11 }
 0x87d   :  { %4299 = vmatprep.subr.bf16.mxu1 %v4790_v3 }
 0x880   :  { %4301 = vmatpush3.bf16.msra.mxu1 %v4910_v14 }
 0x881   :  { %4314 = vmatprep.subr.bf16.mxu1 %v4790_v3 }
 0x946   :  { %v477_v20 = vpop.f32.mrb[2].mxu1 }
 0x947   :  { %v478_v21 = vadd.f32 %v4933_v16, %v477_v20  ;;  %v3668_v22 = vpop.f32.mrb[3].mxu1 }
 0x949   :  { %4669 = vtanh.f32 %v478_v21  ;;  %v481_v24 = vsub.f32 0.0, %v478_v21 }
 0x94b   :  { %v482_v25 = vmul.f32 1.442695, %v481_v24 }
 0x94d   :  { %4671 = vpow2.f32 %v482_v25 }
 0x953   :  { %v4670_v23 = vpop.eup %4669 }
 0x954   :  { %490 = vrot.lane.b32.xlu0 %v4670_v23, %s4793_s21 }
 0x957   :  { %v4672_v26 = vpop.eup %4671 }
 0x958   :  { %v484_v27 = vadd.f32 1.0, %v4672_v26 }
 0x95a   :  { %4673 = vrcp.f32 %v484_v27 }
 0x964   :  { %v4674_v28 = vpop.eup %4673 }
 0x965   :  { %v488_v31 = vmul.f32 %v4674_v28, %v384_v10  ;;  %v3242_v10 = vld [vmem:[%s5746_s1 + $0x30] sm:$0xff] }
 0x9c6   :  { %v491_v29 = vpop.permute.xlu0 %490 }
 0x9c7   :  { %v493_v30 = vmul.f32 %v4674_v28, %v491_v29 }
 0x9c9   :  { %495 = vrot.lane.b32.xlu1 %v493_v30, %s4794_s5 }
 0xa3b   :  { %v496_v32 = vpop.permute.xlu1 %495 }
 0xa3c   :  { %v498_v33 = vadd.f32 %v496_v32, %v488_v31 }
 0xa3e   :  { %4675 = vtanh.f32 %v498_v33 }
 0xa48   :  { %v4676_v35 = vpop.eup %4675 }
 0xa49   :  { %501 = vrot.lane.b32.xlu0 %v4676_v35, %s4793_s21 }
 0xabb   :  { %v502_v36 = vpop.permute.xlu0 %501 }
 0xabc   :  { %v504_v37 = vmul.f32 %v4674_v28, %v502_v36 }
 0xabe   :  { %509 = vrot.lane.b32.xlu1 %v504_v37, %s4793_s21 }
 0xb30   :  { %v510_v38 = vpop.permute.xlu1 %509 }
 0xb31   :  { %512 = vst.msk [vmem:[#allocation2] sm:$0xff] %vm48_vm2, %v510_v38 }
 0xb38   :  { %v513_v39 = vld [vmem:[#allocation2] sm:$0xff] }
 0xb39   :  { %3686 = vmatmul.mubr.msk.f32.vlgmr.msra.gmra.mrb[4].mxu0 %vm65_vm3, %v513_v39  ;;  %621 = vst.msk [vmem:[#allocation2] sm:$0xff] %vm46_vm1, %v3240_v54  ;;  %v974_v54 = vld [vmem:[%s5751_s6 + $0x10] sm:$0xff] }
 0xb3a   :  { %4304 = vmatpush3.bf16.msra.mxu0 %v4869_v4  ;;  %3723 = vmatprep.mubr.msk.f32.mxu0 %vm4791_vm0, %v4792_v6 }
 0xb3b   :  { %4305 = vmatprep.subr.bf16.mxu0 %v4790_v3 }
 0xb3e   :  { %4307 = vmatpush3.bf16.msra.mxu0 %v4883_v8 }
 0xb3f   :  { %4308 = vmatprep.subr.bf16.mxu0 %v4790_v3 }
 0xb42   :  { %4310 = vmatpush3.bf16.msra.mxu0 %v4898_v11 }
 0xb43   :  { %4311 = vmatprep.subr.bf16.mxu0 %v4790_v3 }
 0xb46   :  { %4313 = vmatpush3.bf16.msra.mxu0 %v4910_v14 }
 0xb47   :  { %4326 = vmatprep.subr.bf16.mxu0 %v4790_v3 }
 0xc0c   :  { %v591_v40 = vpop.f32.mrb[4].mxu0 }
 0xc0d   :  { %v592_v41 = vadd.f32 %v4933_v16, %v591_v40  ;;  %v3687_v42 = vpop.f32.mrb[5].mxu0 }
 0xc0f   :  { %4677 = vtanh.f32 %v592_v41  ;;  %v595_v44 = vsub.f32 0.0, %v592_v41 }
 0xc11   :  { %v596_v45 = vmul.f32 1.442695, %v595_v44 }
 0xc13   :  { %4679 = vpow2.f32 %v596_v45 }
 0xc19   :  { %v4678_v43 = vpop.eup %4677 }
 0xc1a   :  { %604 = vrot.lane.b32.xlu0 %v4678_v43, %s4793_s21 }
 0xc1d   :  { %v4680_v46 = vpop.eup %4679 }
 0xc1e   :  { %v598_v47 = vadd.f32 1.0, %v4680_v46 }
 0xc20   :  { %4681 = vrcp.f32 %v598_v47 }
 0xc2a   :  { %v4682_v48 = vpop.eup %4681 }
 0xc2b   :  { %v602_v51 = vmul.f32 %v4682_v48, %v498_v33  ;;  %v3244_v33 = vld [vmem:[%s5746_s1 + $0x38] sm:$0xff] }
 0xc8c   :  { %v605_v49 = vpop.permute.xlu0 %604 }
 0xc8d   :  { %v607_v50 = vmul.f32 %v4682_v48, %v605_v49 }
 0xc8f   :  { %609 = vrot.lane.b32.xlu1 %v607_v50, %s4794_s5 }
 0xd01   :  { %v610_v52 = vpop.permute.xlu1 %609 }
 0xd02   :  { %v612_v53 = vadd.f32 %v610_v52, %v602_v51 }
 0xd04   :  { %4683 = vtanh.f32 %v612_v53 }
 0xd0e   :  { %v4684_v55 = vpop.eup %4683 }
 0xd0f   :  { %615 = vrot.lane.b32.xlu0 %v4684_v55, %s4793_s21 }
 0xd81   :  { %v616_v56 = vpop.permute.xlu0 %615 }
 0xd82   :  { %v618_v57 = vmul.f32 %v4682_v48, %v616_v56  ;;  %v975_v56 = vld [vmem:[%s5751_s6 + $0x18] sm:$0xff] }
 0xd84   :  { %623 = vrot.lane.b32.xlu1 %v618_v57, %s4793_s21  ;;  %v964_v57 = vld [vmem:[%s5748_s3] sm:$0xff] }
 0xdf6   :  { %v624_v58 = vpop.permute.xlu1 %623 }
 0xdf7   :  { %626 = vst.msk [vmem:[#allocation2] sm:$0xff] %vm48_vm2, %v624_v58  ;;  %v5088_v58 = vpack.c.bf16 %v975_v56, %v974_v54  ;;  %v1190_v56 = vld [vmem:[%s5755_s10 + $0x60] sm:$0xff] }
 0xdfe   :  { %v627_v59 = vld [vmem:[#allocation2] sm:$0xff] }
 0xdff   :  { %3705 = vmatmul.mubr.msk.f32.vlgmr.msra.gmra.mrb[4].mxu1 %vm65_vm3, %v627_v59  ;;  %735 = vst.msk [vmem:[#allocation2] sm:$0xff] %vm46_vm1, %v3242_v10 }
 0xe00   :  { %4316 = vmatpush3.bf16.msra.mxu1 %v4869_v4  ;;  %3742 = vmatprep.mubr.msk.f32.mxu1 %vm4791_vm0, %v4792_v6 }
 0xe01   :  { %4317 = vmatprep.subr.bf16.mxu1 %v4790_v3 }
 0xe04   :  { %4319 = vmatpush3.bf16.msra.mxu1 %v4883_v8 }
 0xe05   :  { %4320 = vmatprep.subr.bf16.mxu1 %v4790_v3 }
 0xe08   :  { %4322 = vmatpush3.bf16.msra.mxu1 %v4898_v11 }
 0xe09   :  { %4323 = vmatprep.subr.bf16.mxu1 %v4790_v3 }
 0xe0c   :  { %4325 = vmatpush3.bf16.msra.mxu1 %v4910_v14 }
 0xe0d   :  { %4338 = vmatprep.subr.bf16.mxu1 %v4790_v3 }
 0xed2   :  { %v705_v60 = vpop.f32.mrb[4].mxu1 }
 0xed3   :  { %v706_v4 = vadd.f32 %v4933_v16, %v705_v60  ;;  %v3706_v61 = vpop.f32.mrb[5].mxu1  ;;  %v976_v60 = vld [vmem:[%s5751_s6 + $0x20] sm:$0xff] }
 0xed5   :  { %4685 = vtanh.f32 %v706_v4  ;;  %v709_v63 = vsub.f32 0.0, %v706_v4  ;;  %v977_v4 = vld [vmem:[%s5751_s6 + $0x28] sm:$0xff] }
 0xed6   :  { %v5100_v61 = vpack.c.bf16 %v977_v4, %v976_v60  ;;  %v1192_v60 = vld [vmem:[%s5755_s10 + $0x70] sm:$0xff]  ;;  %v1193_v4 = vld [vmem:[%s5755_s10 + $0x78] sm:$0xff] }
 0xed7   :  { %v710_v8 = vmul.f32 1.442695, %v709_v63  ;;  %v979_v63 = vld [vmem:[%s5751_s6 + $0x38] sm:$0xff] }
 0xed9   :  { %4687 = vpow2.f32 %v710_v8 }
 0xedf   :  { %v4686_v62 = vpop.eup %4685 }
 0xee0   :  { %718 = vrot.lane.b32.xlu0 %v4686_v62, %s4793_s21  ;;  %v978_v62 = vld [vmem:[%s5751_s6 + $0x30] sm:$0xff] }
 0xee1   :  { %v5109_v8 = vpack.c.bf16 %v979_v63, %v978_v62  ;;  %v5248_v62 = vpack.c.bf16 %v1193_v4, %v1192_v60  ;;  %v961_v63 = vlaneseq }
 0xee3   :  { %v4688_v0 = vpop.eup %4687 }
 0xee4   :  { %v712_v1 = vadd.f32 1.0, %v4688_v0 }
 0xee6   :  { %4689 = vrcp.f32 %v712_v1 }
 0xef0   :  { %v4690_v11 = vpop.eup %4689 }
 0xef1   :  { %v716_v14 = vmul.f32 %v4690_v11, %v612_v53  ;;  %v973_v53 = vld [vmem:[%s5751_s6 + $0x8] sm:$0xff] }
 0xf52   :  { %v719_v2 = vpop.permute.xlu0 %718 }
 0xf53   :  { %v721_v5 = vmul.f32 %v4690_v11, %v719_v2 }
 0xf55   :  { %723 = vrot.lane.b32.xlu1 %v721_v5, %s4794_s5  ;;  %v5130_v5 = vld [vmem:[%s5752_s7] ss:$0 sm:$0xff] }
 0xfc7   :  { %v724_v7 = vpop.permute.xlu1 %723 }
 0xfc8   :  { %v726_v9 = vadd.f32 %v724_v7, %v716_v14 }
 0xfca   :  { %4691 = vtanh.f32 %v726_v9 }
 0xfd4   :  { %v4692_v12 = vpop.eup %4691 }
 0xfd5   :  { %729 = vrot.lane.b32.xlu0 %v4692_v12, %s4793_s21 }
0x1047   :  { %v730_v13 = vpop.permute.xlu0 %729 }
0x1048   :  { %v732_v15 = vmul.f32 %v4690_v11, %v730_v13 }
0x104a   :  { %737 = vrot.lane.b32.xlu1 %v732_v15, %s4793_s21 }
0x10bc   :  { %v738_v17 = vpop.permute.xlu1 %737 }
0x10bd   :  { %740 = vst.msk [vmem:[#allocation2] sm:$0xff] %vm48_vm2, %v738_v17 }
0x10c4   :  { %v741_v18 = vld [vmem:[#allocation2] sm:$0xff] }
0x10c5   :  { %3724 = vmatmul.mubr.msk.f32.vlgmr.msra.gmra.mrb[6].mxu0 %vm65_vm3, %v741_v18  ;;  %849 = vst.msk [vmem:[#allocation2] sm:$0xff] %vm46_vm1, %v3244_v33 }
0x10c6   :  { %3761 = vmatprep.mubr.msk.f32.mxu0 %vm4791_vm0, %v4792_v6 }
0x1198   :  { %v819_v19 = vpop.f32.mrb[6].mxu0 }
0x1199   :  { %v820_v20 = vadd.f32 %v4933_v16, %v819_v19  ;;  %v3725_v21 = vpop.f32.mrb[7].mxu0 }
0x119b   :  { %4693 = vtanh.f32 %v820_v20  ;;  %v823_v23 = vsub.f32 0.0, %v820_v20 }
0x119d   :  { %v824_v24 = vmul.f32 1.442695, %v823_v23 }
0x119f   :  { %4695 = vpow2.f32 %v824_v24  ;;  %v1083_v24 = vld [vmem:[%s5753_s8] sm:$0xff] }
0x11a5   :  { %v4694_v22 = vpop.eup %4693 }
0x11a6   :  { %832 = vrot.lane.b32.xlu0 %v4694_v22, %s4793_s21 }
0x11a9   :  { %v4696_v25 = vpop.eup %4695 }
0x11aa   :  { %v826_v26 = vadd.f32 1.0, %v4696_v25  ;;  %v1084_v25 = vld [vmem:[%s5753_s8 + $0x8] sm:$0xff] }
0x11ac   :  { %4697 = vrcp.f32 %v826_v26  ;;  %v1085_v26 = vld [vmem:[%s5753_s8 + $0x10] sm:$0xff] }
0x11b6   :  { %v4698_v27 = vpop.eup %4697 }
0x11b7   :  { %v830_v30 = vmul.f32 %v4698_v27, %v726_v9 }
0x1218   :  { %v833_v28 = vpop.permute.xlu0 %832 }
0x1219   :  { %v835_v29 = vmul.f32 %v4698_v27, %v833_v28  ;;  %v1086_v28 = vld [vmem:[%s5753_s8 + $0x18] sm:$0xff] }
0x121b   :  { %837 = vrot.lane.b32.xlu1 %v835_v29, %s4794_s5  ;;  %v5153_v29 = vpack.c.bf16 %v1086_v28, %v1085_v26 }
0x128d   :  { %v838_v31 = vpop.permute.xlu1 %837 }
0x128e   :  { %v840_v32 = vadd.f32 %v838_v31, %v830_v30 }
0x1290   :  { %4699 = vtanh.f32 %v840_v32 }
0x129a   :  { %v4700_v34 = vpop.eup %4699 }
0x129b   :  { %843 = vrot.lane.b32.xlu0 %v4700_v34, %s4793_s21  ;;  %v5166_v34 = vld [vmem:[%s5754_s9] ss:$0 sm:$0xff] }
0x130d   :  { %v844_v35 = vpop.permute.xlu0 %843 }
0x130e   :  { %v846_v36 = vmul.f32 %v4698_v27, %v844_v35  ;;  %v5147_v27 = vpack.c.bf16 %v1084_v25, %v1083_v24 }
0x1310   :  { %851 = vrot.lane.b32.xlu1 %v846_v36, %s4793_s21 }
0x1382   :  { %v852_v37 = vpop.permute.xlu1 %851 }
0x1383   :  { %854 = vst.msk [vmem:[#allocation2] sm:$0xff] %vm48_vm2, %v852_v37 }
0x138a   :  { %v855_v38 = vld [vmem:[#allocation2] sm:$0xff] }
0x138b   :  { %3743 = vmatmul.mubr.msk.f32.vlgmr.msra.gmra.mrb[6].mxu1 %vm65_vm3, %v855_v38  ;;  %965 = vst.msk [vmem:[#allocation2] sm:$0xff] %vm46_vm1, %v964_v57  ;;  %v1178_v38 = vld [vmem:[%s5755_s10] sm:$0xff]  ;;  %v1191_v57 = vld [vmem:[%s5755_s10 + $0x68] sm:$0xff] }
0x138c   :  { %3772 = vmatprep.mubr.msk.f32.mxu1 %vm4791_vm0, %v4792_v6  ;;  %4340 = vmatpush3.bf16.msra.mxu1 %v5147_v27 }
0x138d   :  { %4341 = vmatprep.subr.bf16.mxu1 %v4790_v3 }
0x1390   :  { %4343 = vmatpush3.bf16.msra.mxu1 %v5153_v29 }
0x1391   :  { %4344 = vmatprep.subr.bf16.mxu1 %v4790_v3 }
0x145e   :  { %v933_v39 = vpop.f32.mrb[6].mxu1 }
0x145f   :  { %v934_v40 = vadd.f32 %v4933_v16, %v933_v39  ;;  %v3744_v41 = vpop.f32.mrb[7].mxu1  ;;  %v972_v16 = vld [vmem:[%s5751_s6] sm:$0xff]  ;;  %v1179_v39 = vld [vmem:[%s5755_s10 + $0x8] sm:$0xff] }
0x1460   :  { %v5078_v55 = vpack.c.bf16 %v973_v53, %v972_v16  ;;  %v5181_v41 = vpack.c.bf16 %v1179_v39, %v1178_v38  ;;  %v1188_v16 = vld [vmem:[%s5755_s10 + $0x50] sm:$0xff]  ;;  %v1189_v53 = vld [vmem:[%s5755_s10 + $0x58] sm:$0xff] }
0x1461   :  { %4701 = vtanh.f32 %v934_v40  ;;  %v937_v43 = vsub.f32 0.0, %v934_v40  ;;  %v1180_v40 = vld [vmem:[%s5755_s10 + $0x10] sm:$0xff]  ;;  %v5228_v54 = vpack.c.bf16 %v1189_v53, %v1188_v16 }
0x1462   :  { %4328 = vmatpush3.bf16.msra.mxu0 %v5078_v55 }
0x1463   :  { %v938_v44 = vmul.f32 1.442695, %v937_v43  ;;  %4329 = vmatprep.subr.bf16.mxu0 %v4790_v3 }
0x1465   :  { %4703 = vpow2.f32 %v938_v44  ;;  %v1182_v44 = vld [vmem:[%s5755_s10 + $0x20] sm:$0xff] }
0x1466   :  { %4331 = vmatpush3.bf16.msra.mxu0 %v5088_v58 }
0x1467   :  { %4332 = vmatprep.subr.bf16.mxu0 %v4790_v3 }
0x146a   :  { %4334 = vmatpush3.bf16.msra.mxu0 %v5100_v61 }
0x146b   :  { %v4702_v42 = vpop.eup %4701  ;;  %4335 = vmatprep.subr.bf16.mxu0 %v4790_v3 }
0x146c   :  { %946 = vrot.lane.b32.xlu0 %v4702_v42, %s4793_s21  ;;  %v1181_v42 = vld [vmem:[%s5755_s10 + $0x18] sm:$0xff] }
0x146d   :  { %v5187_v43 = vpack.c.bf16 %v1181_v42, %v1180_v40 }
0x146e   :  { %4337 = vmatpush3.bf16.msra.mxu0 %v5109_v8 }
0x146f   :  { %v4704_v45 = vpop.eup %4703  ;;  %4368 = vmatprep.subr.bf16.mxu0 %v4790_v3 }
0x1470   :  { %v940_v46 = vadd.f32 1.0, %v4704_v45  ;;  %v1183_v45 = vld [vmem:[%s5755_s10 + $0x28] sm:$0xff] }
0x1472   :  { %4705 = vrcp.f32 %v940_v46  ;;  %v5198_v46 = vpack.c.bf16 %v1183_v45, %v1182_v44 }
0x147c   :  { %v4706_v47 = vpop.eup %4705 }
0x147d   :  { %v944_v50 = vmul.f32 %v4706_v47, %v840_v32 }
0x14de   :  { %v947_v48 = vpop.permute.xlu0 %946 }
0x14df   :  { %v949_v49 = vmul.f32 %v4706_v47, %v947_v48  ;;  %v1185_v48 = vld [vmem:[%s5755_s10 + $0x38] sm:$0xff] }
0x14e1   :  { %951 = vrot.lane.b32.xlu1 %v949_v49, %s4794_s5 }
0x1553   :  { %v952_v51 = vpop.permute.xlu1 %951 }
0x1554   :  { %v954_v52 = vadd.f32 %v952_v51, %v944_v50  ;;  %v1186_v50 = vld [vmem:[%s5755_s10 + $0x40] sm:$0xff]  ;;  %v1187_v51 = vld [vmem:[%s5755_s10 + $0x48] sm:$0xff] }
0x1556   :  { %4707 = vtanh.f32 %v954_v52 }
0x1560   :  { %v4708_v59 = vpop.eup %4707 }
0x1561   :  { %957 = vrot.lane.b32.xlu0 %v4708_v59, %s4793_s21  ;;  %v5238_v59 = vpack.c.bf16 %v1191_v57, %v1190_v56 }
0x15d3   :  { %v958_v0 = vpop.permute.xlu0 %957 }
0x15d4   :  { %v960_v1 = vmul.f32 %v4706_v47, %v958_v0  ;;  %v1184_v47 = vld [vmem:[%s5755_s10 + $0x30] sm:$0xff]  ;;  %v962_v0 = vand.u32 127, %v961_v63 }
0x15d5   :  { %v5208_v49 = vpack.c.bf16 %v1185_v48, %v1184_v47 }
0x15d6   :  { %967 = vrot.lane.b32.xlu1 %v960_v1, %s4793_s21  ;;  %v5253_v1 = vcvt.s32.f32 %v962_v0 }
0x1648   :  { %v968_v11 = vpop.permute.xlu1 %967 }
0x1649   :  { %970 = vst.msk [vmem:[#allocation2] sm:$0xff] %vm48_vm2, %v968_v11 }
0x1650   :  { %v971_v2 = vld [vmem:[#allocation2] sm:$0xff] }
0x1651   :  { %3762 = vmatmul.mubr.msk.f32.vlgmr.msra.gmra.mrb[8].mxu0 %vm65_vm3, %v971_v2 }
0x1652   :  { %4370 = vmatpush3.bf16.msra.mxu0 %v5078_v55  ;;  %3826 = vmatprep.mubr.msk.f32.mxu0 %vm4791_vm0, %v4792_v6 }
0x1653   :  { %4371 = vmatprep.subr.bf16.mxu0 %v4790_v3 }
0x1656   :  { %4373 = vmatpush3.bf16.msra.mxu0 %v5088_v58 }
0x1657   :  { %4374 = vmatprep.subr.bf16.mxu0 %v4790_v3 }
0x165a   :  { %4376 = vmatpush3.bf16.msra.mxu0 %v5100_v61 }
0x165b   :  { %4377 = vmatprep.subr.bf16.mxu0 %v4790_v3 }
0x165e   :  { %4379 = vmatpush3.bf16.msra.mxu0 %v5109_v8 }
0x165f   :  { %4380 = vmatprep.subr.bf16.mxu0 %v4790_v3 }
0x1724   :  { %v1055_v14 = vpop.f32.mrb[8].mxu0 }
0x1725   :  { %v1056_v7 = vadd.f32 %v5130_v5, %v1055_v14  ;;  %v3763_v9 = vpop.f32.mrb[9].mxu0 }
0x1726   :  { %v1268_v9 = vstv %s1267_s15 }
0x1727   :  { %4709 = vtanh.f32 %v1056_v7  ;;  %v1059_v12 = vsub.f32 0.0, %v1056_v7  ;;  %v4795_v7 = vmov 1.0   ;;  %vm1269_vm6 = vcmp.eq.s32.totalorder %v1268_v9, 1 }
0x1729   :  { %v1060_v13 = vmul.f32 1.442695, %v1059_v12 }
0x172b   :  { %4711 = vpow2.f32 %v1060_v13 }
0x1731   :  { %v4710_v10 = vpop.eup %4709 }
0x1732   :  { %1068 = vrot.lane.b32.xlu0 %v4710_v10, %s4793_s21  ;;  %v1266_v10 = vld [vmem:[%s5747_s2] sm:$0xff] }
0x1735   :  { %v4712_v15 = vpop.eup %4711 }
0x1736   :  { %v1062_v17 = vadd.f32 1.0, %v4712_v15 }
0x1738   :  { %4713 = vrcp.f32 %v1062_v17 }
0x1742   :  { %v4714_v18 = vpop.eup %4713 }
0x1743   :  { %v1066_v21 = vmul.f32 %v4714_v18, %v954_v52  ;;  %v5218_v52 = vpack.c.bf16 %v1187_v51, %v1186_v50  ;;  %v1562_v50 = vstv %s1561_s4  ;;  %v3257_v51 = vld [vmem:[%s5747_s2 + $0x8] sm:$0xff] }
0x1744   :  { %vm1563_vm9 = vcmp.eq.s32.totalorder %v1562_v50, 1 }
0x17a4   :  { %v1069_v19 = vpop.permute.xlu0 %1068 }
0x17a5   :  { %v1071_v20 = vmul.f32 %v4714_v18, %v1069_v19 }
0x17a7   :  { %1073 = vrot.lane.b32.xlu1 %v1071_v20, %s4794_s5 }
0x1819   :  { %v1074_v22 = vpop.permute.xlu1 %1073 }
0x181a   :  { %v5135_v23 = vadd.f32 %v1074_v22, %v1066_v21 }
0x181c   :  { %4715 = vtanh.f32 %v5135_v23 }
0x1826   :  { %v4716_v30 = vpop.eup %4715 }
0x1827   :  { %1079 = vrot.lane.b32.xlu0 %v4716_v30, %s4793_s21 }
0x1899   :  { %v1080_v31 = vpop.permute.xlu0 %1079 }
0x189a   :  { %v1082_v32 = vmul.f32 %v4714_v18, %v1080_v31 }
0x189c   :  { %1094 = vrot.lane.b32.xlu1 %v1082_v32, %s4794_s5 }
0x190e   :  { %v1095_v33 = vpop.permute.xlu1 %1094 }
0x190f   :  { %3773 = vmatmul.mubr.msk.f32.vlgmr.msra.gmra.mrb[8].mxu1 %vm46_vm1, %v1095_v33 }
0x1910   :  { %3807 = vmatprep.mubr.msk.f32.mxu1 %vm4791_vm0, %v4792_v6  ;;  %4346 = vmatpush3.bf16.msra.mxu1 %v5181_v41 }
0x1911   :  { %4347 = vmatprep.subr.bf16.mxu1 %v4790_v3 }
0x1914   :  { %4349 = vmatpush3.bf16.msra.mxu1 %v5187_v43 }
0x1915   :  { %4350 = vmatprep.subr.bf16.mxu1 %v4790_v3 }
0x1918   :  { %4352 = vmatpush3.bf16.msra.mxu1 %v5198_v46 }
0x1919   :  { %4353 = vmatprep.subr.bf16.mxu1 %v4790_v3 }
0x191c   :  { %4355 = vmatpush3.bf16.msra.mxu1 %v5208_v49 }
0x191d   :  { %4356 = vmatprep.subr.bf16.mxu1 %v4790_v3 }
0x1920   :  { %4358 = vmatpush3.bf16.msra.mxu1 %v5218_v52 }
0x1921   :  { %4359 = vmatprep.subr.bf16.mxu1 %v4790_v3 }
0x1924   :  { %4361 = vmatpush3.bf16.msra.mxu1 %v5228_v54 }
0x1925   :  { %4362 = vmatprep.subr.bf16.mxu1 %v4790_v3 }
0x1928   :  { %4364 = vmatpush3.bf16.msra.mxu1 %v5238_v59 }
0x1929   :  { %4365 = vmatprep.subr.bf16.mxu1 %v4790_v3 }
0x192c   :  { %4367 = vmatpush3.bf16.msra.mxu1 %v5248_v62 }
0x192d   :  { %4410 = vmatprep.subr.bf16.mxu1 %v4790_v3 }
0x19e2   :  { %v1164_v35 = vpop.f32.mrb[8].mxu1 }
0x19e3   :  { %v1165_v36 = vadd.f32 %v5166_v34, %v1164_v35  ;;  %v3774_v37 = vpop.f32.mrb[9].mxu1 }
0x19e5   :  { %1168 = vst [vmem:[%s5756_s11] sm:$0xff] %v1165_v36  ;;  %1169 = vmax.xlane.f32.xlu0 %v1165_v36 }
0x19fb   :  { %1272 = vrot.lane.b32.xlu0 %v1082_v32, %s4793_s21 }
0x1a72   :  { %v1170_v11 = vpop.xlane.xlu0 %1169 }
0x1a73   :  { %vm1171_vm4 = vcmp.ge.f32.partialorder %v1165_v36, %v1170_v11 }
0x1a74   :  { %v1172_v2 = vsel %vm1171_vm4, %v5253_v1, 128.0 }
0x1a75   :  { %1173 = vmin.xlane.f32.xlu1 %v1172_v2 }
0x1a76   :  { %v1273_v17 = vpop.permute.xlu0 %1272 }
0x1b02   :  { %v1174_v14 = vpop.xlane.xlu1 %1173 }
0x1b03   :  { %vm1175_vm5 = vcmp.eq.f32.partialorder %v5253_v1, %v1174_v14 }
0x1b04   :  { %3808 = vmatmul.mubr.msk.f32.vlgmr.msra.gmra.mrb[10].mxu1 %vm1175_vm5, %v4795_v7 }
0x1b05   :  { %4412 = vmatpush3.bf16.msra.mxu1 %v5078_v55  ;;  %3891 = vmatprep.mubr.msk.f32.mxu1 %vm4791_vm0, %v4792_v6 }
0x1b06   :  { %4413 = vmatprep.subr.bf16.mxu1 %v4790_v3 }
0x1b09   :  { %4415 = vmatpush3.bf16.msra.mxu1 %v5088_v58 }
0x1b0a   :  { %4416 = vmatprep.subr.bf16.mxu1 %v4790_v3 }
0x1b0d   :  { %4418 = vmatpush3.bf16.msra.mxu1 %v5100_v61 }
0x1b0e   :  { %4419 = vmatprep.subr.bf16.mxu1 %v4790_v3 }
0x1b11   :  { %4421 = vmatpush3.bf16.msra.mxu1 %v5109_v8 }
0x1b12   :  { %4422 = vmatprep.subr.bf16.mxu1 %v4790_v3 }
0x1bd7   :  { %v1260_v12 = vpop.f32.mrb[10].mxu1 }
0x1bd8   :  { %v1270_v13 = vsel %vm1269_vm6, %v1266_v10, %v1260_v12  ;;  %v3809_v15 = vpop.f32.mrb[11].mxu1 }
0x1bd9   :  { %1271 = vst.msk [vmem:[#allocation2] sm:$0xff] %vm46_vm1, %v1270_v13 }
0x1bda   :  { %1275 = vst.msk [vmem:[#allocation2] sm:$0xff] %vm48_vm2, %v1273_v17 }
0x1be1   :  { %v1276_v18 = vld [vmem:[#allocation2] sm:$0xff] }
0x1be2   :  { %3827 = vmatmul.mubr.msk.f32.vlgmr.msra.gmra.mrb[10].mxu0 %vm65_vm3, %v1276_v18 }
0x1be3   :  { %4382 = vmatpush3.bf16.msra.mxu0 %v5147_v27  ;;  %3837 = vmatprep.mubr.msk.f32.mxu0 %vm4791_vm0, %v4792_v6 }
0x1be4   :  { %4383 = vmatprep.subr.bf16.mxu0 %v4790_v3 }
0x1be7   :  { %4385 = vmatpush3.bf16.msra.mxu0 %v5153_v29 }
0x1be8   :  { %4386 = vmatprep.subr.bf16.mxu0 %v4790_v3 }
0x1cb5   :  { %v1354_v19 = vpop.f32.mrb[10].mxu0 }
0x1cb6   :  { %v1355_v20 = vadd.f32 %v5130_v5, %v1354_v19  ;;  %v3828_v21 = vpop.f32.mrb[11].mxu0 }
0x1cb8   :  { %4717 = vtanh.f32 %v1355_v20  ;;  %v1358_v24 = vsub.f32 0.0, %v1355_v20 }
0x1cba   :  { %v1359_v25 = vmul.f32 1.442695, %v1358_v24 }
0x1cbc   :  { %4719 = vpow2.f32 %v1359_v25 }
0x1cc2   :  { %v4718_v22 = vpop.eup %4717 }
0x1cc3   :  { %1367 = vrot.lane.b32.xlu1 %v4718_v22, %s4793_s21 }
0x1cc6   :  { %v4720_v26 = vpop.eup %4719 }
0x1cc7   :  { %v1361_v28 = vadd.f32 1.0, %v4720_v26 }
0x1cc9   :  { %4721 = vrcp.f32 %v1361_v28 }
0x1cd3   :  { %v4722_v30 = vpop.eup %4721 }
0x1cd4   :  { %v1365_v33 = vmul.f32 %v4722_v30, %v5135_v23 }
0x1d35   :  { %v1368_v31 = vpop.permute.xlu1 %1367 }
0x1d36   :  { %v1370_v32 = vmul.f32 %v4722_v30, %v1368_v31 }
0x1d38   :  { %1372 = vrot.lane.b32.xlu0 %v1370_v32, %s4794_s5 }
0x1daa   :  { %v1373_v35 = vpop.permute.xlu0 %1372 }
0x1dab   :  { %v5284_v36 = vadd.f32 %v1373_v35, %v1365_v33  ;;  %v3263_v33 = vld [vmem:[%s5747_s2 + $0x10] sm:$0xff] }
0x1dad   :  { %4723 = vtanh.f32 %v5284_v36 }
0x1db7   :  { %v4724_v37 = vpop.eup %4723 }
0x1db8   :  { %1378 = vrot.lane.b32.xlu1 %v4724_v37, %s4793_s21 }
0x1e2a   :  { %v1379_v38 = vpop.permute.xlu1 %1378 }
0x1e2b   :  { %v1381_v39 = vmul.f32 %v4722_v30, %v1379_v38 }
0x1e2d   :  { %1387 = vrot.lane.b32.xlu0 %v1381_v39, %s4794_s5 }
0x1e9f   :  { %v1388_v40 = vpop.permute.xlu0 %1387 }
0x1ea0   :  { %3838 = vmatmul.mubr.msk.f32.vlgmr.msra.gmra.mrb[12].mxu0 %vm46_vm1, %v1388_v40 }
0x1ea1   :  { %4388 = vmatpush3.bf16.msra.mxu0 %v5181_v41  ;;  %3872 = vmatprep.mubr.msk.f32.mxu0 %vm4791_vm0, %v4792_v6 }
0x1ea2   :  { %4389 = vmatprep.subr.bf16.mxu0 %v4790_v3 }
0x1ea5   :  { %4391 = vmatpush3.bf16.msra.mxu0 %v5187_v43 }
0x1ea6   :  { %4392 = vmatprep.subr.bf16.mxu0 %v4790_v3 }
0x1ea9   :  { %4394 = vmatpush3.bf16.msra.mxu0 %v5198_v46 }
0x1eaa   :  { %4395 = vmatprep.subr.bf16.mxu0 %v4790_v3 }
0x1ead   :  { %4397 = vmatpush3.bf16.msra.mxu0 %v5208_v49 }
0x1eae   :  { %4398 = vmatprep.subr.bf16.mxu0 %v4790_v3 }
0x1eb1   :  { %4400 = vmatpush3.bf16.msra.mxu0 %v5218_v52 }
0x1eb2   :  { %4401 = vmatprep.subr.bf16.mxu0 %v4790_v3 }
0x1eb5   :  { %4403 = vmatpush3.bf16.msra.mxu0 %v5228_v54 }
0x1eb6   :  { %4404 = vmatprep.subr.bf16.mxu0 %v4790_v3 }
0x1eb9   :  { %4406 = vmatpush3.bf16.msra.mxu0 %v5238_v59 }
0x1eba   :  { %4407 = vmatprep.subr.bf16.mxu0 %v4790_v3 }
0x1ebd   :  { %4409 = vmatpush3.bf16.msra.mxu0 %v5248_v62 }
0x1ebe   :  { %4452 = vmatprep.subr.bf16.mxu0 %v4790_v3 }
0x1f73   :  { %v1457_v23 = vpop.f32.mrb[12].mxu0 }
0x1f74   :  { %v1458_v42 = vadd.f32 %v5166_v34, %v1457_v23  ;;  %v3839_v44 = vpop.f32.mrb[13].mxu0 }
0x1f76   :  { %1461 = vst [vmem:[%s5756_s11 + $0x8] sm:$0xff] %v1458_v42  ;;  %1462 = vmax.xlane.f32.xlu1 %v1458_v42 }
0x2003   :  { %v1463_v45 = vpop.xlane.xlu1 %1462 }
0x2004   :  { %vm1464_vm7 = vcmp.ge.f32.partialorder %v1458_v42, %v1463_v45 }
0x2005   :  { %v1465_v47 = vsel %vm1464_vm7, %v5253_v1, 128.0 }
0x2006   :  { %1466 = vmin.xlane.f32.xlu0 %v1465_v47 }
0x201c   :  { %1566 = vrot.lane.b32.xlu0 %v1381_v39, %s4793_s21 }
0x2093   :  { %v1467_v48 = vpop.xlane.xlu0 %1466 }
0x2094   :  { %vm1468_vm8 = vcmp.eq.f32.partialorder %v5253_v1, %v1467_v48 }
0x2095   :  { %3873 = vmatmul.mubr.msk.f32.vlgmr.msra.gmra.mrb[14].mxu0 %vm1468_vm8, %v4795_v7 }
0x2096   :  { %4454 = vmatpush3.bf16.msra.mxu0 %v5078_v55  ;;  %3956 = vmatprep.mubr.msk.f32.mxu0 %vm4791_vm0, %v4792_v6 }
0x2097   :  { %4455 = vmatprep.subr.bf16.mxu0 %v4790_v3  ;;  %v1567_v57 = vpop.permute.xlu0 %1566 }
0x209a   :  { %4457 = vmatpush3.bf16.msra.mxu0 %v5088_v58 }
0x209b   :  { %4458 = vmatprep.subr.bf16.mxu0 %v4790_v3 }
0x209e   :  { %4460 = vmatpush3.bf16.msra.mxu0 %v5100_v61 }
0x209f   :  { %4461 = vmatprep.subr.bf16.mxu0 %v4790_v3 }
0x20a2   :  { %4463 = vmatpush3.bf16.msra.mxu0 %v5109_v8 }
0x20a3   :  { %4464 = vmatprep.subr.bf16.mxu0 %v4790_v3 }
0x2168   :  { %v1553_v16 = vpop.f32.mrb[14].mxu0 }
0x2169   :  { %v1564_v53 = vsel %vm1563_vm9, %v3257_v51, %v1553_v16  ;;  %v3874_v56 = vpop.f32.mrb[15].mxu0 }
0x216a   :  { %1565 = vst.msk [vmem:[#allocation2] sm:$0xff] %vm46_vm1, %v1564_v53 }
0x216b   :  { %1569 = vst.msk [vmem:[#allocation2] sm:$0xff] %vm48_vm2, %v1567_v57 }
0x2172   :  { %v1570_v60 = vld [vmem:[#allocation2] sm:$0xff] }
0x2173   :  { %3892 = vmatmul.mubr.msk.f32.vlgmr.msra.gmra.mrb[12].mxu1 %vm65_vm3, %v1570_v60 }
0x2174   :  { %4424 = vmatpush3.bf16.msra.mxu1 %v5147_v27  ;;  %3902 = vmatprep.mubr.msk.f32.mxu1 %vm4791_vm0, %v4792_v6 }
0x2175   :  { %4425 = vmatprep.subr.bf16.mxu1 %v4790_v3 }
0x2178   :  { %4427 = vmatpush3.bf16.msra.mxu1 %v5153_v29 }
0x2179   :  { %4428 = vmatprep.subr.bf16.mxu1 %v4790_v3 }
0x2246   :  { %v1648_v4 = vpop.f32.mrb[12].mxu1 }
0x2247   :  { %v1649_v63 = vadd.f32 %v5130_v5, %v1648_v4  ;;  %v3893_v0 = vpop.f32.mrb[13].mxu1 }
0x2249   :  { %4725 = vtanh.f32 %v1649_v63  ;;  %v1652_v2 = vsub.f32 0.0, %v1649_v63 }
0x224b   :  { %v1653_v14 = vmul.f32 1.442695, %v1652_v2 }
0x224d   :  { %4727 = vpow2.f32 %v1653_v14 }
0x2253   :  { %v4726_v11 = vpop.eup %4725 }
0x2254   :  { %1661 = vrot.lane.b32.xlu1 %v4726_v11, %s4793_s21 }
0x2257   :  { %v4728_v9 = vpop.eup %4727 }
0x2258   :  { %v1655_v10 = vadd.f32 1.0, %v4728_v9 }
0x225a   :  { %4729 = vrcp.f32 %v1655_v10  ;;  %v2150_v10 = vstv %s2149_s30 }
0x225b   :  { %vm2151_vm15 = vcmp.eq.s32.totalorder %v2150_v10, 1 }
0x2264   :  { %v4730_v12 = vpop.eup %4729 }
0x2265   :  { %v1659_v17 = vmul.f32 %v4730_v12, %v5284_v36 }
0x22c6   :  { %v1662_v13 = vpop.permute.xlu1 %1661 }
0x22c7   :  { %v1664_v15 = vmul.f32 %v4730_v12, %v1662_v13 }
0x22c9   :  { %1666 = vrot.lane.b32.xlu1 %v1664_v15, %s4794_s5 }
0x233b   :  { %v1667_v18 = vpop.permute.xlu1 %1666 }
0x233c   :  { %v5342_v19 = vadd.f32 %v1667_v18, %v1659_v17 }
0x233e   :  { %4731 = vtanh.f32 %v5342_v19 }
0x2348   :  { %v4732_v20 = vpop.eup %4731 }
0x2349   :  { %1672 = vrot.lane.b32.xlu0 %v4732_v20, %s4793_s21 }
0x23bb   :  { %v1673_v21 = vpop.permute.xlu0 %1672 }
0x23bc   :  { %v1675_v22 = vmul.f32 %v4730_v12, %v1673_v21  ;;  %v3269_v12 = vld [vmem:[%s5747_s2 + $0x18] sm:$0xff] }
0x23be   :  { %1681 = vrot.lane.b32.xlu1 %v1675_v22, %s4794_s5 }
0x2430   :  { %v1682_v24 = vpop.permute.xlu1 %1681 }
0x2431   :  { %3903 = vmatmul.mubr.msk.f32.vlgmr.msra.gmra.mrb[14].mxu1 %vm46_vm1, %v1682_v24 }
0x2432   :  { %4430 = vmatpush3.bf16.msra.mxu1 %v5181_v41  ;;  %3937 = vmatprep.mubr.msk.f32.mxu1 %vm4791_vm0, %v4792_v6 }
0x2433   :  { %4431 = vmatprep.subr.bf16.mxu1 %v4790_v3 }
0x2436   :  { %4433 = vmatpush3.bf16.msra.mxu1 %v5187_v43 }
0x2437   :  { %4434 = vmatprep.subr.bf16.mxu1 %v4790_v3 }
0x243a   :  { %4436 = vmatpush3.bf16.msra.mxu1 %v5198_v46 }
0x243b   :  { %4437 = vmatprep.subr.bf16.mxu1 %v4790_v3 }
0x243e   :  { %4439 = vmatpush3.bf16.msra.mxu1 %v5208_v49 }
0x243f   :  { %4440 = vmatprep.subr.bf16.mxu1 %v4790_v3 }
0x2442   :  { %4442 = vmatpush3.bf16.msra.mxu1 %v5218_v52 }
0x2443   :  { %4443 = vmatprep.subr.bf16.mxu1 %v4790_v3 }
0x2446   :  { %4445 = vmatpush3.bf16.msra.mxu1 %v5228_v54 }
0x2447   :  { %4446 = vmatprep.subr.bf16.mxu1 %v4790_v3 }
0x244a   :  { %4448 = vmatpush3.bf16.msra.mxu1 %v5238_v59 }
0x244b   :  { %4449 = vmatprep.subr.bf16.mxu1 %v4790_v3 }
0x244e   :  { %4451 = vmatpush3.bf16.msra.mxu1 %v5248_v62 }
0x244f   :  { %4494 = vmatprep.subr.bf16.mxu1 %v4790_v3 }
0x2504   :  { %v1751_v25 = vpop.f32.mrb[14].mxu1 }
0x2505   :  { %v1752_v26 = vadd.f32 %v5166_v34, %v1751_v25  ;;  %v3904_v28 = vpop.f32.mrb[15].mxu1 }
0x2507   :  { %1755 = vst [vmem:[%s5756_s11 + $0x10] sm:$0xff] %v1752_v26  ;;  %1756 = vmax.xlane.f32.xlu0 %v1752_v26 }
0x251d   :  { %1860 = vrot.lane.b32.xlu0 %v1675_v22, %s4793_s21 }
0x2594   :  { %v1757_v30 = vpop.xlane.xlu0 %1756 }
0x2595   :  { %vm1758_vm10 = vcmp.ge.f32.partialorder %v1752_v26, %v1757_v30 }
0x2596   :  { %v1759_v31 = vsel %vm1758_vm10, %v5253_v1, 128.0 }
0x2597   :  { %1760 = vmin.xlane.f32.xlu1 %v1759_v31 }
0x2598   :  { %v1861_v37 = vpop.permute.xlu0 %1860 }
0x2624   :  { %v1761_v32 = vpop.xlane.xlu1 %1760 }
0x2625   :  { %vm1762_vm11 = vcmp.eq.f32.partialorder %v5253_v1, %v1761_v32 }
0x2626   :  { %3938 = vmatmul.mubr.msk.f32.vlgmr.msra.gmra.mrb[16].mxu1 %vm1762_vm11, %v4795_v7 }
0x2627   :  { %4496 = vmatpush3.bf16.msra.mxu1 %v5078_v55  ;;  %4021 = vmatprep.mubr.msk.f32.mxu1 %vm4791_vm0, %v4792_v6  ;;  %v1856_v55 = vstv %s1855_s0 }
0x2628   :  { %4497 = vmatprep.subr.bf16.mxu1 %v4790_v3  ;;  %vm1857_vm12 = vcmp.eq.s32.totalorder %v1856_v55, 1 }
0x262b   :  { %4499 = vmatpush3.bf16.msra.mxu1 %v5088_v58 }
0x262c   :  { %4500 = vmatprep.subr.bf16.mxu1 %v4790_v3 }
0x262f   :  { %4502 = vmatpush3.bf16.msra.mxu1 %v5100_v61 }
0x2630   :  { %4503 = vmatprep.subr.bf16.mxu1 %v4790_v3 }
0x2633   :  { %4505 = vmatpush3.bf16.msra.mxu1 %v5109_v8 }
0x2634   :  { %4506 = vmatprep.subr.bf16.mxu1 %v4790_v3 }
0x26f9   :  { %v1847_v58 = vpop.f32.mrb[16].mxu1 }
0x26fa   :  { %v1858_v35 = vsel %vm1857_vm12, %v3263_v33, %v1847_v58  ;;  %v3939_v36 = vpop.f32.mrb[17].mxu1 }
0x26fb   :  { %1859 = vst.msk [vmem:[#allocation2] sm:$0xff] %vm46_vm1, %v1858_v35 }
0x26fc   :  { %1863 = vst.msk [vmem:[#allocation2] sm:$0xff] %vm48_vm2, %v1861_v37 }
0x2703   :  { %v1864_v61 = vld [vmem:[#allocation2] sm:$0xff] }
0x2704   :  { %3957 = vmatmul.mubr.msk.f32.vlgmr.msra.gmra.mrb[16].mxu0 %vm65_vm3, %v1864_v61 }
0x2705   :  { %4466 = vmatpush3.bf16.msra.mxu0 %v5147_v27  ;;  %3967 = vmatprep.mubr.msk.f32.mxu0 %vm4791_vm0, %v4792_v6 }
0x2706   :  { %4467 = vmatprep.subr.bf16.mxu0 %v4790_v3 }
0x2709   :  { %4469 = vmatpush3.bf16.msra.mxu0 %v5153_v29 }
0x270a   :  { %4470 = vmatprep.subr.bf16.mxu0 %v4790_v3 }
0x27d7   :  { %v1942_v8 = vpop.f32.mrb[16].mxu0 }
0x27d8   :  { %v1943_v38 = vadd.f32 %v5130_v5, %v1942_v8  ;;  %v3958_v39 = vpop.f32.mrb[17].mxu0  ;;  %v2455_v8 = vld [vmem:[%s5751_s6 + $0x10] sm:$0xff] }
0x27da   :  { %4733 = vtanh.f32 %v1943_v38  ;;  %v1946_v23 = vsub.f32 0.0, %v1943_v38  ;;  %v2456_v38 = vld [vmem:[%s5751_s6 + $0x18] sm:$0xff] }
0x27db   :  { %v5502_v39 = vpack.c.bf16 %v2456_v38, %v2455_v8  ;;  %v2658_v8 = vld [vmem:[%s5755_s10 + $0x58] sm:$0xff] }
0x27dc   :  { %v1947_v42 = vmul.f32 1.442695, %v1946_v23  ;;  %v2458_v23 = vld [vmem:[%s5751_s6 + $0x28] sm:$0xff] }
0x27de   :  { %4735 = vpow2.f32 %v1947_v42 }
0x27e4   :  { %v4734_v40 = vpop.eup %4733 }
0x27e5   :  { %1955 = vrot.lane.b32.xlu1 %v4734_v40, %s4793_s21  ;;  %v2457_v40 = vld [vmem:[%s5751_s6 + $0x20] sm:$0xff] }
0x27e6   :  { %v5514_v42 = vpack.c.bf16 %v2458_v23, %v2457_v40  ;;  %v2659_v40 = vld [vmem:[%s5755_s10 + $0x60] sm:$0xff]  ;;  %v2660_v23 = vld [vmem:[%s5755_s10 + $0x68] sm:$0xff] }
0x27e8   :  { %v4736_v44 = vpop.eup %4735 }
0x27e9   :  { %v1949_v45 = vadd.f32 1.0, %v4736_v44  ;;  %v2459_v44 = vld [vmem:[%s5751_s6 + $0x30] sm:$0xff] }
0x27eb   :  { %4737 = vrcp.f32 %v1949_v45  ;;  %v2460_v45 = vld [vmem:[%s5751_s6 + $0x38] sm:$0xff] }
0x27f5   :  { %v4738_v47 = vpop.eup %4737 }
0x27f6   :  { %v1953_v51 = vmul.f32 %v4738_v47, %v5342_v19 }
0x2857   :  { %v1956_v48 = vpop.permute.xlu1 %1955 }
0x2858   :  { %v1958_v50 = vmul.f32 %v4738_v47, %v1956_v48 }
0x285a   :  { %1960 = vrot.lane.b32.xlu0 %v1958_v50, %s4794_s5  ;;  %v3275_v50 = vld [vmem:[%s5747_s2 + $0x20] sm:$0xff] }
0x28cc   :  { %v1961_v16 = vpop.permute.xlu0 %1960 }
0x28cd   :  { %v5400_v53 = vadd.f32 %v1961_v16, %v1953_v51 }
0x28cf   :  { %4739 = vtanh.f32 %v5400_v53 }
0x28d9   :  { %v4740_v56 = vpop.eup %4739 }
0x28da   :  { %1966 = vrot.lane.b32.xlu1 %v4740_v56, %s4793_s21 }
0x294c   :  { %v1967_v57 = vpop.permute.xlu1 %1966 }
0x294d   :  { %v1969_v60 = vmul.f32 %v4738_v47, %v1967_v57  ;;  %v5523_v47 = vpack.c.bf16 %v2460_v45, %v2459_v44  ;;  %v5641_v44 = vpack.c.bf16 %v2660_v23, %v2659_v40  ;;  %v2661_v45 = vld [vmem:[%s5755_s10 + $0x70] sm:$0xff] }
0x294f   :  { %1975 = vrot.lane.b32.xlu0 %v1969_v60, %s4794_s5 }
0x29c1   :  { %v1976_v4 = vpop.permute.xlu0 %1975 }
0x29c2   :  { %3968 = vmatmul.mubr.msk.f32.vlgmr.msra.gmra.mrb[18].mxu0 %vm46_vm1, %v1976_v4 }
0x29c3   :  { %4472 = vmatpush3.bf16.msra.mxu0 %v5181_v41  ;;  %4002 = vmatprep.mubr.msk.f32.mxu0 %vm4791_vm0, %v4792_v6 }
0x29c4   :  { %4473 = vmatprep.subr.bf16.mxu0 %v4790_v3 }
0x29c7   :  { %4475 = vmatpush3.bf16.msra.mxu0 %v5187_v43 }
0x29c8   :  { %4476 = vmatprep.subr.bf16.mxu0 %v4790_v3 }
0x29cb   :  { %4478 = vmatpush3.bf16.msra.mxu0 %v5198_v46 }
0x29cc   :  { %4479 = vmatprep.subr.bf16.mxu0 %v4790_v3 }
0x29cf   :  { %4481 = vmatpush3.bf16.msra.mxu0 %v5208_v49 }
0x29d0   :  { %4482 = vmatprep.subr.bf16.mxu0 %v4790_v3 }
0x29d3   :  { %4484 = vmatpush3.bf16.msra.mxu0 %v5218_v52 }
0x29d4   :  { %4485 = vmatprep.subr.bf16.mxu0 %v4790_v3 }
0x29d7   :  { %4487 = vmatpush3.bf16.msra.mxu0 %v5228_v54 }
0x29d8   :  { %4488 = vmatprep.subr.bf16.mxu0 %v4790_v3 }
0x29db   :  { %4490 = vmatpush3.bf16.msra.mxu0 %v5238_v59 }
0x29dc   :  { %4491 = vmatprep.subr.bf16.mxu0 %v4790_v3 }
0x29df   :  { %4493 = vmatpush3.bf16.msra.mxu0 %v5248_v62 }
0x29e0   :  { %4536 = vmatprep.subr.bf16.mxu0 %v4790_v3 }
0x2a95   :  { %v2045_v63 = vpop.f32.mrb[18].mxu0 }
0x2a96   :  { %v2046_v0 = vadd.f32 %v5166_v34, %v2045_v63  ;;  %v3969_v11 = vpop.f32.mrb[19].mxu0 }
0x2a98   :  { %2049 = vst [vmem:[%s5756_s11 + $0x18] sm:$0xff] %v2046_v0  ;;  %2050 = vmax.xlane.f32.xlu1 %v2046_v0 }
0x2b25   :  { %v2051_v2 = vpop.xlane.xlu1 %2050 }
0x2b26   :  { %vm2052_vm13 = vcmp.ge.f32.partialorder %v2046_v0, %v2051_v2 }
0x2b27   :  { %v2053_v14 = vsel %vm2052_vm13, %v5253_v1, 128.0 }
0x2b28   :  { %2054 = vmin.xlane.f32.xlu0 %v2053_v14 }
0x2b3e   :  { %2154 = vrot.lane.b32.xlu0 %v1969_v60, %s4793_s21 }
0x2bb5   :  { %v2055_v9 = vpop.xlane.xlu0 %2054 }
0x2bb6   :  { %vm2056_vm14 = vcmp.eq.f32.partialorder %v5253_v1, %v2055_v9 }
0x2bb7   :  { %4003 = vmatmul.mubr.msk.f32.vlgmr.msra.gmra.mrb[20].mxu0 %vm2056_vm14, %v4795_v7 }
0x2bb8   :  { %4086 = vmatprep.mubr.msk.f32.mxu0 %vm4791_vm0, %v4792_v6 }
0x2bb9   :  { %v2155_v18 = vpop.permute.xlu0 %2154 }
0x2c8a   :  { %v2141_v13 = vpop.f32.mrb[20].mxu0 }
0x2c8b   :  { %v2152_v15 = vsel %vm2151_vm15, %v3269_v12, %v2141_v13  ;;  %v4004_v17 = vpop.f32.mrb[21].mxu0 }
0x2c8c   :  { %2153 = vst.msk [vmem:[#allocation2] sm:$0xff] %vm46_vm1, %v2152_v15 }
0x2c8d   :  { %2157 = vst.msk [vmem:[#allocation2] sm:$0xff] %vm48_vm2, %v2155_v18  ;;  %v2558_v18 = vld [vmem:[%s5753_s8] sm:$0xff] }
0x2c94   :  { %v2158_v19 = vld [vmem:[#allocation2] sm:$0xff] }
0x2c95   :  { %4022 = vmatmul.mubr.msk.f32.vlgmr.msra.gmra.mrb[18].mxu1 %vm65_vm3, %v2158_v19  ;;  %v2559_v19 = vld [vmem:[%s5753_s8 + $0x8] sm:$0xff] }
0x2c96   :  { %4508 = vmatpush3.bf16.msra.mxu1 %v5147_v27  ;;  %4032 = vmatprep.mubr.msk.f32.mxu1 %vm4791_vm0, %v4792_v6 }
0x2c97   :  { %4509 = vmatprep.subr.bf16.mxu1 %v4790_v3 }
0x2c9a   :  { %4511 = vmatpush3.bf16.msra.mxu1 %v5153_v29 }
0x2c9b   :  { %4512 = vmatprep.subr.bf16.mxu1 %v4790_v3 }
0x2d68   :  { %v2236_v20 = vpop.f32.mrb[18].mxu1 }
0x2d69   :  { %v2237_v21 = vadd.f32 %v5130_v5, %v2236_v20  ;;  %v4023_v22 = vpop.f32.mrb[19].mxu1  ;;  %v2560_v20 = vld [vmem:[%s5753_s8 + $0x10] sm:$0xff] }
0x2d6a   :  { %v2561_v22 = vld [vmem:[%s5753_s8 + $0x18] sm:$0xff] }
0x2d6b   :  { %4741 = vtanh.f32 %v2237_v21  ;;  %v2240_v25 = vsub.f32 0.0, %v2237_v21  ;;  %v5556_v21 = vpack.c.bf16 %v2559_v19, %v2558_v18 }
0x2d6d   :  { %v2241_v26 = vmul.f32 1.442695, %v2240_v25 }
0x2d6f   :  { %4743 = vpow2.f32 %v2241_v26 }
0x2d75   :  { %v4742_v24 = vpop.eup %4741 }
0x2d76   :  { %2249 = vrot.lane.b32.xlu1 %v4742_v24, %s4793_s21  ;;  %v5562_v24 = vpack.c.bf16 %v2561_v22, %v2560_v20 }
0x2d79   :  { %v4744_v27 = vpop.eup %4743 }
0x2d7a   :  { %v2243_v28 = vadd.f32 1.0, %v4744_v27 }
0x2d7c   :  { %4745 = vrcp.f32 %v2243_v28 }
0x2d86   :  { %v4746_v30 = vpop.eup %4745 }
0x2d87   :  { %v2247_v29 = vmul.f32 %v4746_v30, %v5400_v53 }
0x2de8   :  { %v2250_v31 = vpop.permute.xlu1 %2249 }
0x2de9   :  { %v2252_v32 = vmul.f32 %v4746_v30, %v2250_v31 }
0x2deb   :  { %2254 = vrot.lane.b32.xlu1 %v2252_v32, %s4794_s5 }
0x2e5d   :  { %v2255_v55 = vpop.permute.xlu1 %2254 }
0x2e5e   :  { %v5450_v33 = vadd.f32 %v2255_v55, %v2247_v29  ;;  %v2647_v29 = vld [vmem:[%s5755_s10] sm:$0xff]  ;;  %v2648_v55 = vld [vmem:[%s5755_s10 + $0x8] sm:$0xff] }
0x2e60   :  { %4747 = vtanh.f32 %v5450_v33 }
0x2e6a   :  { %v4748_v58 = vpop.eup %4747 }
0x2e6b   :  { %2260 = vrot.lane.b32.xlu0 %v4748_v58, %s4793_s21  ;;  %v5585_v58 = vpack.c.bf16 %v2648_v55, %v2647_v29 }
0x2edd   :  { %v2261_v35 = vpop.permute.xlu0 %2260 }
0x2ede   :  { %v2263_v36 = vmul.f32 %v4746_v30, %v2261_v35 }
0x2ee0   :  { %2269 = vrot.lane.b32.xlu1 %v2263_v36, %s4794_s5 }
0x2f52   :  { %v2270_v37 = vpop.permute.xlu1 %2269 }
0x2f53   :  { %4033 = vmatmul.mubr.msk.f32.vlgmr.msra.gmra.mrb[20].mxu1 %vm46_vm1, %v2270_v37  ;;  %v2652_v37 = vld [vmem:[%s5755_s10 + $0x28] sm:$0xff] }
0x2f54   :  { %4514 = vmatpush3.bf16.msra.mxu1 %v5181_v41  ;;  %4067 = vmatprep.mubr.msk.f32.mxu1 %vm4791_vm0, %v4792_v6 }
0x2f55   :  { %4515 = vmatprep.subr.bf16.mxu1 %v4790_v3 }
0x2f58   :  { %4517 = vmatpush3.bf16.msra.mxu1 %v5187_v43 }
0x2f59   :  { %4518 = vmatprep.subr.bf16.mxu1 %v4790_v3 }
0x2f5c   :  { %4520 = vmatpush3.bf16.msra.mxu1 %v5198_v46 }
0x2f5d   :  { %4521 = vmatprep.subr.bf16.mxu1 %v4790_v3 }
0x2f60   :  { %4523 = vmatpush3.bf16.msra.mxu1 %v5208_v49 }
0x2f61   :  { %4524 = vmatprep.subr.bf16.mxu1 %v4790_v3 }
0x2f64   :  { %4526 = vmatpush3.bf16.msra.mxu1 %v5218_v52 }
0x2f65   :  { %4527 = vmatprep.subr.bf16.mxu1 %v4790_v3 }
0x2f68   :  { %4529 = vmatpush3.bf16.msra.mxu1 %v5228_v54  ;;  %v2453_v54 = vld [vmem:[%s5751_s6] sm:$0xff] }
0x2f69   :  { %4530 = vmatprep.subr.bf16.mxu1 %v4790_v3 }
0x2f6c   :  { %4532 = vmatpush3.bf16.msra.mxu1 %v5238_v59  ;;  %v2454_v59 = vld [vmem:[%s5751_s6 + $0x8] sm:$0xff]  ;;  %s2443_s6 = scalar_select %p2440_p9, 1, 0 }
0x2f6d   :  { %4533 = vmatprep.subr.bf16.mxu1 %v4790_v3 }
0x2f6e   :  { %v2444_v48 = vstv %s2443_s6 }
0x2f6f   :  { %vm2445_vm6 = vcmp.eq.s32.totalorder %v2444_v48, 1  ;;  %v2662_v48 = vld [vmem:[%s5755_s10 + $0x78] sm:$0xff] }
0x2f70   :  { %4535 = vmatpush3.bf16.msra.mxu1 %v5248_v62  ;;  %v5486_v62 = vpack.c.bf16 %v2454_v59, %v2453_v54  ;;  %v2656_v54 = vld [vmem:[%s5755_s10 + $0x48] sm:$0xff] }
0x2f71   :  { %4578 = vmatprep.subr.bf16.mxu1 %v4790_v3 }
0x2f72   :  { %4538 = vmatpush3.bf16.msra.mxu0 %v5486_v62 }
0x2f73   :  { %4539 = vmatprep.subr.bf16.mxu0 %v4790_v3 }
0x2f76   :  { %4541 = vmatpush3.bf16.msra.mxu0 %v5502_v39 }
0x2f77   :  { %4542 = vmatprep.subr.bf16.mxu0 %v4790_v3 }
0x2f7a   :  { %4544 = vmatpush3.bf16.msra.mxu0 %v5514_v42 }
0x2f7b   :  { %4545 = vmatprep.subr.bf16.mxu0 %v4790_v3 }
0x2f7e   :  { %4547 = vmatpush3.bf16.msra.mxu0 %v5523_v47 }
0x2f7f   :  { %4548 = vmatprep.subr.bf16.mxu0 %v4790_v3 }
0x3026   :  { %v2339_v41 = vpop.f32.mrb[20].mxu1 }
0x3027   :  { %v2340_v43 = vadd.f32 %v5166_v34, %v2339_v41  ;;  %v4034_v46 = vpop.f32.mrb[21].mxu1 }
0x3028   :  { %v2654_v46 = vld [vmem:[%s5755_s10 + $0x38] sm:$0xff] }
0x3029   :  { %2343 = vst [vmem:[%s5756_s11 + $0x20] sm:$0xff] %v2340_v43  ;;  %2344 = vmax.xlane.f32.xlu0 %v2340_v43 }
0x303f   :  { %2448 = vrot.lane.b32.xlu0 %v2263_v36, %s4793_s21  ;;  %v2651_v36 = vld [vmem:[%s5755_s10 + $0x20] sm:$0xff] }
0x3040   :  { %v5601_v41 = vpack.c.bf16 %v2652_v37, %v2651_v36 }
0x30b6   :  { %v2345_v49 = vpop.xlane.xlu0 %2344 }
0x30b7   :  { %vm2346_vm4 = vcmp.ge.f32.partialorder %v2340_v43, %v2345_v49  ;;  %v2653_v43 = vld [vmem:[%s5755_s10 + $0x30] sm:$0xff] }
0x30b8   :  { %v2347_v52 = vsel %vm2346_vm4, %v5253_v1, 128.0  ;;  %v5611_v49 = vpack.c.bf16 %v2654_v46, %v2653_v43 }
0x30b9   :  { %2348 = vmin.xlane.f32.xlu1 %v2347_v52  ;;  %v2655_v52 = vld [vmem:[%s5755_s10 + $0x40] sm:$0xff] }
0x30ba   :  { %v2449_v56 = vpop.permute.xlu0 %2448  ;;  %v5621_v59 = vpack.c.bf16 %v2656_v54, %v2655_v52 }
0x3146   :  { %v2349_v61 = vpop.xlane.xlu1 %2348 }
0x3147   :  { %vm2350_vm5 = vcmp.eq.f32.partialorder %v5253_v1, %v2349_v61  ;;  %v2657_v61 = vld [vmem:[%s5755_s10 + $0x50] sm:$0xff] }
0x3148   :  { %4068 = vmatmul.mubr.msk.f32.vlgmr.msra.gmra.mrb[22].mxu1 %vm2350_vm5, %v4795_v7  ;;  %v5631_v38 = vpack.c.bf16 %v2658_v8, %v2657_v61 }
0x3149   :  { %4580 = vmatpush3.bf16.msra.mxu1 %v5486_v62  ;;  %4151 = vmatprep.mubr.msk.f32.mxu1 %vm4791_vm0, %v4792_v6 }
0x314a   :  { %4581 = vmatprep.subr.bf16.mxu1 %v4790_v3 }
0x314d   :  { %4583 = vmatpush3.bf16.msra.mxu1 %v5502_v39 }
0x314e   :  { %4584 = vmatprep.subr.bf16.mxu1 %v4790_v3 }
0x3151   :  { %4586 = vmatpush3.bf16.msra.mxu1 %v5514_v42 }
0x3152   :  { %4587 = vmatprep.subr.bf16.mxu1 %v4790_v3 }
0x3155   :  { %4589 = vmatpush3.bf16.msra.mxu1 %v5523_v47 }
0x3156   :  { %4590 = vmatprep.subr.bf16.mxu1 %v4790_v3 }
0x321b   :  { %v2435_v51 = vpop.f32.mrb[22].mxu1 }
0x321c   :  { %v2446_v16 = vsel %vm2445_vm6, %v3275_v50, %v2435_v51  ;;  %v4069_v53 = vpop.f32.mrb[23].mxu1  ;;  %v5651_v50 = vpack.c.bf16 %v2662_v48, %v2661_v45 }
0x321d   :  { %2447 = vst.msk [vmem:[#allocation2] sm:$0xff] %vm46_vm1, %v2446_v16 }
0x321e   :  { %2451 = vst.msk [vmem:[#allocation2] sm:$0xff] %vm48_vm2, %v2449_v56  ;;  %v3281_v56 = vld [vmem:[%s5747_s2 + $0x28] sm:$0xff] }
0x3225   :  { %v2452_v57 = vld [vmem:[#allocation2] sm:$0xff] }
0x3226   :  { %4087 = vmatmul.mubr.msk.f32.vlgmr.msra.gmra.mrb[22].mxu0 %vm65_vm3, %v2452_v57 }
0x3227   :  { %4097 = vmatprep.mubr.msk.f32.mxu0 %vm4791_vm0, %v4792_v6  ;;  %4550 = vmatpush3.bf16.msra.mxu0 %v5556_v21 }
0x3228   :  { %4551 = vmatprep.subr.bf16.mxu0 %v4790_v3 }
0x322b   :  { %4553 = vmatpush3.bf16.msra.mxu0 %v5562_v24 }
0x322c   :  { %4554 = vmatprep.subr.bf16.mxu0 %v4790_v3 }
0x32f9   :  { %v2530_v60 = vpop.f32.mrb[22].mxu0 }
0x32fa   :  { %v2531_v4 = vadd.f32 %v5130_v5, %v2530_v60  ;;  %v4088_v63 = vpop.f32.mrb[23].mxu0 }
0x32fb   :  { %v5685_v63 = vld [vmem:[%s5752_s7] ss:$0 sm:$0xff] }
0x32fc   :  { %4749 = vtanh.f32 %v2531_v4  ;;  %v2534_v11 = vsub.f32 0.0, %v2531_v4 }
0x32fe   :  { %v2535_v2 = vmul.f32 1.442695, %v2534_v11 }
0x3300   :  { %4751 = vpow2.f32 %v2535_v2 }
0x3306   :  { %v4750_v0 = vpop.eup %4749 }
0x3307   :  { %2543 = vrot.lane.b32.xlu1 %v4750_v0, %s4793_s21 }
0x330a   :  { %v4752_v14 = vpop.eup %4751 }
0x330b   :  { %v2537_v9 = vadd.f32 1.0, %v4752_v14 }
0x330d   :  { %4753 = vrcp.f32 %v2537_v9 }
0x3317   :  { %v4754_v10 = vpop.eup %4753 }
0x3318   :  { %v2541_v15 = vmul.f32 %v4754_v10, %v5450_v33  ;;  %v2649_v33 = vld [vmem:[%s5755_s10 + $0x10] sm:$0xff] }
0x3379   :  { %v2544_v12 = vpop.permute.xlu1 %2543 }
0x337a   :  { %v2546_v13 = vmul.f32 %v4754_v10, %v2544_v12 }
0x337c   :  { %2548 = vrot.lane.b32.xlu0 %v2546_v13, %s4794_s5 }
0x33ee   :  { %v2549_v17 = vpop.permute.xlu0 %2548 }
0x33ef   :  { %v5544_v5 = vadd.f32 %v2549_v17, %v2541_v15 }
0x33f1   :  { %4755 = vtanh.f32 %v5544_v5 }
0x33fb   :  { %v4756_v25 = vpop.eup %4755 }
0x33fc   :  { %2554 = vrot.lane.b32.xlu1 %v4756_v25, %s4793_s21 }
0x346e   :  { %v2555_v26 = vpop.permute.xlu1 %2554 }
0x346f   :  { %v2557_v27 = vmul.f32 %v4754_v10, %v2555_v26 }
0x3471   :  { %2563 = vrot.lane.b32.xlu0 %v2557_v27, %s4794_s5 }
0x34e3   :  { %v2564_v28 = vpop.permute.xlu0 %2563 }
0x34e4   :  { %4098 = vmatmul.mubr.msk.f32.vlgmr.msra.gmra.mrb[24].mxu0 %vm46_vm1, %v2564_v28  ;;  %v4774_v28 = vld [vmem:[%s5754_s9] ss:$0 sm:$0xff]  ;;  %s3286_s9 = sld [smem:[#allocation4 + $0x6]] }
0x34e5   :  { %4132 = vmatprep.mubr.msk.f32.mxu0 %vm4791_vm0, %v4792_v6  ;;  %4556 = vmatpush3.bf16.msra.mxu0 %v5585_v58 }
0x34e6   :  { %4557 = vmatprep.subr.bf16.mxu0 %v4790_v3 }
0x34ea   :  { %p3028_p11 = scmp.gt.s32.totalorder %s3286_s9, 0 }
0x34ec   :  { %s3031_s15 = scalar_select %p3028_p11, 1, 0 }
0x35b7   :  { %v2633_v30 = vpop.f32.mrb[24].mxu0 }
0x35b8   :  { %v2634_v31 = vadd.f32 %v5166_v34, %v2633_v30  ;;  %v4099_v32 = vpop.f32.mrb[25].mxu0  ;;  %v2650_v34 = vld [vmem:[%s5755_s10 + $0x18] sm:$0xff]  ;;  %s3280_s10 = sld [smem:[#allocation4 + $0x5]] }
0x35b9   :  { %v5591_v35 = vpack.c.bf16 %v2650_v34, %v2649_v33  ;;  %v3032_v33 = vstv %s3031_s15 }
0x35ba   :  { %2637 = vst [vmem:[%s5756_s11 + $0x28] sm:$0xff] %v2634_v31  ;;  %2638 = vmax.xlane.f32.xlu1 %v2634_v31  ;;  %vm3033_vm12 = vcmp.eq.s32.totalorder %v3032_v33, 1 }
0x35bb   :  { %4559 = vmatpush3.bf16.msra.mxu0 %v5591_v35 }
0x35bc   :  { %4560 = vmatprep.subr.bf16.mxu0 %v4790_v3 }
0x35be   :  { %p2734_p10 = scmp.gt.s32.totalorder %s3280_s10, 0 }
0x35bf   :  { %4562 = vmatpush3.bf16.msra.mxu0 %v5601_v41 }
0x35c0   :  { %4563 = vmatprep.subr.bf16.mxu0 %v4790_v3  ;;  %s2737_s27 = scalar_select %p2734_p10, 1, 0 }
0x35c3   :  { %4565 = vmatpush3.bf16.msra.mxu0 %v5611_v49 }
0x35c4   :  { %4566 = vmatprep.subr.bf16.mxu0 %v4790_v3 }
0x35c7   :  { %4568 = vmatpush3.bf16.msra.mxu0 %v5621_v59 }
0x35c8   :  { %4569 = vmatprep.subr.bf16.mxu0 %v4790_v3 }
0x35cb   :  { %4571 = vmatpush3.bf16.msra.mxu0 %v5631_v38 }
0x35cc   :  { %4572 = vmatprep.subr.bf16.mxu0 %v4790_v3 }
0x35cf   :  { %4574 = vmatpush3.bf16.msra.mxu0 %v5641_v44 }
0x35d0   :  { %4575 = vmatprep.subr.bf16.mxu0 %v4790_v3 }
0x35d3   :  { %4577 = vmatpush3.bf16.msra.mxu0 %v5651_v50 }
0x35d4   :  { %4620 = vmatprep.subr.bf16.mxu0 %v4790_v3 }
0x3647   :  { %v2639_v51 = vpop.xlane.xlu1 %2638 }
0x3648   :  { %vm2640_vm7 = vcmp.ge.f32.partialorder %v2634_v31, %v2639_v51 }
0x3649   :  { %v2641_v16 = vsel %vm2640_vm7, %v5253_v1, 128.0 }
0x364a   :  { %2642 = vmin.xlane.f32.xlu0 %v2641_v16 }
0x3660   :  { %2742 = vrot.lane.b32.xlu0 %v2557_v27, %s4793_s21 }
0x36d7   :  { %v2643_v53 = vpop.xlane.xlu0 %2642 }
0x36d8   :  { %vm2644_vm8 = vcmp.eq.f32.partialorder %v5253_v1, %v2643_v53 }
0x36d9   :  { %4133 = vmatmul.mubr.msk.f32.vlgmr.msra.gmra.mrb[26].mxu0 %vm2644_vm8, %v4795_v7 }
0x36da   :  { %4622 = vmatpush3.bf16.msra.mxu0 %v5486_v62  ;;  %4216 = vmatprep.mubr.msk.f32.mxu0 %vm4791_vm0, %v4792_v6  ;;  %v2738_v62 = vstv %s2737_s27 }
0x36db   :  { %4623 = vmatprep.subr.bf16.mxu0 %v4790_v3  ;;  %vm2739_vm9 = vcmp.eq.s32.totalorder %v2738_v62, 1  ;;  %v2743_v4 = vpop.permute.xlu0 %2742 }
0x36de   :  { %4625 = vmatpush3.bf16.msra.mxu0 %v5502_v39 }
0x36df   :  { %4626 = vmatprep.subr.bf16.mxu0 %v4790_v3 }
0x36e2   :  { %4628 = vmatpush3.bf16.msra.mxu0 %v5514_v42 }
0x36e3   :  { %4629 = vmatprep.subr.bf16.mxu0 %v4790_v3 }
0x36e6   :  { %4631 = vmatpush3.bf16.msra.mxu0 %v5523_v47 }
0x36e7   :  { %4632 = vmatprep.subr.bf16.mxu0 %v4790_v3 }
0x37ac   :  { %v2729_v39 = vpop.f32.mrb[26].mxu0 }
0x37ad   :  { %v2740_v57 = vsel %vm2739_vm9, %v3281_v56, %v2729_v39  ;;  %v4134_v60 = vpop.f32.mrb[27].mxu0 }
0x37ae   :  { %2741 = vst.msk [vmem:[#allocation2] sm:$0xff] %vm46_vm1, %v2740_v57 }
0x37af   :  { %2745 = vst.msk [vmem:[#allocation2] sm:$0xff] %vm48_vm2, %v2743_v4 }
0x37b6   :  { %v2746_v42 = vld [vmem:[#allocation2] sm:$0xff] }
0x37b7   :  { %4152 = vmatmul.mubr.msk.f32.vlgmr.msra.gmra.mrb[24].mxu1 %vm65_vm3, %v2746_v42 }
0x37b8   :  { %4592 = vmatpush3.bf16.msra.mxu1 %v5556_v21  ;;  %4162 = vmatprep.mubr.msk.f32.mxu1 %vm4791_vm0, %v4792_v6 }
0x37b9   :  { %4593 = vmatprep.subr.bf16.mxu1 %v4790_v3 }
0x37bc   :  { %4595 = vmatpush3.bf16.msra.mxu1 %v5562_v24 }
0x37bd   :  { %4596 = vmatprep.subr.bf16.mxu1 %v4790_v3 }
0x388a   :  { %v2824_v47 = vpop.f32.mrb[24].mxu1 }
0x388b   :  { %v2825_v0 = vadd.f32 %v5685_v63, %v2824_v47  ;;  %v4153_v11 = vpop.f32.mrb[25].mxu1 }
0x388d   :  { %4757 = vtanh.f32 %v2825_v0  ;;  %v2828_v14 = vsub.f32 0.0, %v2825_v0 }
0x388f   :  { %v2829_v9 = vmul.f32 1.442695, %v2828_v14 }
0x3891   :  { %4759 = vpow2.f32 %v2829_v9 }
0x3897   :  { %v4758_v2 = vpop.eup %4757 }
0x3898   :  { %2837 = vrot.lane.b32.xlu1 %v4758_v2, %s4793_s21 }
0x389b   :  { %v4760_v10 = vpop.eup %4759 }
0x389c   :  { %v2831_v12 = vadd.f32 1.0, %v4760_v10 }
0x389e   :  { %4761 = vrcp.f32 %v2831_v12 }
0x38a8   :  { %v4762_v13 = vpop.eup %4761 }
0x38a9   :  { %v2835_v18 = vmul.f32 %v4762_v13, %v5544_v5 }
0x390a   :  { %v2838_v15 = vpop.permute.xlu1 %2837 }
0x390b   :  { %v2840_v17 = vmul.f32 %v4762_v13, %v2838_v15 }
0x390d   :  { %2842 = vrot.lane.b32.xlu1 %v2840_v17, %s4794_s5 }
0x397f   :  { %v2843_v19 = vpop.permute.xlu1 %2842 }
0x3980   :  { %v5691_v20 = vadd.f32 %v2843_v19, %v2835_v18 }
0x3982   :  { %4763 = vtanh.f32 %v5691_v20 }
0x398c   :  { %v4764_v22 = vpop.eup %4763 }
0x398d   :  { %2848 = vrot.lane.b32.xlu0 %v4764_v22, %s4793_s21 }
0x39ff   :  { %v2849_v25 = vpop.permute.xlu0 %2848 }
0x3a00   :  { %v2851_v26 = vmul.f32 %v4762_v13, %v2849_v25 }
0x3a02   :  { %2857 = vrot.lane.b32.xlu1 %v2851_v26, %s4794_s5 }
0x3a74   :  { %v2858_v27 = vpop.permute.xlu1 %2857 }
0x3a75   :  { %4163 = vmatmul.mubr.msk.f32.vlgmr.msra.gmra.mrb[26].mxu1 %vm46_vm1, %v2858_v27 }
0x3a76   :  { %4598 = vmatpush3.bf16.msra.mxu1 %v5585_v58  ;;  %4197 = vmatprep.mubr.msk.f32.mxu1 %vm4791_vm0, %v4792_v6  ;;  %v3287_v58 = vld [vmem:[%s5747_s2 + $0x30] sm:$0xff] }
0x3a77   :  { %4599 = vmatprep.subr.bf16.mxu1 %v4790_v3 }
0x3a7a   :  { %4601 = vmatpush3.bf16.msra.mxu1 %v5591_v35 }
0x3a7b   :  { %4602 = vmatprep.subr.bf16.mxu1 %v4790_v3 }
0x3a7e   :  { %4604 = vmatpush3.bf16.msra.mxu1 %v5601_v41 }
0x3a7f   :  { %4605 = vmatprep.subr.bf16.mxu1 %v4790_v3 }
0x3a82   :  { %4607 = vmatpush3.bf16.msra.mxu1 %v5611_v49 }
0x3a83   :  { %4608 = vmatprep.subr.bf16.mxu1 %v4790_v3 }
0x3a86   :  { %4610 = vmatpush3.bf16.msra.mxu1 %v5621_v59 }
0x3a87   :  { %4611 = vmatprep.subr.bf16.mxu1 %v4790_v3 }
0x3a8a   :  { %4613 = vmatpush3.bf16.msra.mxu1 %v5631_v38 }
0x3a8b   :  { %4614 = vmatprep.subr.bf16.mxu1 %v4790_v3 }
0x3a8e   :  { %4616 = vmatpush3.bf16.msra.mxu1 %v5641_v44 }
0x3a8f   :  { %4617 = vmatprep.subr.bf16.mxu1 %v4790_v3 }
0x3a92   :  { %4619 = vmatpush3.bf16.msra.mxu1 %v5651_v50 }
0x3b48   :  { %v2927_v5 = vpop.f32.mrb[26].mxu1 }
0x3b49   :  { %v2928_v30 = vadd.f32 %v4774_v28, %v2927_v5  ;;  %v4164_v31 = vpop.f32.mrb[27].mxu1 }
0x3b4b   :  { %2931 = vst [vmem:[%s5756_s11 + $0x30] sm:$0xff] %v2928_v30  ;;  %2932 = vmax.xlane.f32.xlu0 %v2928_v30 }
0x3b61   :  { %3036 = vrot.lane.b32.xlu0 %v2851_v26, %s4793_s21 }
0x3bd8   :  { %v2933_v32 = vpop.xlane.xlu0 %2932 }
0x3bd9   :  { %vm2934_vm10 = vcmp.ge.f32.partialorder %v2928_v30, %v2933_v32 }
0x3bda   :  { %v2935_v29 = vsel %vm2934_vm10, %v5253_v1, 128.0 }
0x3bdb   :  { %2936 = vmin.xlane.f32.xlu1 %v2935_v29 }
0x3bdc   :  { %v3037_v37 = vpop.permute.xlu0 %3036 }
0x3c68   :  { %v2937_v55 = vpop.xlane.xlu1 %2936 }
0x3c69   :  { %vm2938_vm11 = vcmp.eq.f32.partialorder %v5253_v1, %v2937_v55 }
0x3c6a   :  { %4198 = vmatmul.mubr.msk.f32.vlgmr.msra.gmra.mrb[28].mxu1 %vm2938_vm11, %v4795_v7 }
0x3d3d   :  { %v3023_v34 = vpop.f32.mrb[28].mxu1 }
0x3d3e   :  { %v3034_v35 = vsel %vm3033_vm12, %v3287_v58, %v3023_v34  ;;  %v4199_v36 = vpop.f32.mrb[29].mxu1 }
0x3d3f   :  { %3035 = vst.msk [vmem:[#allocation2] sm:$0xff] %vm46_vm1, %v3034_v35 }
0x3d40   :  { %3039 = vst.msk [vmem:[#allocation2] sm:$0xff] %vm48_vm2, %v3037_v37 }
0x3d47   :  { %v3040_v1 = vld [vmem:[#allocation2] sm:$0xff] }
0x3d48   :  { %4217 = vmatmul.mubr.msk.f32.vlgmr.msra.gmra.mrb[28].mxu0 %vm65_vm3, %v3040_v1 }
0x3d49   :  { %4634 = vmatpush3.bf16.msra.mxu0 %v5556_v21  ;;  %4227 = vmatprep.mubr.msk.f32.mxu0 %vm4791_vm0, %v4792_v6 }
0x3d4a   :  { %4635 = vmatprep.subr.bf16.mxu0 %v4790_v3 }
0x3d4d   :  { %4637 = vmatpush3.bf16.msra.mxu0 %v5562_v24 }
0x3e1b   :  { %v3118_v7 = vpop.f32.mrb[28].mxu0 }
0x3e1c   :  { %v3119_v41 = vadd.f32 %v5685_v63, %v3118_v7  ;;  %v4218_v43 = vpop.f32.mrb[29].mxu0 }
0x3e1e   :  { %4765 = vtanh.f32 %v3119_v41  ;;  %v3122_v49 = vsub.f32 0.0, %v3119_v41 }
0x3e20   :  { %v3123_v52 = vmul.f32 1.442695, %v3122_v49 }
0x3e22   :  { %4767 = vpow2.f32 %v3123_v52 }
0x3e28   :  { %v4766_v46 = vpop.eup %4765 }
0x3e29   :  { %3131 = vrot.lane.b32.xlu1 %v4766_v46, %s4793_s21 }
0x3e2c   :  { %v4768_v54 = vpop.eup %4767 }
0x3e2d   :  { %v3125_v21 = vadd.f32 1.0, %v4768_v54 }
0x3e2f   :  { %4769 = vrcp.f32 %v3125_v21 }
0x3e39   :  { %v4770_v59 = vpop.eup %4769 }
0x3e3a   :  { %v3129_v3 = vmul.f32 %v4770_v59, %v5691_v20 }
0x3e9b   :  { %v3132_v6 = vpop.permute.xlu1 %3131 }
0x3e9c   :  { %v3134_v61 = vmul.f32 %v4770_v59, %v3132_v6 }
0x3e9e   :  { %3136 = vrot.lane.b32.xlu0 %v3134_v61, %s4794_s5 }
0x3f10   :  { %v3137_v24 = vpop.permute.xlu0 %3136 }
0x3f11   :  { %v3139_v8 = vadd.f32 %v3137_v24, %v3129_v3 }
0x3f13   :  { %4771 = vtanh.f32 %v3139_v8 }
0x3f1d   :  { %v4772_v38 = vpop.eup %4771 }
0x3f1e   :  { %3142 = vrot.lane.b32.xlu1 %v4772_v38, %s4793_s21 }
0x3f90   :  { %v3143_v40 = vpop.permute.xlu1 %3142 }
0x3f91   :  { %v3145_v23 = vmul.f32 %v4770_v59, %v3143_v40 }
0x3f93   :  { %3151 = vrot.lane.b32.xlu0 %v3145_v23, %s4794_s5 }
0x4005   :  { %v3152_v44 = vpop.permute.xlu0 %3151 }
0x4006   :  { %4228 = vmatmul.mubr.msk.f32.vlgmr.msra.gmra.mrb[30].mxu0 %vm46_vm1, %v3152_v44 }
0x40d9   :  { %v3221_v45 = vpop.f32.mrb[30].mxu0 }
0x40da   :  { %v3222_v48 = vadd.f32 %v4774_v28, %v3221_v45  ;;  %v4229_v50 = vpop.f32.mrb[31].mxu0 }
0x40dc   :  { %3225 = vst [vmem:[%s5756_s11 + $0x38] sm:$0xff] %v3222_v48 }

</bundles_post_ra>
